<compile_context>
chip_gen: v6e
topology: v6e:2x2x1
jax: 0.10.0
libtpu: 0.0.40
codegen_flags: <defaults>
</compile_context>

<pallas_src>
import functools

import jax
import jax.numpy as jnp
from jax.experimental import pallas as pl
from jax.experimental.pallas import tpu as pltpu

EPS = 1e-5  # PyTorch nn.LayerNorm default eps


# ---------------------------------------------------------------------------
# in-kernel helpers
# ---------------------------------------------------------------------------
def _layernorm(x, g, b):
    mu = jnp.mean(x, axis=-1, keepdims=True)
    var = jnp.mean((x - mu) ** 2, axis=-1, keepdims=True)
    return (x - mu) * jax.lax.rsqrt(var + EPS) * g + b


def _gelu_exact(x):
    # PyTorch nn.GELU() default is the exact (erf) formulation; input kept in f32.
    return x * 0.5 * (1.0 + jax.lax.erf(x * 0.7071067811865476))


# ---------------------------------------------------------------------------
# Pallas kernels
# ---------------------------------------------------------------------------
def transformer_stack_kernel(x_ref, vecs_ref, wqkv_ref, wo_ref, w1_ref, b1_ref, w2_ref,
                             norm_ref, o_ref, carry_ref, *,
                             heads, dim_head, block_seqs, n_pad, n_real):
    """Full Transformer: grid axis 0 = sequence blocks (parallel), axis 1 = depth (arbitrary).

    The activation block stays resident in `carry_ref` (VMEM scratch) across the depth axis;
    per-layer weights arrive as (1, in, out) blocks selected by the depth grid index.  All
    projections / FFN run on the flattened (block_seqs*n_pad, D) slab; attention is batched
    over sequences with a small per-head loop."""
    layer = pl.program_id(1)
    depth = pl.num_programs(1)

    # Layer 0: load the activation block into the resident VMEM carry.
    @pl.when(layer == 0)
    def _():
        carry_ref[...] = x_ref[...]

    d = x_ref.shape[-1]
    inner = heads * dim_head
    rows = block_seqs * n_pad

    x2 = carry_ref[...].reshape(rows, d)            # (rows, D) f32, resident across depth

    vecs = vecs_ref[0]                              # (8, D) f32 packed per-layer vectors
    ln1g, ln1b = vecs[0:1], vecs[1:2]
    bo = vecs[2:3]
    ln2g, ln2b = vecs[3:4], vecs[4:5]
    b2 = vecs[5:6]
    wqkv = wqkv_ref[0]                              # (D, 3*inner) bf16 (scale folded into wq)
    wo = wo_ref[0]                                  # (inner, D)  bf16
    w1, b1 = w1_ref[0], b1_ref[0]                   # (D, M) bf16, (1, M) f32
    w2 = w2_ref[0]                                  # (M, D) bf16

    # --- attention (PreNorm) -------------------------------------------------
    xn = _layernorm(x2, ln1g, ln1b).astype(jnp.bfloat16)            # one whole-slab LN + cast
    qkv = jnp.dot(xn, wqkv, preferred_element_type=jnp.float32)     # (rows, 3*inner), one MXU op
    qkv = qkv.astype(jnp.bfloat16).reshape(block_seqs, n_pad, 3 * inner)

    if n_real < n_pad:
        key_idx = jax.lax.broadcasted_iota(jnp.int32, (1, 1, n_pad), 2)
        key_mask = key_idx < n_real                                  # mask padded key tokens
    else:
        key_mask = None

    head_outs = []
    for h in range(heads):                                           # heads is small (4)
        q_h = qkv[..., h * dim_head:(h + 1) * dim_head]              # (Bt, n_pad, dh) bf16
        k_h = qkv[..., inner + h * dim_head: inner + (h + 1) * dim_head]
        v_h = qkv[..., 2 * inner + h * dim_head: 2 * inner + (h + 1) * dim_head]
        dots = jnp.einsum('bqd,bkd->bqk', q_h, k_h,
                          preferred_element_type=jnp.float32)        # batched over sequences
        if key_mask is not None:
            dots = jnp.where(key_mask, dots, -1e30)
        m = jnp.max(dots, axis=-1, keepdims=True)
        p = jnp.exp(dots - m)
        p = p * pl.reciprocal(jnp.sum(p, axis=-1, keepdims=True), approx=True)
        head_outs.append(jnp.einsum('bqk,bkd->bqd', p.astype(jnp.bfloat16), v_h,
                                    preferred_element_type=jnp.float32))

    ho = jnp.concatenate(head_outs, axis=-1).astype(jnp.bfloat16).reshape(rows, inner)
    attn_out = jnp.dot(ho, wo, preferred_element_type=jnp.float32) + bo
    h1 = attn_out + x2                                               # residual 1

    # --- feed-forward (PreNorm) ----------------------------------------------
    hn = _layernorm(h1, ln2g, ln2b).astype(jnp.bfloat16)
    ff = jnp.dot(hn, w1, preferred_element_type=jnp.float32) + b1
    ff = _gelu_exact(ff).astype(jnp.bfloat16)
    ff = jnp.dot(ff, w2, preferred_element_type=jnp.float32) + b2
    out = ff + h1                                                    # residual 2

    carry_ref[...] = out.reshape(block_seqs, n_pad, d)               # dense, tile-aligned store

    # Last layer: trailing LayerNorm fused here; single lane-dense store of the whole block.
    @pl.when(layer == depth - 1)
    def _():
        o_ref[...] = _layernorm(out, norm_ref[0:1], norm_ref[1:2]
                                ).astype(o_ref.dtype).reshape(block_seqs, n_pad, d)


def mlp_head_kernel(x_ref, g_ref, b_ref, w_ref, bias_ref, o_ref):
    xn = _layernorm(x_ref[...], g_ref[...], b_ref[...])
    logits = jnp.dot(xn.astype(jnp.bfloat16), w_ref[...],
                     preferred_element_type=jnp.float32) + bias_ref[...]
    o_ref[...] = logits.astype(o_ref.dtype)


# ---------------------------------------------------------------------------
# pallas_call wrappers
# ---------------------------------------------------------------------------
def _prefer_parallel_steps():
    """v7x has 2 TensorCores per device (a 'parallel' grid axis is sharded across them);
    v5e/v6e have 1, where fewer grid steps is strictly better."""
    try:
        kind = jax.devices()[0].device_kind.lower()
    except Exception:
        kind = ""
    return 2 if "v7" in kind else 1


def _pick_block_seqs(total, n_pad, d, max_block_bytes=4 << 20):
    """Sequences per grid block.  Target <= 2 sequence-block steps so per-layer weights are
    streamed at most twice; prefer 2 parallel steps on v7x (feeds both TensorCores), 1 step on
    single-core chips.  Fall back to the largest divisor whose block fits the VMEM budget."""
    bytes_per_seq = max(1, n_pad * d * 4)
    cap = max(1, min(total, max_block_bytes // bytes_per_seq))
    order = (2, 1) if _prefer_parallel_steps() == 2 else (1, 2)
    for steps in order:
        if total % steps == 0 and total // steps <= cap:
            return total // steps
    best = 1
    for c in range(1, cap + 1):
        if total % c == 0:
            best = c
    return best


def _vmem_limit_bytes(tp, bt, n_pad, d):
    """Actual working-set estimate: double-buffered per-layer weights, double-buffered in/out
    activation blocks, the resident carry, plus generous headroom.  Clamped well below the
    64 MiB physical VMEM of a v7x TensorCore."""
    per_layer = ('vecs', 'wqkv', 'w_out', 'w_ff1', 'b_ff1', 'w_ff2')
    w_bytes = sum((int(tp[n].size) // int(tp[n].shape[0])) * tp[n].dtype.itemsize
                  for n in per_layer)
    act_bytes = bt * n_pad * d * 4
    need = 2 * w_bytes + 5 * act_bytes + int(tp['norm'].size) * 4 + (4 << 20)
    return int(min(max(need, 8 << 20), 48 << 20))


def run_transformer(x, tp, heads, dim_head):
    """x: (num_seqs, N, D) f32.  Runs all layers + final LayerNorm in one pallas_call."""
    total, n_real, d = x.shape
    n_pad = ((n_real + 7) // 8) * 8                  # tile-align the token axis
    if n_pad != n_real:
        x = jnp.pad(x, ((0, 0), (0, n_pad - n_real), (0, 0)))
    depth = tp['wqkv'].shape[0]
    bt = _pick_block_seqs(total, n_pad, d)
    assert total % bt == 0

    seq_spec = pl.BlockSpec((bt, n_pad, d), lambda i, l: (i, 0, 0))

    def layer_spec(a):
        return pl.BlockSpec((1,) + a.shape[1:], lambda i, l: (l, 0, 0))

    out = pl.pallas_call(
        functools.partial(transformer_stack_kernel, heads=heads, dim_head=dim_head,
                          block_seqs=bt, n_pad=n_pad, n_real=n_real),
        out_shape=jax.ShapeDtypeStruct((total, n_pad, d), x.dtype),
        grid=(total // bt, depth),
        in_specs=[seq_spec,
                  layer_spec(tp['vecs']),
                  layer_spec(tp['wqkv']),
                  layer_spec(tp['w_out']),
                  layer_spec(tp['w_ff1']),
                  layer_spec(tp['b_ff1']),
                  layer_spec(tp['w_ff2']),
                  pl.BlockSpec(tp['norm'].shape, lambda i, l: (0, 0))],
        out_specs=seq_spec,
        scratch_shapes=[pltpu.VMEM((bt, n_pad, d), jnp.float32)],
        compiler_params=pltpu.CompilerParams(
            dimension_semantics=("parallel", "arbitrary"),
            vmem_limit_bytes=_vmem_limit_bytes(tp, bt, n_pad, d)),
    )(x, tp['vecs'], tp['wqkv'], tp['w_out'], tp['w_ff1'], tp['b_ff1'], tp['w_ff2'], tp['norm'])

    if n_pad != n_real:
        out = out[:, :n_real]
    return out


def mlp_head(x, p):
    B, D = x.shape
    Cp = p['w'].shape[1]                              # classes padded to a multiple of 128
    return pl.pallas_call(
        mlp_head_kernel,
        out_shape=jax.ShapeDtypeStruct((B, Cp), x.dtype),
        grid=(1,),
        in_specs=[pl.BlockSpec((B, D), lambda i: (0, 0)),
                  pl.BlockSpec((1, D), lambda i: (0, 0)),
                  pl.BlockSpec((1, D), lambda i: (0, 0)),
                  pl.BlockSpec((D, Cp), lambda i: (0, 0)),
                  pl.BlockSpec((1, Cp), lambda i: (0, 0))],
        out_specs=pl.BlockSpec((B, Cp), lambda i: (0, 0)),
    )(x, p['ln_g'], p['ln_b'], p['w'], p['b'])


# ---------------------------------------------------------------------------
# parameter init (deterministic, synthetic); matmul weights stored in bf16
# ---------------------------------------------------------------------------
def init_transformer_params(key, dim, depth, heads, dim_head, mlp_dim):
    inner = heads * dim_head
    scale = dim_head ** -0.5
    ks = jax.random.split(key, 6)

    def w(k, shape):
        return jax.random.normal(k, shape, jnp.float32) * 0.02

    # Packed QKV weight: softmax scale folded into the wq slice.
    wq = w(ks[0], (depth, dim, inner)) * scale
    wk = w(ks[1], (depth, dim, inner))
    wv = w(ks[2], (depth, dim, inner))
    wqkv = jnp.concatenate([wq, wk, wv], axis=-1).astype(jnp.bfloat16)

    ones_d = jnp.ones((depth, 1, dim), jnp.float32)
    zeros_d = jnp.zeros((depth, 1, dim), jnp.float32)
    # Packed per-layer f32 vectors, rows: [ln1_g, ln1_b, b_out, ln2_g, ln2_b, b_ff2, pad, pad]
    vecs = jnp.concatenate([ones_d, zeros_d, zeros_d, ones_d, zeros_d, zeros_d,
                            zeros_d, zeros_d], axis=1)               # (depth, 8, dim)

    return dict(
        vecs=vecs,
        wqkv=wqkv,
        w_out=w(ks[3], (depth, inner, dim)).astype(jnp.bfloat16),
        w_ff1=w(ks[4], (depth, dim, mlp_dim)).astype(jnp.bfloat16),
        b_ff1=jnp.zeros((depth, 1, mlp_dim), jnp.float32),
        w_ff2=w(ks[5], (depth, mlp_dim, dim)).astype(jnp.bfloat16),
        norm=jnp.concatenate([jnp.ones((1, dim), jnp.float32),
                              jnp.zeros((1, dim), jnp.float32)], axis=0),   # (2, dim)
    )


def init_vivit_params(key, *, image_size, patch_size, num_classes, num_frames,
                      dim, depth, heads, dim_head, scale_dim):
    num_patches = (image_size // patch_size) ** 2
    key, k_pos, k_sp, k_tmp, k_head, k_space, k_temporal = jax.random.split(key, 7)
    space = init_transformer_params(k_space, dim, depth, heads, dim_head, dim * scale_dim)
    temporal = init_transformer_params(k_temporal, dim, depth, heads, dim_head, dim * scale_dim)

    c_pad = ((num_classes + 127) // 128) * 128        # lane-dense classifier store
    w_head = jax.random.normal(k_head, (dim, num_classes), jnp.float32) * 0.02
    w_head = jnp.pad(w_head, ((0, 0), (0, c_pad - num_classes))).astype(jnp.bfloat16)

    return dict(
        pos_embedding=jax.random.normal(k_pos, (1, num_frames, num_patches + 1, dim),
                                        jnp.float32),
        space_token=jax.random.normal(k_sp, (1, 1, dim), jnp.float32),
        temporal_token=jax.random.normal(k_tmp, (1, 1, dim), jnp.float32),
        space_transformer=space,
        temporal_transformer=temporal,
        head=dict(
            ln_g=jnp.ones((1, dim), jnp.float32),
            ln_b=jnp.zeros((1, dim), jnp.float32),
            w=w_head,
            b=jnp.zeros((1, c_pad), jnp.float32),
        ),
    )


# ---------------------------------------------------------------------------
# ViViT forward (glue in plain JAX, compute in Pallas)
# ---------------------------------------------------------------------------
def vivit_forward(x, params, *, patch_size, dim, heads, dim_head, num_classes, pool='cls'):
    b, t, c, H, W = x.shape
    p = patch_size
    h, w = H // p, W // p
    # to_patch_embedding: 'b t c (h p1) (w p2) -> b t (h w) (p1 p2 c)'
    x = x.reshape(b, t, c, h, p, w, p)
    x = x.transpose(0, 1, 3, 5, 4, 6, 2)
    x = x.reshape(b, t, h * w, p * p * c)
    n = x.shape[2]

    cls_space = jnp.broadcast_to(params['space_token'][None], (b, t, 1, dim))
    x = jnp.concatenate([cls_space, x], axis=2)
    x = x + params['pos_embedding'][:, :, :n + 1]
    # dropout / emb_dropout are identity at inference (p=0.0)

    x = x.reshape(b * t, n + 1, dim)
    x = run_transformer(x, params['space_transformer'], heads, dim_head)

    x = x[:, 0].reshape(b, t, dim)
    cls_temporal = jnp.broadcast_to(params['temporal_token'], (b, 1, dim))
    x = jnp.concatenate([cls_temporal, x], axis=1)
    x = run_transformer(x, params['temporal_transformer'], heads, dim_head)

    x = x.mean(axis=1) if pool == 'mean' else x[:, 0]
    logits = mlp_head(x, params['head'])
    return logits[:, :num_classes]


if __name__ == "__main__":
    # Small config.  The PyTorch module has no linear patch projection, so the rearranged
    # patch dim (in_channels * patch_size**2) must equal `dim`.  Chosen so dim = 128
    # (lane-dense stores) and inner = heads*dim_head = 128.
    image_size, patch_size, in_channels = 8, 4, 8
    num_frames, num_classes = 4, 10
    dim = in_channels * patch_size ** 2          # 128
    depth, heads, dim_head, scale_dim = 2, 4, 32, 2
    batch = 2

    key = jax.random.PRNGKey(0)
    key, k_x = jax.random.split(key)
    x = jax.random.normal(k_x, (batch, num_frames, in_channels, image_size, image_size),
                          jnp.float32)
    params = init_vivit_params(key, image_size=image_size, patch_size=patch_size,
                               num_classes=num_classes, num_frames=num_frames,
                               dim=dim, depth=depth, heads=heads, dim_head=dim_head,
                               scale_dim=scale_dim)

    out = vivit_forward(x, params, patch_size=patch_size, dim=dim, heads=heads,
                        dim_head=dim_head, num_classes=num_classes, pool='cls')
    out = jax.block_until_ready(out)
    assert out.shape == (batch, num_classes), out.shape
    print("KERNEL_OK")
</pallas_src>

<mosaic_0001>
module attributes {stable_mosaic.version = 11 : i64} {
  func.func @transformer_stack_kernel(%arg0: i32, %arg1: i32, %arg2: memref<8x8x128xf32, #tpu.memory_space<vmem>>, %arg3: memref<1x8x128xf32, #tpu.memory_space<vmem>>, %arg4: memref<1x128x384xbf16, #tpu.memory_space<vmem>>, %arg5: memref<1x128x128xbf16, #tpu.memory_space<vmem>>, %arg6: memref<1x128x256xbf16, #tpu.memory_space<vmem>>, %arg7: memref<1x1x256xf32, #tpu.memory_space<vmem>>, %arg8: memref<1x256x128xbf16, #tpu.memory_space<vmem>>, %arg9: memref<2x128xf32, #tpu.memory_space<vmem>>, %arg10: memref<8x8x128xf32, #tpu.memory_space<vmem>>, %arg11: memref<8x8x128xf32, #tpu.memory_space<vmem>>) attributes {dimension_semantics = [#tpu.dimension_semantics<parallel>, #tpu.dimension_semantics<arbitrary>], iteration_bounds = array<i64: 1, 2>, scalar_prefetch = 0 : i64, scratch_operands = 1 : i64, tpu.core_type = #tpu.core_type<tc>, window_params = [{transform_indices = @transform_0, window_bounds = array<i64: 8, 8, 128>}, {transform_indices = @transform_1, window_bounds = array<i64: 1, 8, 128>}, {transform_indices = @transform_2, window_bounds = array<i64: 1, 128, 384>}, {transform_indices = @transform_3, window_bounds = array<i64: 1, 128, 128>}, {transform_indices = @transform_4, window_bounds = array<i64: 1, 128, 256>}, {transform_indices = @transform_5, window_bounds = array<i64: 1, 1, 256>}, {transform_indices = @transform_6, window_bounds = array<i64: 1, 256, 128>}, {pipeline_mode = #tpu.pipeline_mode<synchronous>, transform_indices = @transform_7, window_bounds = array<i64: 2, 128>}, {transform_indices = @transform_8, window_bounds = array<i64: 8, 8, 128>}]} {
    %c0_i32 = arith.constant 0 : i32
    %0 = arith.cmpi eq, %arg1, %c0_i32 : i32
    %1 = arith.extui %0 : i1 to i32
    %c0_i32_0 = arith.constant 0 : i32
    %2 = arith.cmpi ne, %1, %c0_i32_0 : i32
    scf.if %2 {
      %c0_61 = arith.constant 0 : index
      %c0_62 = arith.constant 0 : index
      %c0_63 = arith.constant 0 : index
      %183 = vector.load %arg2[%c0_61, %c0_62, %c0_63] : memref<8x8x128xf32, #tpu.memory_space<vmem>>, vector<8x8x128xf32>
      %c0_64 = arith.constant 0 : index
      %c0_65 = arith.constant 0 : index
      %c0_66 = arith.constant 0 : index
      %184 = vector.load %arg11[%c0_64, %c0_65, %c0_66] : memref<8x8x128xf32, #tpu.memory_space<vmem>>, vector<8x8x128xf32>
      tpu.vector_store %arg11[%c0_64, %c0_65, %c0_66], %183 {strides = array<i32>} : memref<8x8x128xf32, #tpu.memory_space<vmem>>, vector<8x8x128xf32>,
    } else {
    }
    %c0 = arith.constant 0 : index
    %c0_1 = arith.constant 0 : index
    %c0_2 = arith.constant 0 : index
    %3 = vector.load %arg11[%c0, %c0_1, %c0_2] : memref<8x8x128xf32, #tpu.memory_space<vmem>>, vector<8x8x128xf32>
    %4 = vector.shape_cast %3 : vector<8x8x128xf32> to vector<64x128xf32>
    %c0_3 = arith.constant 0 : index
    %c0_4 = arith.constant 0 : index
    %c0_5 = arith.constant 0 : index
    %5 = vector.load %arg3[%c0_3, %c0_4, %c0_5] : memref<1x8x128xf32, #tpu.memory_space<vmem>>, vector<1x8x128xf32>
    %6 = vector.shape_cast %5 : vector<1x8x128xf32> to vector<8x128xf32>
    %7 = vector.extract_strided_slice %6 {offsets = [0, 0], sizes = [1, 128], strides = [1, 1]} : vector<8x128xf32> to vector<1x128xf32>
    %8 = vector.extract_strided_slice %6 {offsets = [1, 0], sizes = [1, 128], strides = [1, 1]} : vector<8x128xf32> to vector<1x128xf32>
    %9 = vector.extract_strided_slice %6 {offsets = [2, 0], sizes = [1, 128], strides = [1, 1]} : vector<8x128xf32> to vector<1x128xf32>
    %10 = vector.extract_strided_slice %6 {offsets = [3, 0], sizes = [1, 128], strides = [1, 1]} : vector<8x128xf32> to vector<1x128xf32>
    %11 = vector.extract_strided_slice %6 {offsets = [4, 0], sizes = [1, 128], strides = [1, 1]} : vector<8x128xf32> to vector<1x128xf32>
    %12 = vector.extract_strided_slice %6 {offsets = [5, 0], sizes = [1, 128], strides = [1, 1]} : vector<8x128xf32> to vector<1x128xf32>
    %c0_6 = arith.constant 0 : index
    %c0_7 = arith.constant 0 : index
    %c0_8 = arith.constant 0 : index
    %13 = vector.load %arg4[%c0_6, %c0_7, %c0_8] : memref<1x128x384xbf16, #tpu.memory_space<vmem>>, vector<1x128x384xbf16>
    %14 = vector.shape_cast %13 : vector<1x128x384xbf16> to vector<128x384xbf16>
    %c0_9 = arith.constant 0 : index
    %c0_10 = arith.constant 0 : index
    %c0_11 = arith.constant 0 : index
    %15 = vector.load %arg5[%c0_9, %c0_10, %c0_11] : memref<1x128x128xbf16, #tpu.memory_space<vmem>>, vector<1x128x128xbf16>
    %16 = vector.shape_cast %15 : vector<1x128x128xbf16> to vector<128x128xbf16>
    %c0_12 = arith.constant 0 : index
    %c0_13 = arith.constant 0 : index
    %c0_14 = arith.constant 0 : index
    %17 = vector.load %arg6[%c0_12, %c0_13, %c0_14] : memref<1x128x256xbf16, #tpu.memory_space<vmem>>, vector<1x128x256xbf16>
    %18 = vector.shape_cast %17 : vector<1x128x256xbf16> to vector<128x256xbf16>
    %c0_15 = arith.constant 0 : index
    %c0_16 = arith.constant 0 : index
    %c0_17 = arith.constant 0 : index
    %19 = vector.load %arg7[%c0_15, %c0_16, %c0_17] : memref<1x1x256xf32, #tpu.memory_space<vmem>>, vector<1x1x256xf32>
    %20 = vector.shape_cast %19 : vector<1x1x256xf32> to vector<1x256xf32>
    %c0_18 = arith.constant 0 : index
    %c0_19 = arith.constant 0 : index
    %c0_20 = arith.constant 0 : index
    %21 = vector.load %arg8[%c0_18, %c0_19, %c0_20] : memref<1x256x128xbf16, #tpu.memory_space<vmem>>, vector<1x256x128xbf16>
    %22 = vector.shape_cast %21 : vector<1x256x128xbf16> to vector<256x128xbf16>
    %cst = arith.constant dense<0.000000e+00> : vector<64xf32>
    %23 = vector.multi_reduction <add>, %4, %cst [1] : vector<64x128xf32> to vector<64xf32>
    %24 = vector.shape_cast %23 : vector<64xf32> to vector<64x1xf32>
    %cst_21 = arith.constant 1.280000e+02 : f32
    %25 = vector.broadcast %cst_21 : f32 to vector<64x1xf32>
    %26 = arith.divf %24, %25 : vector<64x1xf32>
    %27 = vector.broadcast %26 : vector<64x1xf32> to vector<64x128xf32>
    %28 = arith.subf %4, %27 : vector<64x128xf32>
    %29 = arith.mulf %28, %28 : vector<64x128xf32>
    %cst_22 = arith.constant dense<0.000000e+00> : vector<64xf32>
    %30 = vector.multi_reduction <add>, %29, %cst_22 [1] : vector<64x128xf32> to vector<64xf32>
    %31 = vector.shape_cast %30 : vector<64xf32> to vector<64x1xf32>
    %cst_23 = arith.constant 1.280000e+02 : f32
    %32 = vector.broadcast %cst_23 : f32 to vector<64x1xf32>
    %33 = arith.divf %31, %32 : vector<64x1xf32>
    %34 = vector.broadcast %26 : vector<64x1xf32> to vector<64x128xf32>
    %35 = arith.subf %4, %34 : vector<64x128xf32>
    %cst_24 = arith.constant 9.99999974E-6 : f32
    %36 = vector.broadcast %cst_24 : f32 to vector<64x1xf32>
    %37 = arith.addf %33, %36 : vector<64x1xf32>
    %38 = math.rsqrt %37 : vector<64x1xf32>
    %39 = vector.broadcast %38 : vector<64x1xf32> to vector<64x128xf32>
    %40 = arith.mulf %35, %39 : vector<64x128xf32>
    %41 = vector.broadcast %7 : vector<1x128xf32> to vector<64x128xf32>
    %42 = arith.mulf %40, %41 : vector<64x128xf32>
    %43 = vector.broadcast %8 : vector<1x128xf32> to vector<64x128xf32>
    %44 = arith.addf %42, %43 : vector<64x128xf32>
    %45 = arith.truncf %44 : vector<64x128xf32> to vector<64x128xbf16>
    %cst_25 = arith.constant dense<0.000000e+00> : vector<64x384xf32>
    %46 = tpu.matmul %45, %14, %cst_25 {dimension_numbers = #tpu.dot_dimension_numbers<[1], [0], [0], [1], [0, 0, 1, 1], [], []>} : vector<64x128xbf16>, vector<128x384xbf16>, vector<64x384xf32> -> vector<64x384xf32>
    %47 = arith.truncf %46 : vector<64x384xf32> to vector<64x384xbf16>
    %48 = vector.shape_cast %47 : vector<64x384xbf16> to vector<8x8x384xbf16>
    %49 = tpu.iota {dimensions = array<i32: 2>} : vector<1x1x8xi32>
    %c5_i32 = arith.constant 5 : i32
    %50 = vector.broadcast %c5_i32 : i32 to vector<1x1x8xi32>
    %51 = arith.cmpi slt, %49, %50 : vector<1x1x8xi32>
    %52 = vector.extract_strided_slice %48 {offsets = [0, 0, 0], sizes = [8, 8, 32], strides = [1, 1, 1]} : vector<8x8x384xbf16> to vector<8x8x32xbf16>
    %53 = vector.extract_strided_slice %48 {offsets = [0, 0, 128], sizes = [8, 8, 32], strides = [1, 1, 1]} : vector<8x8x384xbf16> to vector<8x8x32xbf16>
    %54 = vector.extract_strided_slice %48 {offsets = [0, 0, 256], sizes = [8, 8, 32], strides = [1, 1, 1]} : vector<8x8x384xbf16> to vector<8x8x32xbf16>
    "tpu.trace_start"() <{level = 10 : i32, message = "bqd,bkd->bqk"}> : () -> ()
    %cst_26 = arith.constant dense<0.000000e+00> : vector<8x8x8xf32>
    %55 = tpu.matmul %52, %53, %cst_26 {dimension_numbers = #tpu.dot_dimension_numbers<[2], [2], [1], [1], [0, 0, 0, 1, 1, 1], [0], [0]>} : vector<8x8x32xbf16>, vector<8x8x32xbf16>, vector<8x8x8xf32> -> vector<8x8x8xf32>
    %cst_27 = arith.constant -1.000000e+30 : f32
    "tpu.trace_stop"() : () -> ()
    %56 = vector.shape_cast %51 : vector<1x1x8xi1> to vector<1x1x8xi1>
    %57 = vector.broadcast %56 : vector<1x1x8xi1> to vector<8x8x8xi1>
    %58 = vector.broadcast %cst_27 : f32 to vector<8x8x8xf32>
    %59 = arith.select %57, %55, %58 : vector<8x8x8xi1>, vector<8x8x8xf32>
    %cst_28 = arith.constant dense<0xFF800000> : vector<8x8xf32>
    %60 = vector.multi_reduction <maximumf>, %59, %cst_28 [2] : vector<8x8x8xf32> to vector<8x8xf32>
    %61 = vector.shape_cast %60 : vector<8x8xf32> to vector<8x8x1xf32>
    %62 = vector.broadcast %61 : vector<8x8x1xf32> to vector<8x8x8xf32>
    %63 = arith.subf %59, %62 : vector<8x8x8xf32>
    %64 = math.exp %63 : vector<8x8x8xf32>
    %cst_29 = arith.constant dense<0.000000e+00> : vector<8x8xf32>
    %65 = vector.multi_reduction <add>, %64, %cst_29 [2] : vector<8x8x8xf32> to vector<8x8xf32>
    %66 = vector.shape_cast %65 : vector<8x8xf32> to vector<8x8x1xf32>
    %67 = tpu.reciprocal %66 {approx = true} : vector<8x8x1xf32> -> vector<8x8x1xf32>
    %68 = vector.broadcast %67 : vector<8x8x1xf32> to vector<8x8x8xf32>
    %69 = arith.mulf %64, %68 : vector<8x8x8xf32>
    %70 = arith.truncf %69 : vector<8x8x8xf32> to vector<8x8x8xbf16>
    "tpu.trace_start"() <{level = 10 : i32, message = "bqk,bkd->bqd"}> : () -> ()
    %cst_30 = arith.constant dense<0.000000e+00> : vector<8x8x32xf32>
    %71 = tpu.matmul %70, %54, %cst_30 {dimension_numbers = #tpu.dot_dimension_numbers<[2], [1], [1], [2], [0, 0, 0, 1, 1, 2], [0], [0]>} : vector<8x8x8xbf16>, vector<8x8x32xbf16>, vector<8x8x32xf32> -> vector<8x8x32xf32>
    "tpu.trace_stop"() : () -> ()
    %72 = vector.extract_strided_slice %48 {offsets = [0, 0, 32], sizes = [8, 8, 32], strides = [1, 1, 1]} : vector<8x8x384xbf16> to vector<8x8x32xbf16>
    %73 = vector.extract_strided_slice %48 {offsets = [0, 0, 160], sizes = [8, 8, 32], strides = [1, 1, 1]} : vector<8x8x384xbf16> to vector<8x8x32xbf16>
    %74 = vector.extract_strided_slice %48 {offsets = [0, 0, 288], sizes = [8, 8, 32], strides = [1, 1, 1]} : vector<8x8x384xbf16> to vector<8x8x32xbf16>
    "tpu.trace_start"() <{level = 10 : i32, message = "bqd,bkd->bqk"}> : () -> ()
    %cst_31 = arith.constant dense<0.000000e+00> : vector<8x8x8xf32>
    %75 = tpu.matmul %72, %73, %cst_31 {dimension_numbers = #tpu.dot_dimension_numbers<[2], [2], [1], [1], [0, 0, 0, 1, 1, 1], [0], [0]>} : vector<8x8x32xbf16>, vector<8x8x32xbf16>, vector<8x8x8xf32> -> vector<8x8x8xf32>
    %cst_32 = arith.constant -1.000000e+30 : f32
    "tpu.trace_stop"() : () -> ()
    %76 = vector.shape_cast %51 : vector<1x1x8xi1> to vector<1x1x8xi1>
    %77 = vector.broadcast %76 : vector<1x1x8xi1> to vector<8x8x8xi1>
    %78 = vector.broadcast %cst_32 : f32 to vector<8x8x8xf32>
    %79 = arith.select %77, %75, %78 : vector<8x8x8xi1>, vector<8x8x8xf32>
    %cst_33 = arith.constant dense<0xFF800000> : vector<8x8xf32>
    %80 = vector.multi_reduction <maximumf>, %79, %cst_33 [2] : vector<8x8x8xf32> to vector<8x8xf32>
    %81 = vector.shape_cast %80 : vector<8x8xf32> to vector<8x8x1xf32>
    %82 = vector.broadcast %81 : vector<8x8x1xf32> to vector<8x8x8xf32>
    %83 = arith.subf %79, %82 : vector<8x8x8xf32>
    %84 = math.exp %83 : vector<8x8x8xf32>
    %cst_34 = arith.constant dense<0.000000e+00> : vector<8x8xf32>
    %85 = vector.multi_reduction <add>, %84, %cst_34 [2] : vector<8x8x8xf32> to vector<8x8xf32>
    %86 = vector.shape_cast %85 : vector<8x8xf32> to vector<8x8x1xf32>
    %87 = tpu.reciprocal %86 {approx = true} : vector<8x8x1xf32> -> vector<8x8x1xf32>
    %88 = vector.broadcast %87 : vector<8x8x1xf32> to vector<8x8x8xf32>
    %89 = arith.mulf %84, %88 : vector<8x8x8xf32>
    %90 = arith.truncf %89 : vector<8x8x8xf32> to vector<8x8x8xbf16>
    "tpu.trace_start"() <{level = 10 : i32, message = "bqk,bkd->bqd"}> : () -> ()
    %cst_35 = arith.constant dense<0.000000e+00> : vector<8x8x32xf32>
    %91 = tpu.matmul %90, %74, %cst_35 {dimension_numbers = #tpu.dot_dimension_numbers<[2], [1], [1], [2], [0, 0, 0, 1, 1, 2], [0], [0]>} : vector<8x8x8xbf16>, vector<8x8x32xbf16>, vector<8x8x32xf32> -> vector<8x8x32xf32>
    "tpu.trace_stop"() : () -> ()
    %92 = vector.extract_strided_slice %48 {offsets = [0, 0, 64], sizes = [8, 8, 32], strides = [1, 1, 1]} : vector<8x8x384xbf16> to vector<8x8x32xbf16>
    %93 = vector.extract_strided_slice %48 {offsets = [0, 0, 192], sizes = [8, 8, 32], strides = [1, 1, 1]} : vector<8x8x384xbf16> to vector<8x8x32xbf16>
    %94 = vector.extract_strided_slice %48 {offsets = [0, 0, 320], sizes = [8, 8, 32], strides = [1, 1, 1]} : vector<8x8x384xbf16> to vector<8x8x32xbf16>
    "tpu.trace_start"() <{level = 10 : i32, message = "bqd,bkd->bqk"}> : () -> ()
    %cst_36 = arith.constant dense<0.000000e+00> : vector<8x8x8xf32>
    %95 = tpu.matmul %92, %93, %cst_36 {dimension_numbers = #tpu.dot_dimension_numbers<[2], [2], [1], [1], [0, 0, 0, 1, 1, 1], [0], [0]>} : vector<8x8x32xbf16>, vector<8x8x32xbf16>, vector<8x8x8xf32> -> vector<8x8x8xf32>
    %cst_37 = arith.constant -1.000000e+30 : f32
    "tpu.trace_stop"() : () -> ()
    %96 = vector.shape_cast %51 : vector<1x1x8xi1> to vector<1x1x8xi1>
    %97 = vector.broadcast %96 : vector<1x1x8xi1> to vector<8x8x8xi1>
    %98 = vector.broadcast %cst_37 : f32 to vector<8x8x8xf32>
    %99 = arith.select %97, %95, %98 : vector<8x8x8xi1>, vector<8x8x8xf32>
    %cst_38 = arith.constant dense<0xFF800000> : vector<8x8xf32>
    %100 = vector.multi_reduction <maximumf>, %99, %cst_38 [2] : vector<8x8x8xf32> to vector<8x8xf32>
    %101 = vector.shape_cast %100 : vector<8x8xf32> to vector<8x8x1xf32>
    %102 = vector.broadcast %101 : vector<8x8x1xf32> to vector<8x8x8xf32>
    %103 = arith.subf %99, %102 : vector<8x8x8xf32>
    %104 = math.exp %103 : vector<8x8x8xf32>
    %cst_39 = arith.constant dense<0.000000e+00> : vector<8x8xf32>
    %105 = vector.multi_reduction <add>, %104, %cst_39 [2] : vector<8x8x8xf32> to vector<8x8xf32>
    %106 = vector.shape_cast %105 : vector<8x8xf32> to vector<8x8x1xf32>
    %107 = tpu.reciprocal %106 {approx = true} : vector<8x8x1xf32> -> vector<8x8x1xf32>
    %108 = vector.broadcast %107 : vector<8x8x1xf32> to vector<8x8x8xf32>
    %109 = arith.mulf %104, %108 : vector<8x8x8xf32>
    %110 = arith.truncf %109 : vector<8x8x8xf32> to vector<8x8x8xbf16>
    "tpu.trace_start"() <{level = 10 : i32, message = "bqk,bkd->bqd"}> : () -> ()
    %cst_40 = arith.constant dense<0.000000e+00> : vector<8x8x32xf32>
    %111 = tpu.matmul %110, %94, %cst_40 {dimension_numbers = #tpu.dot_dimension_numbers<[2], [1], [1], [2], [0, 0, 0, 1, 1, 2], [0], [0]>} : vector<8x8x8xbf16>, vector<8x8x32xbf16>, vector<8x8x32xf32> -> vector<8x8x32xf32>
    "tpu.trace_stop"() : () -> ()
    %112 = vector.extract_strided_slice %48 {offsets = [0, 0, 96], sizes = [8, 8, 32], strides = [1, 1, 1]} : vector<8x8x384xbf16> to vector<8x8x32xbf16>
    %113 = vector.extract_strided_slice %48 {offsets = [0, 0, 224], sizes = [8, 8, 32], strides = [1, 1, 1]} : vector<8x8x384xbf16> to vector<8x8x32xbf16>
    %114 = vector.extract_strided_slice %48 {offsets = [0, 0, 352], sizes = [8, 8, 32], strides = [1, 1, 1]} : vector<8x8x384xbf16> to vector<8x8x32xbf16>
    "tpu.trace_start"() <{level = 10 : i32, message = "bqd,bkd->bqk"}> : () -> ()
    %cst_41 = arith.constant dense<0.000000e+00> : vector<8x8x8xf32>
    %115 = tpu.matmul %112, %113, %cst_41 {dimension_numbers = #tpu.dot_dimension_numbers<[2], [2], [1], [1], [0, 0, 0, 1, 1, 1], [0], [0]>} : vector<8x8x32xbf16>, vector<8x8x32xbf16>, vector<8x8x8xf32> -> vector<8x8x8xf32>
    %cst_42 = arith.constant -1.000000e+30 : f32
    "tpu.trace_stop"() : () -> ()
    %116 = vector.shape_cast %51 : vector<1x1x8xi1> to vector<1x1x8xi1>
    %117 = vector.broadcast %116 : vector<1x1x8xi1> to vector<8x8x8xi1>
    %118 = vector.broadcast %cst_42 : f32 to vector<8x8x8xf32>
    %119 = arith.select %117, %115, %118 : vector<8x8x8xi1>, vector<8x8x8xf32>
    %cst_43 = arith.constant dense<0xFF800000> : vector<8x8xf32>
    %120 = vector.multi_reduction <maximumf>, %119, %cst_43 [2] : vector<8x8x8xf32> to vector<8x8xf32>
    %121 = vector.shape_cast %120 : vector<8x8xf32> to vector<8x8x1xf32>
    %122 = vector.broadcast %121 : vector<8x8x1xf32> to vector<8x8x8xf32>
    %123 = arith.subf %119, %122 : vector<8x8x8xf32>
    %124 = math.exp %123 : vector<8x8x8xf32>
    %cst_44 = arith.constant dense<0.000000e+00> : vector<8x8xf32>
    %125 = vector.multi_reduction <add>, %124, %cst_44 [2] : vector<8x8x8xf32> to vector<8x8xf32>
    %126 = vector.shape_cast %125 : vector<8x8xf32> to vector<8x8x1xf32>
    %127 = tpu.reciprocal %126 {approx = true} : vector<8x8x1xf32> -> vector<8x8x1xf32>
    %128 = vector.broadcast %127 : vector<8x8x1xf32> to vector<8x8x8xf32>
    %129 = arith.mulf %124, %128 : vector<8x8x8xf32>
    %130 = arith.truncf %129 : vector<8x8x8xf32> to vector<8x8x8xbf16>
    "tpu.trace_start"() <{level = 10 : i32, message = "bqk,bkd->bqd"}> : () -> ()
    %cst_45 = arith.constant dense<0.000000e+00> : vector<8x8x32xf32>
    %131 = tpu.matmul %130, %114, %cst_45 {dimension_numbers = #tpu.dot_dimension_numbers<[2], [1], [1], [2], [0, 0, 0, 1, 1, 2], [0], [0]>} : vector<8x8x8xbf16>, vector<8x8x32xbf16>, vector<8x8x32xf32> -> vector<8x8x32xf32>
    "tpu.trace_stop"() : () -> ()
    %132 = tpu.concatenate %71, %91, %111, %131 in 2 : vector<8x8x32xf32>, vector<8x8x32xf32>, vector<8x8x32xf32>, vector<8x8x32xf32> -> vector<8x8x128xf32>
    %133 = arith.truncf %132 : vector<8x8x128xf32> to vector<8x8x128xbf16>
    %134 = vector.shape_cast %133 : vector<8x8x128xbf16> to vector<64x128xbf16>
    %cst_46 = arith.constant dense<0.000000e+00> : vector<64x128xf32>
    %135 = tpu.matmul %134, %16, %cst_46 {dimension_numbers = #tpu.dot_dimension_numbers<[1], [0], [0], [1], [0, 0, 1, 1], [], []>} : vector<64x128xbf16>, vector<128x128xbf16>, vector<64x128xf32> -> vector<64x128xf32>
    %136 = vector.broadcast %9 : vector<1x128xf32> to vector<64x128xf32>
    %137 = arith.addf %135, %136 : vector<64x128xf32>
    %138 = arith.addf %137, %4 : vector<64x128xf32>
    %cst_47 = arith.constant dense<0.000000e+00> : vector<64xf32>
    %139 = vector.multi_reduction <add>, %138, %cst_47 [1] : vector<64x128xf32> to vector<64xf32>
    %140 = vector.shape_cast %139 : vector<64xf32> to vector<64x1xf32>
    %cst_48 = arith.constant 1.280000e+02 : f32
    %141 = vector.broadcast %cst_48 : f32 to vector<64x1xf32>
    %142 = arith.divf %140, %141 : vector<64x1xf32>
    %143 = vector.broadcast %142 : vector<64x1xf32> to vector<64x128xf32>
    %144 = arith.subf %138, %143 : vector<64x128xf32>
    %145 = arith.mulf %144, %144 : vector<64x128xf32>
    %cst_49 = arith.constant dense<0.000000e+00> : vector<64xf32>
    %146 = vector.multi_reduction <add>, %145, %cst_49 [1] : vector<64x128xf32> to vector<64xf32>
    %147 = vector.shape_cast %146 : vector<64xf32> to vector<64x1xf32>
    %cst_50 = arith.constant 1.280000e+02 : f32
    %148 = vector.broadcast %cst_50 : f32 to vector<64x1xf32>
    %149 = arith.divf %147, %148 : vector<64x1xf32>
    %150 = vector.broadcast %142 : vector<64x1xf32> to vector<64x128xf32>
    %151 = arith.subf %138, %150 : vector<64x128xf32>
    %cst_51 = arith.constant 9.99999974E-6 : f32
    %152 = vector.broadcast %cst_51 : f32 to vector<64x1xf32>
    %153 = arith.addf %149, %152 : vector<64x1xf32>
    %154 = math.rsqrt %153 : vector<64x1xf32>
    %155 = vector.broadcast %154 : vector<64x1xf32> to vector<64x128xf32>
    %156 = arith.mulf %151, %155 : vector<64x128xf32>
    %157 = vector.broadcast %10 : vector<1x128xf32> to vector<64x128xf32>
    %158 = arith.mulf %156, %157 : vector<64x128xf32>
    %159 = vector.broadcast %11 : vector<1x128xf32> to vector<64x128xf32>
    %160 = arith.addf %158, %159 : vector<64x128xf32>
    %161 = arith.truncf %160 : vector<64x128xf32> to vector<64x128xbf16>
    %cst_52 = arith.constant dense<0.000000e+00> : vector<64x256xf32>
    %162 = tpu.matmul %161, %18, %cst_52 {dimension_numbers = #tpu.dot_dimension_numbers<[1], [0], [0], [1], [0, 0, 1, 1], [], []>} : vector<64x128xbf16>, vector<128x256xbf16>, vector<64x256xf32> -> vector<64x256xf32>
    %163 = vector.broadcast %20 : vector<1x256xf32> to vector<64x256xf32>
    %164 = arith.addf %162, %163 : vector<64x256xf32>
    %cst_53 = arith.constant 5.000000e-01 : f32
    %165 = vector.broadcast %cst_53 : f32 to vector<64x256xf32>
    %166 = arith.mulf %164, %165 : vector<64x256xf32>
    %cst_54 = arith.constant 0.707106769 : f32
    %167 = vector.broadcast %cst_54 : f32 to vector<64x256xf32>
    %168 = arith.mulf %164, %167 : vector<64x256xf32>
    %169 = math.erf %168 : vector<64x256xf32>
    %cst_55 = arith.constant 1.000000e+00 : f32
    %170 = vector.broadcast %cst_55 : f32 to vector<64x256xf32>
    %171 = arith.addf %170, %169 : vector<64x256xf32>
    %172 = arith.mulf %166, %171 : vector<64x256xf32>
    %173 = arith.truncf %172 : vector<64x256xf32> to vector<64x256xbf16>
    %cst_56 = arith.constant dense<0.000000e+00> : vector<64x128xf32>
    %174 = tpu.matmul %173, %22, %cst_56 {dimension_numbers = #tpu.dot_dimension_numbers<[1], [0], [0], [1], [0, 0, 1, 1], [], []>} : vector<64x256xbf16>, vector<256x128xbf16>, vector<64x128xf32> -> vector<64x128xf32>
    %175 = vector.broadcast %12 : vector<1x128xf32> to vector<64x128xf32>
    %176 = arith.addf %174, %175 : vector<64x128xf32>
    %177 = arith.addf %176, %138 : vector<64x128xf32>
    %178 = vector.shape_cast %177 : vector<64x128xf32> to vector<8x8x128xf32>
    %c0_57 = arith.constant 0 : index
    %c0_58 = arith.constant 0 : index
    %c0_59 = arith.constant 0 : index
    %179 = vector.load %arg11[%c0_57, %c0_58, %c0_59] : memref<8x8x128xf32, #tpu.memory_space<vmem>>, vector<8x8x128xf32>
    tpu.vector_store %arg11[%c0_57, %c0_58, %c0_59], %178 {strides = array<i32>} : memref<8x8x128xf32, #tpu.memory_space<vmem>>, vector<8x8x128xf32>,
    %c1_i32 = arith.constant 1 : i32
    %180 = arith.cmpi eq, %arg1, %c1_i32 : i32
    %181 = arith.extui %180 : i1 to i32
    %c0_i32_60 = arith.constant 0 : i32
    %182 = arith.cmpi ne, %181, %c0_i32_60 : i32
    scf.if %182 {
      %c0_61 = arith.constant 0 : index
      %c0_62 = arith.constant 0 : index
      %183 = vector.load %arg9[%c0_61, %c0_62] : memref<2x128xf32, #tpu.memory_space<vmem>>, vector<1x128xf32>
      %c1 = arith.constant 1 : index
      %c0_63 = arith.constant 0 : index
      %184 = vector.load %arg9[%c1, %c0_63] : memref<2x128xf32, #tpu.memory_space<vmem>>, vector<1x128xf32>
      %cst_64 = arith.constant dense<0.000000e+00> : vector<64xf32>
      %185 = vector.multi_reduction <add>, %177, %cst_64 [1] : vector<64x128xf32> to vector<64xf32>
      %186 = vector.shape_cast %185 : vector<64xf32> to vector<64x1xf32>
      %cst_65 = arith.constant 1.280000e+02 : f32
      %187 = vector.broadcast %cst_65 : f32 to vector<64x1xf32>
      %188 = arith.divf %186, %187 : vector<64x1xf32>
      %189 = vector.broadcast %188 : vector<64x1xf32> to vector<64x128xf32>
      %190 = arith.subf %177, %189 : vector<64x128xf32>
      %191 = arith.mulf %190, %190 : vector<64x128xf32>
      %cst_66 = arith.constant dense<0.000000e+00> : vector<64xf32>
      %192 = vector.multi_reduction <add>, %191, %cst_66 [1] : vector<64x128xf32> to vector<64xf32>
      %193 = vector.shape_cast %192 : vector<64xf32> to vector<64x1xf32>
      %cst_67 = arith.constant 1.280000e+02 : f32
      %194 = vector.broadcast %cst_67 : f32 to vector<64x1xf32>
      %195 = arith.divf %193, %194 : vector<64x1xf32>
      %196 = vector.broadcast %188 : vector<64x1xf32> to vector<64x128xf32>
      %197 = arith.subf %177, %196 : vector<64x128xf32>
      %cst_68 = arith.constant 9.99999974E-6 : f32
      %198 = vector.broadcast %cst_68 : f32 to vector<64x1xf32>
      %199 = arith.addf %195, %198 : vector<64x1xf32>
      %200 = math.rsqrt %199 : vector<64x1xf32>
      %201 = vector.broadcast %200 : vector<64x1xf32> to vector<64x128xf32>
      %202 = arith.mulf %197, %201 : vector<64x128xf32>
      %203 = vector.broadcast %183 : vector<1x128xf32> to vector<64x128xf32>
      %204 = arith.mulf %202, %203 : vector<64x128xf32>
      %205 = vector.broadcast %184 : vector<1x128xf32> to vector<64x128xf32>
      %206 = arith.addf %204, %205 : vector<64x128xf32>
      %207 = vector.shape_cast %206 : vector<64x128xf32> to vector<8x8x128xf32>
      %c0_69 = arith.constant 0 : index
      %c0_70 = arith.constant 0 : index
      %c0_71 = arith.constant 0 : index
      %208 = vector.load %arg10[%c0_69, %c0_70, %c0_71] : memref<8x8x128xf32, #tpu.memory_space<vmem>>, vector<8x8x128xf32>
      tpu.vector_store %arg10[%c0_69, %c0_70, %c0_71], %207 {strides = array<i32>} : memref<8x8x128xf32, #tpu.memory_space<vmem>>, vector<8x8x128xf32>,
    } else {
    }
    return
  }
  func.func @transform_0(%arg0: i32, %arg1: i32) -> (i32, i32, i32) {
    %c0_i32 = arith.constant 0 : i32
    %c0_i32_0 = arith.constant 0 : i32
    %c0_i32_1 = arith.constant 0 : i32
    return %arg0, %c0_i32, %c0_i32_0 : i32, i32, i32
  }
  func.func @transform_1(%arg0: i32, %arg1: i32) -> (i32, i32, i32) {
    %c0_i32 = arith.constant 0 : i32
    %c0_i32_0 = arith.constant 0 : i32
    %c0_i32_1 = arith.constant 0 : i32
    return %arg1, %c0_i32, %c0_i32_0 : i32, i32, i32
  }
  func.func @transform_2(%arg0: i32, %arg1: i32) -> (i32, i32, i32) {
    %c0_i32 = arith.constant 0 : i32
    %c0_i32_0 = arith.constant 0 : i32
    %c0_i32_1 = arith.constant 0 : i32
    return %arg1, %c0_i32, %c0_i32_0 : i32, i32, i32
  }
  func.func @transform_3(%arg0: i32, %arg1: i32) -> (i32, i32, i32) {
    %c0_i32 = arith.constant 0 : i32
    %c0_i32_0 = arith.constant 0 : i32
    %c0_i32_1 = arith.constant 0 : i32
    return %arg1, %c0_i32, %c0_i32_0 : i32, i32, i32
  }
  func.func @transform_4(%arg0: i32, %arg1: i32) -> (i32, i32, i32) {
    %c0_i32 = arith.constant 0 : i32
    %c0_i32_0 = arith.constant 0 : i32
    %c0_i32_1 = arith.constant 0 : i32
    return %arg1, %c0_i32, %c0_i32_0 : i32, i32, i32
  }
  func.func @transform_5(%arg0: i32, %arg1: i32) -> (i32, i32, i32) {
    %c0_i32 = arith.constant 0 : i32
    %c0_i32_0 = arith.constant 0 : i32
    %c0_i32_1 = arith.constant 0 : i32
    return %arg1, %c0_i32, %c0_i32_0 : i32, i32, i32
  }
  func.func @transform_6(%arg0: i32, %arg1: i32) -> (i32, i32, i32) {
    %c0_i32 = arith.constant 0 : i32
    %c0_i32_0 = arith.constant 0 : i32
    %c0_i32_1 = arith.constant 0 : i32
    return %arg1, %c0_i32, %c0_i32_0 : i32, i32, i32
  }
  func.func @transform_7(%arg0: i32, %arg1: i32) -> (i32, i32) {
    %c0_i32 = arith.constant 0 : i32
    %c0_i32_0 = arith.constant 0 : i32
    %c0_i32_1 = arith.constant 0 : i32
    return %c0_i32, %c0_i32_0 : i32, i32
  }
  func.func @transform_8(%arg0: i32, %arg1: i32) -> (i32, i32, i32) {
    %c0_i32 = arith.constant 0 : i32
    %c0_i32_0 = arith.constant 0 : i32
    %c0_i32_1 = arith.constant 0 : i32
    return %arg0, %c0_i32, %c0_i32_0 : i32, i32, i32
  }
}

</mosaic_0001>

<bundles_post_ra>
// kernel: tpu_custom_call.1
= control target key start
LH: loop header
LB: loop body
LE: loop exit
PB: predicated region body
PF: predicated region fallthrough
CT: control target
= control target key end

     0   :  { %s9015_s0 = inlined_call_operand.hbm [shape: f32[8,8,128], index: 0, kind: input, shape index: {}]   ;;  %s9016_s1 = inlined_call_operand.hbm [shape: f32[2,8,128], index: 1, kind: input, shape index: {}]   ;;  %s9017_s2 = inlined_call_operand.hbm [shape: bf16[2,128,384], index: 2, kind: input, shape index: {}]   ;;  %s9018_s3 = inlined_call_operand.hbm [shape: bf16[2,128,128], index: 3, kind: input, shape index: {}]   ;;  %s9019_s4 = inlined_call_operand.hbm [shape: bf16[2,128,256], index: 4, kind: input, shape index: {}]   ;;  %s9020_s5 = inlined_call_operand.vmem [shape: f32[2,1,256], index: 5, kind: input, shape index: {}]   ;;  %s9021_s6 = inlined_call_operand.hbm [shape: bf16[2,256,128], index: 6, kind: input, shape index: {}]   ;;  %s9022_s7 = inlined_call_operand.vmem [shape: f32[2,128], index: 7, kind: input, shape index: {}]   ;;  %s9023_s8 = inlined_call_operand.hbm [shape: f32[8,8,128], index: 8, kind: output, shape index: {}]  }
   0x1   :  { %9038 = sst [smem:[#allocation24_spill]] %s9015_s0 }
   0x2   :  { %9039 = sst [smem:[#allocation25_spill]] %s9016_s1 }
   0x3   :  { %9040 = sst [smem:[#allocation26_spill]] %s9017_s2 }
   0x4   :  { %9041 = sst [smem:[#allocation27_spill]] %s9018_s3 }
   0x5   :  { %13 = vsyncpa [#allocation4], 0 }
   0x6   :  { %14 = vsyncpa [#allocation7], 0 }
   0x7   :  { %16 = vsyncpa [#allocation7 + $0x1], 0 }
   0x8   :  { %17 = vsyncpa [#allocation10], 0 }
   0x9   :  { %19 = vsyncpa [#allocation10 + $0x1], 0 }
   0xa   :  { %20 = vsyncpa [#allocation13], 0 }
   0xb   :  { %22 = vsyncpa [#allocation13 + $0x1], 0 }
   0xc   :  { %23 = vsyncpa [#allocation5], 0  ;;  %s7436_s27 = smov 0   ;;  %s7438_s28 = smov 0  }
   0xd   :  { %s7440_s29 = smov 0   ;;  %s7442_s30 = smov 0  }
   0xe   :  { %s7444_s9 = smov 0   ;;  %s7446_s10 = smov 0  }
   0xf LB: > { %9042 = sst [smem:[#allocation20_spill]] %s7356_s29  ;;  %s38_s11 = sadd.s32 1, %s7364_s9  ;;  %s7368_s10 = sphi %s7446_s10, %s29_s10   ;;  %s7364_s9 = sphi %s7444_s9, %s9075_s9   ;;  %s7360_s30 = sphi %s7442_s30, %s9074_s30   ;;  %s7356_s29 = sphi %s7440_s29, %s9070_s29   ;;  %s7352_s28 = sphi %s7438_s28, %s9073_s28   ;;  %s7348_s27 = sphi %s7436_s27, %s9072_s27  }
  0x10   : > { %9043 = sst [smem:[#allocation21_spill]] %s7368_s10  ;;  %s74_s12 = sadd.s32 1, %s7356_s29 }
  0x11   : > { %p39_p0 = scmp.ge.s32.totalorder %s38_s11, 2  ;;  %p81_p1 = scmp.ne.s32.totalorder %s7356_s29, %s7352_s28 }
  0x12   : > { %p82_p2 = scmp.eq.s32.totalorder %s7368_s10, 0  ;;  %p6687_p4 = scmp.lt.s32.totalorder %s7368_s10, 2 }
  0x13   : > { %s9077_s11 = smov (%p39_p0, %s38_s11), 0  ;;  %s9024_s14 = sand.u32 1, %s7368_s10  }
  0x14   : > { %9044 = sst [smem:[#allocation22_spill]] %s9077_s11  ;;  %p83_p3 = por %p82_p2, %p81_p1 }
  0x15   : > { %s71_s13 = ssub.s32 %s7364_s9, %s9077_s11  ;;  %s7478_s15 = sand.u32 1, %s7356_s29  }
  0x16   : > { %p72_p5 = scmp.eq.s32.totalorder %s71_s13, 0  ;;  %s5792_s16 = sshll.u32 %s7364_s9, 7 }
  0x17   : > { %s5791_s18 = sshll.u32 %s7478_s15, 3  ;;  %s9046_s1 = sld [smem:[#allocation25_spill]] }
  0x18   : > { %s7482_s17 = scalar_select %p72_p5, %s7356_s29, %s74_s12  }
  0x19   : > { %p7488_p6 = pnand %p6687_p4, %p83_p3  ;;  %s311_s23 = scalar_lea.vmem [#allocation6], %s5791_s18 }
  0x1a   : > { %9045 = sst [smem:[#allocation23_spill]] %s7482_s17  ;;  %s318_s24 = sshll.u32 %s311_s23, 4  ;;  %s319_s24 = int_to_ptr.vmem [resolvable:$true] %s318_s24 }
  0x1b   : > { %s7494_s25 = scalar_lea.sflag [#allocation7], %s9024_s14  ;;  %p7498_p7 = pneg %p7488_p6 }
  0x1c   : > { %s7125_s12 = scalar_lea.vmem %s319_s24, 128  ;;  %s7370_s13 = smov [#allocation6]  }
  0x1d   : > { %s316_s21 = scalar_lea.hbm %s9046_s1, %s5792_s16  ;;  %p7126_p8 = scmp.ne.s32.totalorder %s319_s24, %s7125_s12 }
  0x1e   : > { %s7130_s16 = sshll.u32 %s7370_s13, 4  ;;  %s7131_s16 = int_to_ptr.vmem [resolvable:$false] %s7130_s16 }
  0x1f   : > { %p7128_p9 = pnand %p7126_p8, %p7498_p7  ;;  %s7132_s18 = scalar_lea.vmem %s7131_s16, 256 }
  0x20   : > { %p7133_p11 = scmp.lt.s32.totalorder %s319_s24, %s7131_s16  ;;  %p7134_p12 = scmp.lt.s32.totalorder %s7132_s18, %s7125_s12 }
  0x21   : > { %p7129_p10 = pneg %p7128_p9 }
  0x22   : > { %p7135_p13 = por %p7134_p12, %p7133_p11 }
  0x24   : > { %p7136_p0 = pnand %p7135_p13, %p7129_p10 }
  0x26   : > { %7139 = shalt.err (!%p7136_p0)
}
  0x27   : > { %6673 = dma.hbm_to_vmem [thread:$0]  (!%p7488_p6), %s316_s21, 128, %s319_s24, %s7494_s25  }
  0x28   : > { %s5794_s19 = sshll.u32 %s7478_s15, 6  ;;  %s5974_s20 = sshll.u32 %s7364_s9, 10 }
  0x29   : > { %s9049_s3 = sld [smem:[#allocation27_spill]]  ;;  %s350_s1 = scalar_lea.vmem [#allocation9], %s5794_s19 }
  0x2a   : > { %s357_s16 = sshll.u32 %s350_s1, 4  ;;  %s9050_s12 = sand.u32 1, %s7368_s10   ;;  %s358_s16 = int_to_ptr.vmem [resolvable:$true] %s357_s16 }
  0x2b   : > { %s7514_s18 = scalar_lea.sflag [#allocation10], %s9050_s12  ;;  %s7153_s11 = scalar_lea.vmem %s358_s16, 1024 }
  0x2c   : > { %p7154_p1 = scmp.ne.s32.totalorder %s358_s16, %s7153_s11  ;;  %s7371_s17 = smov [#allocation9]  }
  0x2d   : > { %s7158_s29 = sshll.u32 %s7371_s17, 4  ;;  %s7159_s29 = int_to_ptr.vmem [resolvable:$false] %s7158_s29 }
  0x2e   : > { %p7156_p2 = pnand %p7154_p1, %p7498_p7  ;;  %s7160_s21 = scalar_lea.vmem %s7159_s29, 2048 }
  0x2f   : > { %s356_s13 = scalar_lea.hbm %s9049_s3, %s5974_s20  ;;  %p7161_p4 = scmp.lt.s32.totalorder %s358_s16, %s7159_s29 }
  0x30   : > { %p7157_p3 = pneg %p7156_p2  ;;  %p7162_p5 = scmp.lt.s32.totalorder %s7160_s21, %s7153_s11 }
  0x32   : > { %p7163_p8 = por %p7162_p5, %p7161_p4 }
  0x34   : > { %p7164_p9 = pnand %p7163_p8, %p7157_p3 }
  0x36   : > { %7167 = shalt.err (!%p7164_p9)
}
  0x37   : > { %s9027_s14 = smov 64   ;;  %s9028_s1 = smov 4  }
  0x38   : > { %6679 = dma.hbm_to_vmem [thread:$0]  (!%p7488_p6), %s356_s13, 1024, %s358_s16, %s7514_s18, %s9027_s14, %s9027_s14, %s9028_s1  }
  0x39   : > { %s7525_s29 = sadd.s32 4294967295, %s7368_s10   ;;  %p87_p10 = scmp.ne.s32.totalorder %s7352_s28, %s7348_s27 }
  0x3a   : > { %p88_p11 = scmp.eq.s32.totalorder %s7525_s29, 0  ;;  %p5788_p12 = scmp.ge.s32.totalorder %s7368_s10, 1 }
  0x3b   : > { %p275_p13 = scmp.lt.s32.totalorder %s7368_s10, 3  ;;  %s7374_s24 = smov [#allocation3]  }
  0x3c   : > { %p7534_p0 = por %p88_p11, %p87_p10  ;;  %s290_s19 = sshll.u32 %s7374_s24, 4  ;;  %s291_s19 = int_to_ptr.vmem [resolvable:$true] %s290_s19 }
  0x3d   : > { %p7538_p1 = pnand %p5788_p12, %p275_p13  ;;  %s6645_s20 = smul.u32 192, %s7478_s15 }
  0x3e   : > { %s6646_s23 = smul.u32 3072, %s7364_s9  ;;  %s9054_s2 = sld [smem:[#allocation26_spill]] }
  0x3f   : > { %p6666_p2 = pneg %p7538_p1  ;;  %s7179_s21 = scalar_lea.vmem %s291_s19, 1024 }
  0x40   : > { %p7180_p5 = scmp.ne.s32.totalorder %s291_s19, %s7179_s21  ;;  %p7187_p10 = scmp.lt.s32.totalorder %s291_s19, %s291_s19 }
  0x41   : > { %p7547_p3 = pnand %p6666_p2, %p88_p11  ;;  %p7188_p12 = scmp.lt.s32.totalorder %s7179_s21, %s7179_s21 }
  0x43   : > { %p7170_p4 = pneg %p7547_p3  ;;  %p7189_p13 = por %p7188_p12, %p7187_p10 }
  0x44   : > { %s7555_s12 = scalar_lea.hbm %s9054_s2, %s6646_s23 }
  0x45   : > { %p7182_p8 = pnand %p7180_p5, %p7170_p4 }
  0x47   : > { %p7183_p9 = pneg %p7182_p8 }
  0x49   : > { %p7190_p2 = pnand %p7189_p13, %p7183_p9 }
  0x4b   : > { %7193 = shalt.err (!%p7190_p2)
}
  0x4c   : > { %s9030_s24 = smov 128   ;;  %s9031_s14 = smov 8  }
  0x4d   : > { %s9055_s0 = sld [smem:[#allocation24_spill]]  ;;  %s329_s16 = scalar_lea.vmem [#allocation8], %s6645_s20 }
  0x4e   : > { %s336_s1 = sshll.u32 %s329_s16, 4  ;;  %s5797_s2 = sshll.u32 %s7478_s15, 7  ;;  %s337_s1 = int_to_ptr.vmem [resolvable:$true] %s336_s1 }
  0x4f   : > { %s7207_s21 = scalar_lea.vmem %s337_s1, 3072  ;;  %s7377_s3 = smov [#allocation8]  }
  0x50   : > { %p7208_p4 = scmp.ne.s32.totalorder %s337_s1, %s7207_s21  ;;  %s7212_s10 = sshll.u32 %s7377_s3, 4  ;;  %s7213_s10 = int_to_ptr.vmem [resolvable:$false] %s7212_s10 }
  0x51   : > { %s7214_s27 = scalar_lea.vmem %s7213_s10, 6144  ;;  %p7215_p9 = scmp.lt.s32.totalorder %s337_s1, %s7213_s10 }
  0x52   : > { %p7210_p5 = pnand %p7208_p4, %p7498_p7  ;;  %p7216_p10 = scmp.lt.s32.totalorder %s7214_s27, %s7207_s21 }
  0x53   : > { %6669 = dma.hbm_to_vmem [thread:$0]  (!%p7547_p3), %s9055_s0, 1024, %s291_s19, [#allocation4], %s9030_s24, %s9030_s24, %s9031_s14  }
  0x54   : > { %p7211_p8 = pneg %p7210_p5  ;;  %p7217_p12 = por %p7216_p10, %p7215_p9 }
  0x56   : > { %p7218_p13 = pnand %p7217_p12, %p7211_p8 }
  0x58   : > { %7221 = shalt.err (!%p7218_p13)
}
  0x59   : > { %s7378_s23 = smov 192   ;;  %s7379_s19 = smov 12  }
  0x5a   : > { %6676 = dma.hbm_to_vmem [thread:$0]  (!%p7488_p6), %s7555_s12, 3072, %s337_s1, %s7494_s25, %s7378_s23, %s7378_s23, %s7379_s19  }
  0x5b   : > { %s5975_s20 = sshll.u32 %s7364_s9, 11  ;;  %s371_s3 = scalar_lea.vmem [#allocation11], %s5797_s2 }
  0x5c   : > { %s378_s13 = sshll.u32 %s371_s3, 4  ;;  %s377_s21 = scalar_lea.hbm %s9019_s4, %s5975_s20  ;;  %s379_s13 = int_to_ptr.vmem [resolvable:$true] %s378_s13 }
  0x5d   : > { %s7235_s27 = scalar_lea.vmem %s379_s13, 2048  ;;  %s7380_s24 = smov [#allocation11]  }
  0x5e   : > { %p7236_p3 = scmp.ne.s32.totalorder %s379_s13, %s7235_s27  ;;  %s7240_s14 = sshll.u32 %s7380_s24, 4  ;;  %s7241_s14 = int_to_ptr.vmem [resolvable:$false] %s7240_s14 }
  0x5f   : > { %s7242_s0 = scalar_lea.vmem %s7241_s14, 4096  ;;  %p7243_p5 = scmp.lt.s32.totalorder %s379_s13, %s7241_s14 }
  0x60   : > { %p7238_p2 = pnand %p7236_p3, %p7498_p7  ;;  %p7244_p8 = scmp.lt.s32.totalorder %s7242_s0, %s7235_s27 }
  0x62   : > { %p7239_p4 = pneg %p7238_p2  ;;  %p7245_p9 = por %p7244_p8, %p7243_p5 }
  0x64   : > { %p7246_p10 = pnand %p7245_p9, %p7239_p4 }
  0x66   : > { %7249 = shalt.err (!%p7246_p10)
}
  0x67   : > { %s9056_s25 = smov 8   ;;  %s9057_s1 = smov 128  }
  0x68   : > { %6682 = dma.hbm_to_vmem [thread:$0]  (!%p7488_p6), %s377_s21, 2048, %s379_s13, %s7514_s18, %s9057_s1, %s9057_s1, %s9056_s25  }
  0x69   : > { %s405_s24 = scalar_lea.hbm %s9021_s6, %s5975_s20  ;;  %s399_s14 = scalar_lea.vmem [#allocation12], %s5797_s2 }
  0x6a   : > { %s406_s0 = sshll.u32 %s399_s14, 4  ;;  %s396_s19 = scalar_lea.sflag [#allocation13], %s7478_s15  ;;  %s407_s0 = int_to_ptr.vmem [resolvable:$true] %s406_s0 }
  0x6b   : > { %s7263_s3 = scalar_lea.vmem %s407_s0, 2048  ;;  %s7381_s16 = smov [#allocation12]  }
  0x6c   : > { %p7264_p12 = scmp.ne.s32.totalorder %s407_s0, %s7263_s3  ;;  %s7268_s10 = sshll.u32 %s7381_s16, 4  ;;  %s7269_s10 = int_to_ptr.vmem [resolvable:$false] %s7268_s10 }
  0x6d   : > { %s7270_s27 = scalar_lea.vmem %s7269_s10, 4096  ;;  %p7271_p2 = scmp.lt.s32.totalorder %s407_s0, %s7269_s10 }
  0x6e   : > { %p7266_p13 = pnand %p7264_p12, %p7498_p7  ;;  %p7272_p4 = scmp.lt.s32.totalorder %s7270_s27, %s7263_s3 }
  0x70   : > { %p7267_p3 = pneg %p7266_p13  ;;  %p7273_p5 = por %p7272_p4, %p7271_p2 }
  0x72   : > { %p7274_p8 = pnand %p7273_p5, %p7267_p3 }
  0x74   : > { %7277 = shalt.err (!%p7274_p8)
}
  0x75   : > { %s9058_s2 = smov 4   ;;  %s9059_s18 = smov 64  }
  0x76   : > { %6685 = dma.hbm_to_vmem [thread:$0]  (!%p7488_p6), %s405_s24, 2048, %s407_s0, %s396_s19, %s9059_s18, %s9059_s18, %s9058_s2  }
  0x77   : > { %418 = sbr.rel (%p7538_p1) target bundleno = 4713 (0x1269), region = 52 }
  0x7c   : > { %7327 = dma.done.wait (%p88_p11), [#allocation4], 1024  }
  0x7d   : > { %7329 = vsyncadd (%p88_p11), [#allocation4], 4294966272  ;;  %s424_s15 = sand.u32 1, %s7525_s29   ;;  %s426_s26 = sand.u32 1, %s7352_s28  }
  0x7e   : > { %s5805_s20 = sshll.u32 %s426_s26, 3  ;;  %s425_s22 = scalar_lea.sflag [#allocation7], %s424_s15 }
  0x7f   : > { %s7609_s13 = scalar_lea.vmem [#allocation6], %s5805_s20 }
  0x80   : > { %7331 = dma.done.wait (%p7534_p0), %s425_s22, 3200  }
  0x81   : > { %7333 = vsyncadd (%p7534_p0), %s425_s22, 4294964096  ;;  %s6647_s17 = smul.u32 192, %s426_s26  ;;  %s5806_s21 = sshll.u32 %s426_s26, 6 }
  0x82   : > { %s443_s1 = scalar_lea.sflag [#allocation10], %s424_s15  ;;  %s7617_s12 = scalar_lea.vmem [#allocation9], %s5806_s21 }
  0x83   : > { %s7615_s25 = scalar_lea.vmem [#allocation8], %s6647_s17 }
  0x84   : > { %7335 = dma.done.wait (%p7534_p0), %s443_s1, 3072  }
  0x85   : > { %7337 = vsyncadd (%p7534_p0), %s443_s1, 4294964224  ;;  %s5807_s23 = sshll.u32 %s426_s26, 7  ;;  %s461_s14 = scalar_lea.sflag [#allocation13], %s426_s26 }
  0x86   : > { %s7623_s24 = scalar_lea.vmem [#allocation11], %s5807_s23  ;;  %s7625_s0 = scalar_lea.vmem [#allocation12], %s5807_s23 }
  0x87   : > { %7339 = dma.done.wait (%p7534_p0), %s461_s14, 2048  }
  0x88   : > { %7341 = vsyncadd (%p7534_p0), %s461_s14, 4294965248  ;;  %p517_p6 = scmp.lt.s32.totalorder %s7360_s30, 1  ;;  %p5810_p7 = scmp.ne.s32.totalorder %s7360_s30, 0 }
  0x8a   : > { %s518_s19 = scalar_select %p517_p6, %s7360_s30, 1 }
  0x8b   : > { %526 = sbr.rel (%p5810_p7) target bundleno = 149 (0x95), region = 80 }
  0x8c   : > { %s5809_s3 = sshll.u32 %s518_s19, 1 }
  0x8d   : > { %s7636_s27 = scalar_lea.vmem %s9020_s5, %s5809_s3 }
  0x90   : > { %v527_v0 = vld [vmem:[#allocation3] sm:$0xff]  ;;  %v528_v1 = vld [vmem:[#allocation3 + $0x8] sm:$0xff]  ;;  %v529_v2 = vld [vmem:[#allocation3 + $0x10] sm:$0xff] }
  0x91   : > { %535 = vst [vmem:[#allocation2 + $0x30] sm:$0xff] %v527_v0  ;;  %536 = vst [vmem:[#allocation2] sm:$0xff] %v528_v1  ;;  %v530_v3 = vld [vmem:[#allocation3 + $0x18] sm:$0xff]  ;;  %v531_v4 = vld [vmem:[#allocation3 + $0x20] sm:$0xff] }
  0x92   : > { %537 = vst [vmem:[#allocation2 + $0x18] sm:$0xff] %v529_v2  ;;  %v532_v5 = vld [vmem:[#allocation3 + $0x28] sm:$0xff]  ;;  %538 = vst [vmem:[#allocation2 + $0x10] sm:$0xff] %v530_v3  ;;  %v533_v6 = vld [vmem:[#allocation3 + $0x30] sm:$0xff] }
  0x93   : > { %539 = vst [vmem:[#allocation2 + $0x8] sm:$0xff] %v531_v4  ;;  %540 = vst [vmem:[#allocation2 + $0x20] sm:$0xff] %v532_v5  ;;  %v534_v7 = vld [vmem:[#allocation3 + $0x38] sm:$0xff] }
  0x94   : > { %541 = vst [vmem:[#allocation2 + $0x28] sm:$0xff] %v533_v6  ;;  %542 = vst [vmem:[#allocation2 + $0x38] sm:$0xff] %v534_v7 }
  0x95 PF: > { %v6815_v16 = vld [vmem:[%s7615_s25 + $0xac] ss:$12 sps:$4 sm:$0xff]   ;;  %v6817_v17 = vld [vmem:[%s7615_s25 + $0xa8] ss:$12 sps:$4 sm:$0xff]   ;;  %v6820_v50 = vld [vmem:[%s7615_s25 + $0xb0] ss:$12 sps:$4 sm:$0xff]  }
  0x96   : > { %894 = vmatprep.subr.bf16.mxu0 %v6815_v16  ;;  %v6818_v49 = vld [vmem:[%s7615_s25 + $0x94] ss:$12 sps:$4 sm:$0xff]   ;;  %v6821_v51 = vld [vmem:[%s7615_s25 + $0x90] ss:$12 sps:$4 sm:$0xff]   ;;  %6197 = vmatprep.subr.bf16.mxu1 %v6820_v50  ;;  %v6824_v54 = vld [vmem:[%s7615_s25 + $0x98] ss:$12 sps:$4 sm:$0xff]  }
  0x97   : > { %895 = vmatpush1.bf16.msra.mxu0 %v6817_v17  ;;  %6198 = vmatpush3.bf16.msra.mxu1 %v6820_v50  ;;  %v6822_v53 = vld [vmem:[%s7615_s25 + $0x7c] ss:$12 sps:$4 sm:$0xff]   ;;  %v6825_v55 = vld [vmem:[%s7615_s25 + $0x78] ss:$12 sps:$4 sm:$0xff]   ;;  %v6828_v57 = vld [vmem:[%s7615_s25 + $0x80] ss:$12 sps:$4 sm:$0xff]  }
  0x98   : > { %v543_v8 = vld [vmem:[#allocation2 + $0x30] sm:$0xff]  ;;  %v544_v10 = vld [vmem:[#allocation2] sm:$0xff]  ;;  %896 = vmatprep.subr.bf16.mxu0 %v6818_v49  ;;  %6199 = vmatprep.subr.bf16.mxu1 %v6824_v54  ;;  %v6830_v59 = vld [vmem:[%s7615_s25 + $0x4c] ss:$12 sps:$4 sm:$0xff]   ;;  %v9034_v6 = vmov 0   ;;  %vm7384_vm0 = vmmov 0  }
  0x99   : > { %v545_v9 = vld [vmem:[#allocation2 + $0x18] sm:$0xff]  ;;  %649 = vadd.xlane.f32.xlu0 %v543_v8  ;;  %v546_v11 = vld [vmem:[#allocation2 + $0x10] sm:$0xff]  ;;  %v6836_v63 = vld [vmem:[%s7615_s25 + $0x50] ss:$12 sps:$4 sm:$0xff]   ;;  %926 = vmatprep.mubr.bf16.mxu0 %v9034_v6  ;;  %vm1100_vm1 = vcmask 261120   ;;  %vm1586_vm2 = vcmask 1043456  }
  0x9a   : > { %653 = vadd.xlane.f32.xlu1 %v545_v9  ;;  %v547_v12 = vld [vmem:[#allocation2 + $0x8] sm:$0xff]  ;;  %v548_v13 = vld [vmem:[#allocation2 + $0x20] sm:$0xff]  ;;  %v6829_v58 = vld [vmem:[%s7615_s25 + $0x60] ss:$12 sps:$4 sm:$0xff]   ;;  %vm1486_vm4 = vcmask 64512   ;;  %s7385_s11 = smov 96  }
  0x9b   : > { %v549_v14 = vld [vmem:[#allocation2 + $0x28] sm:$0xff]  ;;  %v550_v15 = vld [vmem:[#allocation2 + $0x38] sm:$0xff]  ;;  %897 = vmatpush1.bf16.msra.mxu0 %v6821_v51  ;;  %6200 = vmatpush3.bf16.msra.mxu1 %v6824_v54  ;;  %v6826_v56 = vld [vmem:[%s7615_s25 + $0x64] ss:$12 sps:$4 sm:$0xff]   ;;  %s7386_s2 = smov 64   ;;  %s7387_s18 = smov 32  }
  0x9c   : > { %898 = vmatprep.subr.bf16.mxu0 %v6822_v53  ;;  %6201 = vmatprep.subr.bf16.mxu1 %v6828_v57  ;;  %v6832_v60 = vld [vmem:[%s7615_s25 + $0x68] ss:$12 sps:$4 sm:$0xff]   ;;  %v6837_v0 = vld [vmem:[%s7615_s25 + $0x30] ss:$12 sps:$4 sm:$0xff]   ;;  %v6840_v2 = vld [vmem:[%s7615_s25 + $0x38] ss:$12 sps:$4 sm:$0xff]  }
  0x9d   : > { %651 = vadd.xlane.f32.xlu0 %v544_v10  ;;  %v6833_v61 = vld [vmem:[%s7615_s25 + $0x48] ss:$12 sps:$4 sm:$0xff]   ;;  %v6841_v3 = vld [vmem:[%s7615_s25 + $0x18] ss:$12 sps:$4 sm:$0xff]   ;;  %v6844_v5 = vld [vmem:[%s7615_s25 + $0x20] ss:$12 sps:$4 sm:$0xff]  }
  0x9e   : > { %655 = vadd.xlane.f32.xlu1 %v546_v11  ;;  %v6834_v62 = vld [vmem:[%s7615_s25 + $0x34] ss:$12 sps:$4 sm:$0xff]   ;;  %v6838_v1 = vld [vmem:[%s7615_s25 + $0x1c] ss:$12 sps:$4 sm:$0xff]   ;;  %v6842_v4 = vld [vmem:[%s7615_s25 + $0x4] ss:$12 sps:$4 sm:$0xff]  }
  0x9f   : > { %899 = vmatpush1.bf16.msra.mxu0 %v6825_v55  ;;  %6202 = vmatpush3.bf16.msra.mxu1 %v6828_v57  ;;  %v6845_v7 = vld [vmem:[%s7615_s25] ss:$12 sps:$4 sm:$0xff]   ;;  %vm4752_vm5 = vcmask 523264   ;;  %vm4761_vm6 = vcmask 785408   ;;  %p5967_p11 = scmp.ne.s32.totalorder %s7360_s30, 1 }
  0xa0   : > { %900 = vmatprep.subr.bf16.mxu0 %v6826_v56  ;;  %6203 = vmatprep.subr.bf16.mxu1 %v6832_v60 }
  0xa1   : > { %657 = vadd.xlane.f32.xlu0 %v547_v12 }
  0xa2   : > { %659 = vadd.xlane.f32.xlu1 %v548_v13 }
  0xa3   : > { %901 = vmatpush1.bf16.msra.mxu0 %v6829_v58  ;;  %6204 = vmatpush3.bf16.msra.mxu1 %v6832_v60 }
  0xa4   : > { %902 = vmatprep.subr.bf16.mxu0 %v6830_v59  ;;  %6205 = vmatprep.subr.bf16.mxu1 %v6836_v63 }
  0xa5   : > { %661 = vadd.xlane.f32.xlu0 %v549_v14 }
  0xa6   : > { %663 = vadd.xlane.f32.xlu1 %v550_v15 }
  0xa7   : > { %903 = vmatpush1.bf16.msra.mxu0 %v6833_v61  ;;  %6206 = vmatpush3.bf16.msra.mxu1 %v6836_v63 }
  0xa8   : > { %904 = vmatprep.subr.bf16.mxu0 %v6834_v62  ;;  %6207 = vmatprep.subr.bf16.mxu1 %v6840_v2 }
  0xab   : > { %905 = vmatpush1.bf16.msra.mxu0 %v6837_v0  ;;  %6208 = vmatpush3.bf16.msra.mxu1 %v6840_v2 }
  0xac   : > { %906 = vmatprep.subr.bf16.mxu0 %v6838_v1  ;;  %6209 = vmatprep.subr.bf16.mxu1 %v6844_v5 }
  0xaf   : > { %907 = vmatpush1.bf16.msra.mxu0 %v6841_v3  ;;  %6210 = vmatpush3.bf16.msra.mxu1 %v6844_v5 }
  0xb0   : > { %908 = vmatprep.subr.bf16.mxu0 %v6842_v4 }
  0xb3   : > { %909 = vmatpush1.bf16.msra.mxu0 %v6845_v7 }
 0x122   : > { %v650_v18 = vpop.xlane.xlu0 %649 }
 0x123   : > { %v654_v19 = vpop.xlane.xlu1 %653  ;;  %v666_v20 = vmul.f32 0.0078125, %v650_v18  ;;  %v738_v18 = vlaneseq }
 0x124   : > { %v668_v21 = vmul.f32 0.0078125, %v654_v19 }
 0x125   : > { %v7641_v22 = vsub.f32 %v543_v8, %v666_v20  ;;  %v6846_v8 = vld [vmem:[%s7615_s25 + $0x8] ss:$12 sps:$4 sm:$0xff]  }
 0x126   : > { %v7643_v23 = vsub.f32 %v545_v9, %v668_v21  ;;  %v652_v24 = vpop.xlane.xlu0 %651  ;;  %6211 = vmatprep.subr.bf16.mxu1 %v6846_v8 }
 0x127   : > { %v656_v25 = vpop.xlane.xlu1 %655  ;;  %v667_v26 = vmul.f32 0.0078125, %v652_v24  ;;  %v682_v27 = vmul.f32 %v7641_v22, %v7641_v22  ;;  %6212 = vmatpush3.bf16.msra.mxu1 %v6846_v8 }
 0x128   : > { %v669_v28 = vmul.f32 0.0078125, %v656_v25  ;;  %v684_v29 = vmul.f32 %v7643_v23, %v7643_v23 }
 0x129   : > { %690 = vadd.xlane.f32.xlu0 %v682_v27  ;;  %v7649_v30 = vsub.f32 %v544_v10, %v667_v26  ;;  %v7697_v27 = vshrl.u32 %v738_v18, 7 }
 0x12a   : > { %v7651_v31 = vsub.f32 %v546_v11, %v669_v28  ;;  %v658_v32 = vpop.xlane.xlu0 %657 }
 0x12b   : > { %v660_v33 = vpop.xlane.xlu1 %659  ;;  %v670_v34 = vmul.f32 0.0078125, %v658_v32  ;;  %v683_v35 = vmul.f32 %v7649_v30, %v7649_v30 }
 0x12c   : > { %v671_v36 = vmul.f32 0.0078125, %v660_v33  ;;  %v685_v37 = vmul.f32 %v7651_v31, %v7651_v31 }
 0x12d   : > { %694 = vadd.xlane.f32.xlu0 %v684_v29  ;;  %692 = vadd.xlane.f32.xlu1 %v683_v35  ;;  %v7657_v38 = vsub.f32 %v547_v12, %v670_v34 }
 0x12e   : > { %v7659_v39 = vsub.f32 %v548_v13, %v671_v36  ;;  %v662_v40 = vpop.xlane.xlu0 %661  ;;  %v9033_v36 = vsub.s32 0, %v7697_v27 }
 0x12f   : > { %v664_v41 = vpop.xlane.xlu1 %663  ;;  %v672_v42 = vmul.f32 0.0078125, %v662_v40  ;;  %v686_v43 = vmul.f32 %v7657_v38, %v7657_v38  ;;  %v551_v40 = vld [vmem:[%s7609_s13] sm:$0xff] }
 0x130   : > { %v673_v44 = vmul.f32 0.0078125, %v664_v41  ;;  %v687_v45 = vmul.f32 %v7659_v39, %v7659_v39 }
 0x131   : > { %696 = vadd.xlane.f32.xlu1 %v685_v37  ;;  %698 = vadd.xlane.f32.xlu0 %v686_v43  ;;  %v7665_v46 = vsub.f32 %v549_v14, %v672_v42 }
 0x132   : > { %v7667_v47 = vsub.f32 %v550_v15, %v673_v44 }
 0x133   : > { %v688_v48 = vmul.f32 %v7665_v46, %v7665_v46 }
 0x134   : > { %v689_v52 = vmul.f32 %v7667_v47, %v7667_v47 }
 0x135   : > { %700 = vadd.xlane.f32.xlu1 %v687_v45  ;;  %702 = vadd.xlane.f32.xlu0 %v688_v48  ;;  %v741_v45 = vrot.slane %v551_v40, %v9033_v36  ;;  %v9032_v48 = vsub.s32 1, %v7697_v27 }
 0x137   : > { %v753_v53 = vrot.slane %v551_v40, %v9032_v48 }
 0x139   : > { %704 = vadd.xlane.f32.xlu1 %v689_v52 }
 0x1b2   : > { %v691_v9 = vpop.xlane.xlu0 %690 }
 0x1b3   : > { %v706_v10 = vmul.f32 0.0078125, %v691_v9 }
 0x1b5   : > { %v714_v11 = vadd.f32 1e-05, %v706_v10 }
 0x1b6   : > { %v693_v12 = vpop.xlane.xlu1 %692  ;;  %v695_v13 = vpop.xlane.xlu0 %694 }
 0x1b7   : > { %6895 = vrsqrt.f32 %v714_v11  ;;  %v707_v14 = vmul.f32 0.0078125, %v693_v12  ;;  %v708_v15 = vmul.f32 0.0078125, %v695_v13 }
 0x1b9   : > { %v715_v16 = vadd.f32 1e-05, %v707_v14  ;;  %v716_v17 = vadd.f32 1e-05, %v708_v15 }
 0x1ba   : > { %v697_v19 = vpop.xlane.xlu1 %696  ;;  %v699_v20 = vpop.xlane.xlu0 %698 }
 0x1bb   : > { %6897 = vrsqrt.f32 %v715_v16  ;;  %v709_v21 = vmul.f32 0.0078125, %v697_v19  ;;  %v710_v24 = vmul.f32 0.0078125, %v699_v20 }
 0x1bc   : > { %6899 = vrsqrt.f32 %v716_v17 }
 0x1bd   : > { %v717_v25 = vadd.f32 1e-05, %v709_v21  ;;  %v718_v26 = vadd.f32 1e-05, %v710_v24 }
 0x1be   : > { %v701_v28 = vpop.xlane.xlu1 %700  ;;  %v703_v29 = vpop.xlane.xlu0 %702 }
 0x1bf   : > { %6901 = vrsqrt.f32 %v717_v25  ;;  %v711_v32 = vmul.f32 0.0078125, %v701_v28  ;;  %v712_v33 = vmul.f32 0.0078125, %v703_v29 }
 0x1c0   : > { %6903 = vrsqrt.f32 %v718_v26 }
 0x1c1   : > { %v719_v34 = vadd.f32 1e-05, %v711_v32  ;;  %v720_v35 = vadd.f32 1e-05, %v712_v33 }
 0x1c2   : > { %v705_v37 = vpop.xlane.xlu1 %704 }
 0x1c3   : > { %6905 = vrsqrt.f32 %v719_v34  ;;  %v713_v41 = vmul.f32 0.0078125, %v705_v37 }
 0x1c4   : > { %v6896_v42 = vpop.eup %6895  ;;  %6907 = vrsqrt.f32 %v720_v35 }
 0x1c5   : > { %v721_v43 = vadd.f32 1e-05, %v713_v41  ;;  %v730_v44 = vmul.f32 %v6896_v42, %v7641_v22 }
 0x1c7   : > { %6909 = vrsqrt.f32 %v721_v43  ;;  %v742_v52 = vmul.f32 %v741_v45, %v730_v44 }
 0x1c8   : > { %v6898_v49 = vpop.eup %6897 }
 0x1c9   : > { %v6900_v50 = vpop.eup %6899  ;;  %v731_v51 = vmul.f32 %v6898_v49, %v7649_v30  ;;  %v754_v58 = vadd.f32 %v753_v53, %v742_v52 }
 0x1ca   : > { %v732_v54 = vmul.f32 %v6900_v50, %v7643_v23 }
 0x1cb   : > { %v743_v55 = vmul.f32 %v741_v45, %v731_v51 }
 0x1cc   : > { %v6902_v56 = vpop.eup %6901  ;;  %v744_v57 = vmul.f32 %v741_v45, %v732_v54 }
 0x1cd   : > { %v6904_v22 = vpop.eup %6903  ;;  %v755_v59 = vadd.f32 %v753_v53, %v743_v55  ;;  %v733_v60 = vmul.f32 %v6902_v56, %v7651_v31 }
 0x1ce   : > { %v734_v61 = vmul.f32 %v6904_v22, %v7657_v38  ;;  %v756_v30 = vadd.f32 %v753_v53, %v744_v57 }
 0x1cf   : > { %v762_v62 = vpack.c.bf16 %v755_v59, %v754_v58  ;;  %v745_v63 = vmul.f32 %v741_v45, %v733_v60 }
 0x1d0   : > { %v6906_v0 = vpop.eup %6905  ;;  %v746_v3 = vmul.f32 %v741_v45, %v734_v61 }
 0x1d1   : > { %v6908_v1 = vpop.eup %6907  ;;  %927 = vmatmul.mubr.bf16.vlgmr.msra.gmra.mxu0 %v762_v62  ;;  %6213 = vmatprep.mubr.bf16.mxu1 %v762_v62  ;;  %v757_v2 = vadd.f32 %v753_v53, %v745_v63  ;;  %v735_v23 = vmul.f32 %v6906_v0, %v7659_v39 }
 0x1d2   : > { %936 = vmatprep.mubr.bf16.mxu0 %v9034_v6  ;;  %v736_v4 = vmul.f32 %v6908_v1, %v7665_v46  ;;  %v758_v38 = vadd.f32 %v753_v53, %v746_v3  ;;  %v9036_v46 = vmov 0.0  }
 0x1d3   : > { %v763_v5 = vpack.c.bf16 %v757_v2, %v756_v30  ;;  %v747_v7 = vmul.f32 %v741_v45, %v735_v23  ;;  %6221 = vmatprep.subr.bf16.mxu1 %v9036_v46  ;;  %6233 = vmatprep.subr.bf16.mxu0 %v9036_v46 }
 0x1d4   : > { %v6910_v31 = vpop.eup %6909  ;;  %v748_v10 = vmul.f32 %v741_v45, %v736_v4 }
 0x1d5   : > { %6214 = vmatmul.mubr.bf16.vlgmr.msra.gmra.mxu1 %v763_v5  ;;  %v759_v8 = vadd.f32 %v753_v53, %v747_v7  ;;  %v737_v9 = vmul.f32 %v6910_v31, %v7667_v47 }
 0x1d6   : > { %v760_v13 = vadd.f32 %v753_v53, %v748_v10 }
 0x1d7   : > { %v764_v11 = vpack.c.bf16 %v759_v8, %v758_v38  ;;  %v749_v12 = vmul.f32 %v741_v45, %v737_v9  ;;  %v7838_v8 = vand.u32 127, %v738_v18 }
 0x1d9   : > { %937 = vmatmul.mubr.bf16.gmra.mxu0 %v763_v5  ;;  %6217 = vmatprep.mubr.bf16.mxu1 %v764_v11  ;;  %v761_v39 = vadd.f32 %v753_v53, %v749_v12  ;;  %vm1098_vm3 = vcmp.lt.s32.totalorder %v7838_v8, 5 }
 0x1da   : > { %946 = vmatprep.mubr.bf16.mxu0 %v9034_v6 }
 0x1db   : > { %v765_v14 = vpack.c.bf16 %v761_v39, %v760_v13 }
 0x1dd   : > { %6218 = vmatmul.mubr.bf16.gmra.mxu1 %v765_v14 }
 0x1de   : > { %6223 = vmatprep.mubr.msk.bf16.mxu1 %vm7384_vm0, %v9036_v46 }
 0x1e1   : > { %947 = vmatmul.mubr.bf16.gmra.mxu0 %v764_v11 }
 0x1e2   : > { %956 = vmatprep.mubr.bf16.mxu0 %v9034_v6 }
 0x1e9   : > { %957 = vmatmul.mubr.bf16.gmra.mxu0 %v765_v14 }
 0x1ea   : > { %6235 = vmatprep.mubr.msk.bf16.mxu0 %vm7384_vm0, %v9036_v46 }
 0x291   : > { %v7723_v47 = vpop.f32.mrf.mxu0 }
 0x293   : > { %v930_v15 = vpop.f32.mrf.mxu0 }
 0x294   : > { %v7726_v16 = vpack.c.bf16 %v930_v15, %v7723_v47 }
 0x295   : > { %v7728_v17 = vpop.f32.mrf.mxu0  ;;  %v7786_v22 = vpop.f32.mrf.mxu1 }
 0x296   : > { %v1099_v19 = vrot.slane %v7726_v16, 4 }
 0x297   : > { %v934_v20 = vpop.f32.mrf.mxu0  ;;  %v1001_v0 = vpop.f32.mrf.mxu1 }
 0x298   : > { %v7732_v21 = vpack.c.bf16 %v934_v20, %v7728_v17  ;;  %v1105_v24 = vsel %vm1100_vm1, %v1099_v19, 0  ;;  %v7806_v30 = vpack.c.bf16 %v1001_v0, %v1001_v0 }
 0x299   : > { %v7735_v25 = vpop.f32.mrf.mxu0  ;;  %6222 = vmatpush3.bf16.xpose.msra.mxu1 %v1105_v24  ;;  %v7809_v2 = vpop.f32.mrf.mxu1 }
 0x29a   : > { %6227 = vmatprep.subr.bf16.mxu1 %v9036_v46  ;;  %v1147_v29 = vrot.slane %v7732_v21, 4  ;;  %v1588_v3 = vsel %vm1586_vm2, %v7806_v30, 0 }
 0x29b   : > { %v940_v26 = vpop.f32.mrf.mxu0  ;;  %v1004_v4 = vpop.f32.mrf.mxu1 }
 0x29c   : > { %v7739_v28 = vpack.c.bf16 %v940_v26, %v7735_v25  ;;  %v1152_v37 = vsel %vm1100_vm1, %v1147_v29, 0  ;;  %v7824_v5 = vpack.c.bf16 %v1004_v4, %v1004_v4 }
 0x29d   : > { %v7742_v32 = vpop.f32.mrf.mxu0  ;;  %v7833_v31 = vpop.f32.mrf.mxu1 }
 0x29e   : > { %v1194_v33 = vrot.slane %v7739_v28, 4  ;;  %v1634_v7 = vsel %vm1586_vm2, %v7824_v5, 0 }
 0x29f   : > { %v944_v34 = vpop.f32.mrf.mxu0  ;;  %v7835_v38 = vpop.f32.mrf.mxu1 }
 0x2a0   : > { %v7746_v35 = vpack.c.bf16 %v944_v34, %v7742_v32  ;;  %6224 = vmatmul.mubr.msk.bf16.vlgmr.msra.gmra.mxu1 %vm1100_vm1, %v7726_v16  ;;  %v1199_v40 = vsel %vm1100_vm1, %v1194_v33, 0 }
 0x2a1   : > { %v7752_v41 = vpop.f32.mrf.mxu0  ;;  %6228 = vmatpush3.bf16.xpose.msra.mxu1 %v1152_v37  ;;  %6234 = vmatpush3.bf16.xpose.msra.mxu0 %v1199_v40  ;;  %v7840_v9 = vpop.f32.mrf.mxu1 }
 0x2a2   : > { %6229 = vmatprep.mubr.msk.bf16.mxu1 %vm7384_vm0, %v9036_v46  ;;  %6239 = vmatprep.subr.bf16.mxu1 %v9036_v46  ;;  %v1241_v44 = vrot.slane %v7746_v35, 4 }
 0x2a3   : > { %v950_v42 = vpop.f32.mrf.mxu0  ;;  %6245 = vmatprep.subr.bf16.mxu0 %v9036_v46  ;;  %v7843_v10 = vpop.f32.mrf.mxu1 }
 0x2a4   : > { %v7759_v43 = vpack.c.bf16 %v950_v42, %v7752_v41  ;;  %v1246_v52 = vsel %vm1100_vm1, %v1241_v44, 0 }
 0x2a5   : > { %v7762_v45 = vpop.f32.mrf.mxu0 }
 0x2a6   : > { %v1288_v49 = vrot.slane %v7759_v43, 4 }
 0x2a7   : > { %v954_v50 = vpop.f32.mrf.mxu0 }
 0x2a8   : > { %v7766_v51 = vpack.c.bf16 %v954_v50, %v7762_v45  ;;  %6230 = vmatmul.mubr.msk.bf16.vlgmr.msra.gmra.mxu1 %vm1100_vm1, %v7732_v21  ;;  %6236 = vmatmul.mubr.msk.bf16.vlgmr.msra.gmra.mxu0 %vm1100_vm1, %v7739_v28  ;;  %v1293_v53 = vsel %vm1100_vm1, %v1288_v49, 0 }
 0x2a9   : > { %v7774_v54 = vpop.f32.mrf.mxu0  ;;  %6240 = vmatpush3.bf16.xpose.msra.mxu1 %v1246_v52  ;;  %6246 = vmatpush3.bf16.xpose.msra.mxu0 %v1293_v53 }
 0x2aa   : > { %6241 = vmatprep.mubr.msk.bf16.mxu1 %vm7384_vm0, %v9036_v46  ;;  %6247 = vmatprep.mubr.msk.bf16.mxu0 %vm7384_vm0, %v9036_v46  ;;  %v1335_v57 = vrot.slane %v7766_v51, 4 }
 0x2ab   : > { %v960_v55 = vpop.f32.mrf.mxu0  ;;  %6251 = vmatprep.subr.bf16.mxu1 %v9036_v46  ;;  %6257 = vmatprep.subr.bf16.mxu0 %v9036_v46 }
 0x2ac   : > { %v7783_v56 = vpack.c.bf16 %v960_v55, %v7774_v54  ;;  %v1340_v62 = vsel %vm1100_vm1, %v1335_v57, 0 }
 0x2ad   : > { %v7788_v58 = vpop.f32.mrf.mxu0 }
 0x2ae   : > { %v1382_v59 = vrot.slane %v7783_v56, 4 }
 0x2af   : > { %v964_v60 = vpop.f32.mrf.mxu0 }
 0x2b0   : > { %v7792_v61 = vpack.c.bf16 %v964_v60, %v7788_v58  ;;  %6242 = vmatmul.mubr.msk.bf16.vlgmr.msra.gmra.mxu1 %vm1100_vm1, %v7746_v35  ;;  %6248 = vmatmul.mubr.msk.bf16.vlgmr.msra.gmra.mxu0 %vm1100_vm1, %v7759_v43  ;;  %v1387_v63 = vsel %vm1100_vm1, %v1382_v59, 0 }
 0x2b1   : > { %6252 = vmatpush3.bf16.xpose.msra.mxu1 %v1340_v62  ;;  %6258 = vmatpush3.bf16.xpose.msra.mxu0 %v1387_v63 }
 0x2b2   : > { %6253 = vmatprep.mubr.msk.bf16.mxu1 %vm7384_vm0, %v9036_v46  ;;  %6259 = vmatprep.mubr.msk.bf16.mxu0 %vm7384_vm0, %v9036_v46  ;;  %v1429_v1 = vrot.slane %v7792_v61, 4 }
 0x2b3   : > { %6263 = vmatprep.subr.bf16.mxu1 %v9036_v46  ;;  %6269 = vmatprep.subr.bf16.mxu0 %v9036_v46 }
 0x2b4   : > { %v1434_v23 = vsel %vm1100_vm1, %v1429_v1, 0 }
 0x2b8   : > { %6254 = vmatmul.mubr.msk.bf16.vlgmr.msra.gmra.mxu1 %vm1100_vm1, %v7766_v51  ;;  %6260 = vmatmul.mubr.msk.bf16.vlgmr.msra.gmra.mxu0 %vm1100_vm1, %v7783_v56 }
 0x2b9   : > { %6264 = vmatpush3.bf16.xpose.msra.mxu1 %v1434_v23  ;;  %6270 = vmatpush3.bf16.msra.mxu0 %v1588_v3 }
 0x2ba   : > { %6265 = vmatprep.mubr.msk.bf16.mxu1 %vm7384_vm0, %v9036_v46  ;;  %6275 = vmatprep.subr.bf16.mxu1 %v9036_v46 }
 0x2bb   : > { %6271 = vmatprep.mubr.msk.bf16.mxu0 %vm7384_vm0, %v9036_v46  ;;  %6281 = vmatprep.subr.bf16.mxu0 %v9036_v46 }
 0x2c0   : > { %6266 = vmatmul.mubr.msk.bf16.vlgmr.msra.gmra.mxu1 %vm1100_vm1, %v7792_v61 }
 0x2c1   : > { %6276 = vmatpush3.bf16.msra.mxu1 %v1634_v7  ;;  %6277 = vmatprep.mubr.msk.bf16.mxu1 %vm7384_vm0, %v9036_v46 }
 0x2c2   : > { %6287 = vmatprep.subr.bf16.mxu1 %v9036_v46 }
 0x360   : > { %v1141_v11 = vpop.f32.mrf.mxu1 }
 0x361   : > { %v1478_v12 = vsel %vm1098_vm3, %v1141_v11, -1e+30 }
 0x362   : > { %v6225_v13 = vpop.f32.mrf.mxu1  ;;  %v1487_v39 = vsel %vm1486_vm4, %v1478_v12, -inf }
 0x363   : > { %1488 = vmax.xlane.f32.xlu0 %v1487_v39 }
 0x364   : > { %v1144_v14 = vpop.f32.mrf.mxu1 }
 0x366   : > { %v6226_v15 = vpop.f32.mrf.mxu1 }
 0x368   : > { %v1188_v19 = vpop.f32.mrf.mxu1  ;;  %v1235_v18 = vpop.f32.mrf.mxu0 }
 0x369   : > { %v1479_v20 = vsel %vm1098_vm3, %v1188_v19, -1e+30  ;;  %v1480_v24 = vsel %vm1098_vm3, %v1235_v18, -1e+30 }
 0x36a   : > { %v6231_v26 = vpop.f32.mrf.mxu1  ;;  %v6237_v29 = vpop.f32.mrf.mxu0  ;;  %v1490_v33 = vsel %vm1486_vm4, %v1479_v20, -inf  ;;  %v1493_v34 = vsel %vm1486_vm4, %v1480_v24, -inf }
 0x36b   : > { %1491 = vmax.xlane.f32.xlu1 %v1490_v33  ;;  %1494 = vmax.xlane.f32.xlu0 %v1493_v34 }
 0x36c   : > { %v1191_v37 = vpop.f32.mrf.mxu1  ;;  %v1238_v40 = vpop.f32.mrf.mxu0 }
 0x36e   : > { %v6232_v42 = vpop.f32.mrf.mxu1  ;;  %v6238_v44 = vpop.f32.mrf.mxu0 }
 0x370   : > { %v1282_v49 = vpop.f32.mrf.mxu1  ;;  %v1329_v50 = vpop.f32.mrf.mxu0 }
 0x371   : > { %v1481_v52 = vsel %vm1098_vm3, %v1282_v49, -1e+30  ;;  %v1482_v53 = vsel %vm1098_vm3, %v1329_v50, -1e+30 }
 0x372   : > { %v6243_v55 = vpop.f32.mrf.mxu1  ;;  %v6249_v57 = vpop.f32.mrf.mxu0  ;;  %v1496_v59 = vsel %vm1486_vm4, %v1481_v52, -inf  ;;  %v1499_v60 = vsel %vm1486_vm4, %v1482_v53, -inf }
 0x373   : > { %1497 = vmax.xlane.f32.xlu1 %v1496_v59  ;;  %1500 = vmax.xlane.f32.xlu0 %v1499_v60 }
 0x374   : > { %v1285_v62 = vpop.f32.mrf.mxu1  ;;  %v1332_v63 = vpop.f32.mrf.mxu0 }
 0x376   : > { %v6244_v0 = vpop.f32.mrf.mxu1  ;;  %v6250_v1 = vpop.f32.mrf.mxu0 }
 0x378   : > { %v1376_v23 = vpop.f32.mrf.mxu1  ;;  %v1423_v3 = vpop.f32.mrf.mxu0 }
 0x379   : > { %v1483_v4 = vsel %vm1098_vm3, %v1376_v23, -1e+30  ;;  %v1484_v7 = vsel %vm1098_vm3, %v1423_v3, -1e+30 }
 0x37a   : > { %v6255_v11 = vpop.f32.mrf.mxu1  ;;  %v6261_v13 = vpop.f32.mrf.mxu0  ;;  %v1502_v39 = vsel %vm1486_vm4, %v1483_v4, -inf  ;;  %v1505_v14 = vsel %vm1486_vm4, %v1484_v7, -inf }
 0x37b   : > { %1503 = vmax.xlane.f32.xlu1 %v1502_v39  ;;  %1506 = vmax.xlane.f32.xlu0 %v1505_v14 }
 0x37c   : > { %v1379_v15 = vpop.f32.mrf.mxu1  ;;  %v1426_v19 = vpop.f32.mrf.mxu0 }
 0x37e   : > { %v6256_v18 = vpop.f32.mrf.mxu1  ;;  %v6262_v26 = vpop.f32.mrf.mxu0 }
 0x380   : > { %v1470_v29 = vpop.f32.mrf.mxu1 }
 0x381   : > { %v7868_v33 = vsel %vm1098_vm3, %v1470_v29, -1e+30 }
 0x382   : > { %v6267_v34 = vpop.f32.mrf.mxu1  ;;  %v1508_v37 = vsel %vm1486_vm4, %v7868_v33, -inf }
 0x383   : > { %1509 = vmax.xlane.f32.xlu1 %v1508_v37 }
 0x384   : > { %v1473_v40 = vpop.f32.mrf.mxu1 }
 0x386   : > { %v6268_v42 = vpop.f32.mrf.mxu1 }
 0x3ec   : > { %v1489_v44 = vpop.xlane.xlu0 %1488 }
 0x3ed   : > { %v1511_v49 = vsub.f32 %v1478_v12, %v1489_v44 }
 0x3ef   : > { %v1519_v50 = vmul.f32 1.442695, %v1511_v49 }
 0x3f1   : > { %6911 = vpow2.f32 %v1519_v50  ;;  %v7908_v50 = vpack.c.bf16 %v7723_v47, %v7723_v47  ;;  %v7925_v47 = vpack.c.bf16 %v7752_v41, %v7752_v41  ;;  %v7945_v41 = vpack.c.bf16 %v7728_v17, %v7728_v17 }
 0x3f2   : > { %v7961_v17 = vpack.c.bf16 %v7762_v45, %v7762_v45  ;;  %v7981_v45 = vpack.c.bf16 %v7809_v2, %v7809_v2 }
 0x3f4   : > { %v1492_v55 = vpop.xlane.xlu1 %1491  ;;  %v1495_v57 = vpop.xlane.xlu0 %1494 }
 0x3f5   : > { %v1512_v59 = vsub.f32 %v1479_v20, %v1492_v55  ;;  %v1513_v60 = vsub.f32 %v1480_v24, %v1495_v57 }
 0x3f7   : > { %v1521_v62 = vmul.f32 1.442695, %v1512_v59  ;;  %v1523_v63 = vmul.f32 1.442695, %v1513_v60  ;;  %v7917_v59 = vpack.c.bf16 %v7735_v25, %v7735_v25 }
 0x3f9   : > { %6913 = vpow2.f32 %v1521_v62 }
 0x3fa   : > { %6915 = vpow2.f32 %v1523_v63  ;;  %v7967_v63 = vpack.c.bf16 %v7788_v58, %v7788_v58 }
 0x3fc   : > { %v1498_v0 = vpop.xlane.xlu1 %1497  ;;  %v1501_v1 = vpop.xlane.xlu0 %1500 }
 0x3fd   : > { %v1514_v23 = vsub.f32 %v1481_v52, %v1498_v0  ;;  %v1515_v3 = vsub.f32 %v1482_v53, %v1501_v1 }
 0x3fe   : > { %v7872_v11 = vpop.eup %6911 }
 0x3ff   : > { %v1525_v13 = vmul.f32 1.442695, %v1514_v23  ;;  %v1527_v39 = vmul.f32 1.442695, %v1515_v3  ;;  %v1535_v12 = vsel %vm1486_vm4, %v7872_v11, 0.0 }
 0x400   : > { %1536 = vadd.xlane.f32.xlu0 %v1535_v12 }
 0x401   : > { %6917 = vpow2.f32 %v1525_v13 }
 0x402   : > { %6919 = vpow2.f32 %v1527_v39 }
 0x404   : > { %v1504_v20 = vpop.xlane.xlu1 %1503  ;;  %v1507_v24 = vpop.xlane.xlu0 %1506 }
 0x405   : > { %v1516_v14 = vsub.f32 %v1483_v4, %v1504_v20  ;;  %v1517_v15 = vsub.f32 %v1484_v7, %v1507_v24  ;;  %v7995_v24 = vpack.c.bf16 %v7835_v38, %v7835_v38 }
 0x406   : > { %v7876_v19 = vpop.eup %6913 }
 0x407   : > { %v7878_v18 = vpop.eup %6915  ;;  %v1529_v52 = vmul.f32 1.442695, %v1516_v14  ;;  %v1531_v53 = vmul.f32 1.442695, %v1517_v15  ;;  %v1538_v26 = vsel %vm1486_vm4, %v7876_v19, 0.0  ;;  %v1772_v38 = vsel %vm1586_vm2, %v7995_v24, 0 }
 0x408   : > { %v1541_v29 = vsel %vm1486_vm4, %v7878_v18, 0.0  ;;  %1539 = vadd.xlane.f32.xlu1 %v1538_v26 }
 0x409   : > { %6921 = vpow2.f32 %v1529_v52  ;;  %1542 = vadd.xlane.f32.xlu0 %v1541_v29  ;;  %v1726_v29 = vsel %vm1586_vm2, %v7981_v45, 0 }
 0x40a   : > { %6923 = vpow2.f32 %v1531_v53 }
 0x40c   : > { %v1510_v55 = vpop.xlane.xlu1 %1509 }
 0x40d   : > { %v1518_v57 = vsub.f32 %v7868_v33, %v1510_v55  ;;  %v7931_v33 = vpack.c.bf16 %v7774_v54, %v7774_v54  ;;  %v7953_v54 = vpack.c.bf16 %v7742_v32, %v7742_v32  ;;  %v7975_v32 = vpack.c.bf16 %v7786_v22, %v7786_v22 }
 0x40e   : > { %v7884_v34 = vpop.eup %6917 }
 0x40f   : > { %v7886_v4 = vpop.eup %6919  ;;  %v1544_v7 = vsel %vm1486_vm4, %v7884_v34, 0.0  ;;  %v1533_v60 = vmul.f32 1.442695, %v1518_v57  ;;  %v1680_v2 = vsel %vm1586_vm2, %v7975_v32, 0 }
 0x410   : > { %v1547_v37 = vsel %vm1486_vm4, %v7886_v4, 0.0  ;;  %1545 = vadd.xlane.f32.xlu1 %v1544_v7  ;;  %v8011_v7 = vpack.c.bf16 %v7843_v10, %v7843_v10 }
 0x411   : > { %1548 = vadd.xlane.f32.xlu0 %v1547_v37  ;;  %6925 = vpow2.f32 %v1533_v60 }
 0x416   : > { %v7892_v40 = vpop.eup %6921 }
 0x417   : > { %v7894_v42 = vpop.eup %6923  ;;  %v1550_v44 = vsel %vm1486_vm4, %v7892_v40, 0.0 }
 0x418   : > { %v1553_v49 = vsel %vm1486_vm4, %v7894_v42, 0.0  ;;  %1551 = vadd.xlane.f32.xlu1 %v1550_v44 }
 0x419   : > { %1554 = vadd.xlane.f32.xlu0 %v1553_v49  ;;  %v8017_v49 = vpack.c.bf16 %v7833_v31, %v7833_v31 }
 0x41b   : > { %v1864_v10 = vsel %vm1586_vm2, %v8017_v49, 0 }
 0x41e   : > { %v7937_v25 = vpop.eup %6925 }
 0x41f   : > { %v1556_v62 = vsel %vm1486_vm4, %v7937_v25, 0.0 }
 0x429   : > { %2004 = vrot.lane.b32.xlu1 %v7732_v21, %s7385_s11 }
 0x42d   : > { %2056 = vrot.lane.b32.xlu1 %v7739_v28, %s7385_s11 }
 0x42f   : > { %1952 = vrot.lane.b32.xlu0 %v7726_v16, %s7385_s11 }
 0x433   : > { %1956 = vrot.lane.b32.xlu0 %v7908_v50, %s7385_s11 }
 0x437   : > { %2160 = vrot.lane.b32.xlu0 %v7759_v43, %s7385_s11 }
 0x43b   : > { %2060 = vrot.lane.b32.xlu0 %v7917_v59, %s7385_s11 }
 0x43f   : > { %2264 = vrot.lane.b32.xlu0 %v7783_v56, %s7385_s11 }
 0x443   : > { %2164 = vrot.lane.b32.xlu0 %v7925_v47, %s7385_s11 }
 0x447   : > { %2268 = vrot.lane.b32.xlu0 %v7931_v33, %s7385_s11 }
 0x44b   : > { %2472 = vrot.lane.b32.xlu0 %v7806_v30, %s7385_s11 }
 0x451   : > { %1557 = vadd.xlane.f32.xlu1 %v1556_v62  ;;  %v1818_v62 = vsel %vm1586_vm2, %v8011_v7, 0 }
 0x462   : > { %2108 = vrot.lane.b32.xlu1 %v7746_v35, %s7385_s11 }
 0x466   : > { %2008 = vrot.lane.b32.xlu1 %v7945_v41, %s7385_s11 }
 0x46a   : > { %2212 = vrot.lane.b32.xlu1 %v7766_v51, %s7385_s11 }
 0x46e   : > { %2112 = vrot.lane.b32.xlu1 %v7953_v54, %s7385_s11 }
 0x472   : > { %2316 = vrot.lane.b32.xlu1 %v7792_v61, %s7385_s11 }
 0x476   : > { %2216 = vrot.lane.b32.xlu1 %v7961_v17, %s7385_s11 }
 0x47a   : > { %2320 = vrot.lane.b32.xlu1 %v7967_v63, %s7385_s11 }
 0x47e   : > { %2520 = vrot.lane.b32.xlu1 %v7824_v5, %s7385_s11 }
 0x482   : > { %2568 = vrot.lane.b32.xlu1 %v7975_v32, %s7385_s11 }
 0x486   : > { %2616 = vrot.lane.b32.xlu1 %v7981_v45, %s7385_s11 }
 0x489   : > { %v1537_v58 = vpop.xlane.xlu0 %1536 }
 0x48a   : > { %6927 = vrcp.f32 %v1537_v58  ;;  %v8033_v58 = vpack.c.bf16 %v7840_v9, %v7840_v9 }
 0x491   : > { %v1540_v0 = vpop.xlane.xlu1 %1539 }
 0x492   : > { %v1543_v1 = vpop.xlane.xlu0 %1542  ;;  %6929 = vrcp.f32 %v1540_v0 }
 0x493   : > { %6931 = vrcp.f32 %v1543_v1 }
 0x497   : > { %v6928_v23 = vpop.eup %6927 }
 0x498   : > { %v1567_v22 = vmul.f32 %v6928_v23, %v7872_v11 }
 0x499   : > { %v1546_v3 = vpop.xlane.xlu1 %1545 }
 0x49a   : > { %v1549_v13 = vpop.xlane.xlu0 %1548  ;;  %6933 = vrcp.f32 %v1546_v3  ;;  %v1575_v39 = vpack.c.bf16 %v1567_v22, %v1567_v22 }
 0x49b   : > { %6935 = vrcp.f32 %v1549_v13 }
 0x49c   : > { %6272 = vmatmul.mubr.msk.bf16.vlgmr.msra.gmra.mxu0 %vm1486_vm4, %v1575_v39 }
 0x49d   : > { %6282 = vmatpush3.bf16.msra.mxu0 %v1680_v2  ;;  %6283 = vmatprep.mubr.msk.bf16.mxu0 %vm7384_vm0, %v9036_v46  ;;  %v1910_v2 = vsel %vm1586_vm2, %v8033_v58, 0 }
 0x49e   : > { %6293 = vmatprep.subr.bf16.mxu0 %v9036_v46 }
 0x49f   : > { %v6930_v12 = vpop.eup %6929 }
 0x4a0   : > { %v6932_v20 = vpop.eup %6931  ;;  %v1568_v11 = vmul.f32 %v6930_v12, %v7876_v19 }
 0x4a1   : > { %v1552_v14 = vpop.xlane.xlu1 %1551  ;;  %v1569_v15 = vmul.f32 %v6932_v20, %v7878_v18 }
 0x4a2   : > { %v1555_v52 = vpop.xlane.xlu0 %1554  ;;  %6937 = vrcp.f32 %v1552_v14  ;;  %v1576_v53 = vpack.c.bf16 %v1568_v11, %v1568_v11 }
 0x4a3   : > { %6939 = vrcp.f32 %v1555_v52  ;;  %v1577_v26 = vpack.c.bf16 %v1569_v15, %v1569_v15 }
 0x4a4   : > { %6278 = vmatmul.mubr.msk.bf16.vlgmr.msra.gmra.mxu1 %vm1486_vm4, %v1576_v53 }
 0x4a5   : > { %6284 = vmatmul.mubr.msk.bf16.vlgmr.msra.gmra.mxu0 %vm1486_vm4, %v1577_v26  ;;  %6288 = vmatpush3.bf16.msra.mxu1 %v1726_v29  ;;  %v2005_v0 = vpop.permute.xlu1 %2004 }
 0x4a6   : > { %6294 = vmatpush3.bf16.msra.mxu0 %v1772_v38  ;;  %6289 = vmatprep.mubr.msk.bf16.mxu1 %vm7384_vm0, %v9036_v46  ;;  %v1953_v37 = vpop.permute.xlu0 %1952 }
 0x4a7   : > { %v6934_v19 = vpop.eup %6933  ;;  %6295 = vmatprep.mubr.msk.bf16.mxu0 %vm7384_vm0, %v9036_v46  ;;  %6299 = vmatprep.subr.bf16.mxu1 %v9036_v46  ;;  %v1954_v23 = vrot.slane %v1953_v37, 4 }
 0x4a8   : > { %v6936_v18 = vpop.eup %6935  ;;  %6305 = vmatprep.subr.bf16.mxu0 %v9036_v46  ;;  %v1570_v44 = vmul.f32 %v6934_v19, %v7884_v34 }
 0x4a9   : > { %v1571_v55 = vmul.f32 %v6936_v18, %v7886_v4  ;;  %v1962_v9 = vsel %vm1100_vm1, %v1954_v23, 0  ;;  %v2057_v12 = vpop.permute.xlu1 %2056 }
 0x4aa   : > { %v1578_v57 = vpack.c.bf16 %v1570_v44, %v1570_v44  ;;  %v1957_v34 = vpop.permute.xlu0 %1956 }
 0x4ab   : > { %v1579_v60 = vpack.c.bf16 %v1571_v55, %v1571_v55 }
 0x4ac   : > { %6290 = vmatmul.mubr.msk.bf16.vlgmr.msra.gmra.mxu1 %vm1486_vm4, %v1578_v57  ;;  %v2006_v57 = vrot.slane %v2005_v0, 4 }
 0x4ad   : > { %6296 = vmatmul.mubr.msk.bf16.vlgmr.msra.gmra.mxu0 %vm1486_vm4, %v1579_v60  ;;  %6300 = vmatpush3.bf16.msra.mxu1 %v1818_v62 }
 0x4ae   : > { %6306 = vmatpush3.bf16.msra.mxu0 %v1864_v10  ;;  %6301 = vmatprep.mubr.msk.bf16.mxu1 %vm7384_vm0, %v9036_v46  ;;  %v2161_v39 = vpop.permute.xlu0 %2160 }
 0x4af   : > { %v6938_v31 = vpop.eup %6937  ;;  %6307 = vmatprep.mubr.msk.bf16.mxu0 %vm7384_vm0, %v9036_v46  ;;  %6311 = vmatprep.subr.bf16.mxu1 %v9036_v46  ;;  %v2162_v14 = vrot.slane %v2161_v39, 4 }
 0x4b0   : > { %v6940_v4 = vpop.eup %6939  ;;  %6317 = vmatprep.subr.bf16.mxu0 %v9036_v46  ;;  %v1572_v1 = vmul.f32 %v6938_v31, %v7892_v40  ;;  %v2058_v40 = vrot.slane %v2057_v12, 4 }
 0x4b1   : > { %v1573_v22 = vmul.f32 %v6940_v4, %v7894_v42  ;;  %v2170_v15 = vsel %vm1100_vm1, %v2162_v14, 0 }
 0x4b2   : > { %v1580_v3 = vpack.c.bf16 %v1572_v1, %v1572_v1  ;;  %v2061_v42 = vpop.permute.xlu0 %2060  ;;  %v2066_v20 = vsel %vm1100_vm1, %v2058_v40, 0 }
 0x4b3   : > { %v1581_v13 = vpack.c.bf16 %v1573_v22, %v1573_v22 }
 0x4b4   : > { %6302 = vmatmul.mubr.msk.bf16.vlgmr.msra.gmra.mxu1 %vm1486_vm4, %v1580_v3 }
 0x4b5   : > { %6308 = vmatmul.mubr.msk.bf16.vlgmr.msra.gmra.mxu0 %vm1486_vm4, %v1581_v13  ;;  %6312 = vmatpush3.bf16.msra.mxu1 %v1910_v2 }
 0x4b6   : > { %6318 = vmatpush3.bf16.xpose.msra.mxu0 %v1962_v9  ;;  %6319 = vmatprep.mubr.msk.bf16.mxu0 %vm7384_vm0, %v9036_v46  ;;  %v2265_v11 = vpop.permute.xlu0 %2264 }
 0x4b7   : > { %6329 = vmatprep.subr.bf16.mxu0 %v9036_v46  ;;  %6313 = vmatprep.mubr.msk.bf16.mxu1 %vm7384_vm0, %v9036_v46  ;;  %v2266_v53 = vrot.slane %v2265_v11, 4 }
 0x4b8   : > { %6323 = vmatprep.subr.bf16.mxu1 %v9036_v46 }
 0x4b9   : > { %v2274_v29 = vsel %vm1100_vm1, %v2266_v53, 0 }
 0x4ba   : > { %v2165_v52 = vpop.permute.xlu0 %2164 }
 0x4bd   : > { %6320 = vmatmul.mubr.msk.bf16.vlgmr.msra.gmra.mxu0 %vm1100_vm1, %v1957_v34  ;;  %v2014_v34 = vsel %vm1100_vm1, %v2006_v57, 0 }
 0x4be   : > { %6330 = vmatpush3.bf16.xpose.msra.mxu0 %v2066_v20  ;;  %6331 = vmatprep.mubr.msk.bf16.mxu0 %vm7384_vm0, %v9036_v46  ;;  %v2269_v26 = vpop.permute.xlu0 %2268 }
 0x4bf   : > { %6341 = vmatprep.subr.bf16.mxu0 %v9036_v46 }
 0x4c2   : > { %v2473_v38 = vpop.permute.xlu0 %2472 }
 0x4c3   : > { %v2478_v19 = vsel %vm1586_vm2, %v2473_v38, 0 }
 0x4c5   : > { %6332 = vmatmul.mubr.msk.bf16.vlgmr.msra.gmra.mxu0 %vm1100_vm1, %v2061_v42 }
 0x4c6   : > { %6342 = vmatpush3.bf16.xpose.msra.mxu0 %v2170_v15  ;;  %6343 = vmatprep.mubr.msk.bf16.mxu0 %vm7384_vm0, %v9036_v46 }
 0x4c7   : > { %6353 = vmatprep.subr.bf16.mxu0 %v9036_v46 }
 0x4cd   : > { %6344 = vmatmul.mubr.msk.bf16.vlgmr.msra.gmra.mxu0 %vm1100_vm1, %v2165_v52 }
 0x4ce   : > { %6354 = vmatpush3.bf16.xpose.msra.mxu0 %v2274_v29  ;;  %6355 = vmatprep.mubr.msk.bf16.mxu0 %vm7384_vm0, %v9036_v46 }
 0x4cf   : > { %6365 = vmatprep.subr.bf16.mxu0 %v9036_v46 }
 0x4d5   : > { %6356 = vmatmul.mubr.msk.bf16.vlgmr.msra.gmra.mxu0 %vm1100_vm1, %v2269_v26 }
 0x4d6   : > { %6366 = vmatpush3.bf16.msra.mxu0 %v2478_v19  ;;  %6367 = vmatprep.mubr.msk.bf16.mxu0 %vm7384_vm0, %v9036_v46 }
 0x4d7   : > { %6377 = vmatprep.subr.bf16.mxu0 %v9036_v46 }
 0x4da   : > { %v1558_v18 = vpop.xlane.xlu1 %1557 }
 0x4db   : > { %6941 = vrcp.f32 %v1558_v18 }
 0x4de   : > { %v2109_v37 = vpop.permute.xlu1 %2108 }
 0x4df   : > { %v2110_v31 = vrot.slane %v2109_v37, 4 }
 0x4e1   : > { %v2118_v0 = vsel %vm1100_vm1, %v2110_v31, 0 }
 0x4e2   : > { %v2009_v44 = vpop.permute.xlu1 %2008 }
 0x4e6   : > { %v2213_v10 = vpop.permute.xlu1 %2212 }
 0x4e7   : > { %v2214_v1 = vrot.slane %v2213_v10, 4 }
 0x4e8   : > { %v6942_v55 = vpop.eup %6941 }
 0x4e9   : > { %v1574_v60 = vmul.f32 %v6942_v55, %v7937_v25  ;;  %v2222_v23 = vsel %vm1100_vm1, %v2214_v1, 0 }
 0x4ea   : > { %v2113_v4 = vpop.permute.xlu1 %2112 }
 0x4eb   : > { %v1582_v62 = vpack.c.bf16 %v1574_v60, %v1574_v60 }
 0x4ed   : > { %6314 = vmatmul.mubr.msk.bf16.vlgmr.msra.gmra.mxu1 %vm1486_vm4, %v1582_v62 }
 0x4ee   : > { %6324 = vmatpush3.bf16.xpose.msra.mxu1 %v2014_v34  ;;  %6325 = vmatprep.mubr.msk.bf16.mxu1 %vm7384_vm0, %v9036_v46  ;;  %v2317_v25 = vpop.permute.xlu1 %2316 }
 0x4ef   : > { %6335 = vmatprep.subr.bf16.mxu1 %v9036_v46  ;;  %v2318_v3 = vrot.slane %v2317_v25, 4 }
 0x4f1   : > { %v2326_v39 = vsel %vm1100_vm1, %v2318_v3, 0 }
 0x4f2   : > { %v2217_v22 = vpop.permute.xlu1 %2216 }
 0x4f5   : > { %6326 = vmatmul.mubr.msk.bf16.vlgmr.msra.gmra.mxu1 %vm1100_vm1, %v2009_v44 }
 0x4f6   : > { %6336 = vmatpush3.bf16.xpose.msra.mxu1 %v2118_v0  ;;  %6337 = vmatprep.mubr.msk.bf16.mxu1 %vm7384_vm0, %v9036_v46  ;;  %v2321_v13 = vpop.permute.xlu1 %2320 }
 0x4f7   : > { %6347 = vmatprep.subr.bf16.mxu1 %v9036_v46 }
 0x4fa   : > { %v2521_v2 = vpop.permute.xlu1 %2520 }
 0x4fb   : > { %v2526_v9 = vsel %vm1586_vm2, %v2521_v2, 0 }
 0x4fd   : > { %6338 = vmatmul.mubr.msk.bf16.vlgmr.msra.gmra.mxu1 %vm1100_vm1, %v2113_v4 }
 0x4fe   : > { %6348 = vmatpush3.bf16.xpose.msra.mxu1 %v2222_v23  ;;  %6349 = vmatprep.mubr.msk.bf16.mxu1 %vm7384_vm0, %v9036_v46 }
 0x4ff   : > { %6359 = vmatprep.subr.bf16.mxu1 %v9036_v46 }
 0x505   : > { %6350 = vmatmul.mubr.msk.bf16.vlgmr.msra.gmra.mxu1 %vm1100_vm1, %v2217_v22 }
 0x506   : > { %6360 = vmatpush3.bf16.xpose.msra.mxu1 %v2326_v39  ;;  %6361 = vmatprep.mubr.msk.bf16.mxu1 %vm7384_vm0, %v9036_v46 }
 0x507   : > { %6371 = vmatprep.subr.bf16.mxu1 %v9036_v46 }
 0x50d   : > { %6362 = vmatmul.mubr.msk.bf16.vlgmr.msra.gmra.mxu1 %vm1100_vm1, %v2321_v13 }
 0x50e   : > { %6372 = vmatpush3.bf16.msra.mxu1 %v2526_v9  ;;  %6373 = vmatprep.mubr.msk.bf16.mxu1 %vm7384_vm0, %v9036_v46 }
 0x50f   : > { %6383 = vmatprep.subr.bf16.mxu1 %v9036_v46 }
 0x55c   : > { %v8095_v12 = vpop.f32.mrf.mxu0 }
 0x55e   : > { %v6273_v40 = vpop.f32.mrf.mxu0 }
 0x560   : > { %v1627_v42 = vpop.f32.mrf.mxu0 }
 0x562   : > { %v6274_v20 = vpop.f32.mrf.mxu0 }
 0x564   : > { %v8097_v11 = vpop.f32.mrf.mxu1 }
 0x565   : > { %v8099_v14 = vpop.f32.mrf.mxu0 }
 0x566   : > { %v6279_v15 = vpop.f32.mrf.mxu1 }
 0x567   : > { %v6285_v52 = vpop.f32.mrf.mxu0 }
 0x568   : > { %v1673_v53 = vpop.f32.mrf.mxu1 }
 0x569   : > { %v1719_v26 = vpop.f32.mrf.mxu0 }
 0x56a   : > { %v6280_v29 = vpop.f32.mrf.mxu1 }
 0x56b   : > { %v6286_v38 = vpop.f32.mrf.mxu0 }
 0x56c   : > { %v8101_v19 = vpop.f32.mrf.mxu1 }
 0x56d   : > { %v8103_v18 = vpop.f32.mrf.mxu0 }
 0x56e   : > { %v6291_v37 = vpop.f32.mrf.mxu1 }
 0x56f   : > { %v6297_v44 = vpop.f32.mrf.mxu0 }
 0x570   : > { %v1765_v55 = vpop.f32.mrf.mxu1 }
 0x571   : > { %v1811_v57 = vpop.f32.mrf.mxu0 }
 0x572   : > { %v6292_v60 = vpop.f32.mrf.mxu1 }
 0x573   : > { %v6298_v62 = vpop.f32.mrf.mxu0 }
 0x574   : > { %v8105_v10 = vpop.f32.mrf.mxu1 }
 0x575   : > { %v8107_v34 = vpop.f32.mrf.mxu0 }
 0x576   : > { %v6303_v31 = vpop.f32.mrf.mxu1 }
 0x577   : > { %v6309_v4 = vpop.f32.mrf.mxu0 }
 0x578   : > { %v1857_v0 = vpop.f32.mrf.mxu1 }
 0x579   : > { %v1903_v25 = vpop.f32.mrf.mxu0 }
 0x57a   : > { %v6304_v1 = vpop.f32.mrf.mxu1 }
 0x57b   : > { %v6310_v23 = vpop.f32.mrf.mxu0 }
 0x57d   : > { %v1998_v22 = vpop.f32.mrf.mxu0 }
 0x57e   : > { %v8111_v3 = vsel %vm1098_vm3, %v1998_v22, -1e+30 }
 0x57f   : > { %v6321_v13 = vpop.f32.mrf.mxu0  ;;  %v2376_v39 = vsel %vm1486_vm4, %v8111_v3, -inf }
 0x580   : > { %2377 = vmax.xlane.f32.xlu0 %v2376_v39 }
 0x581   : > { %v2001_v2 = vpop.f32.mrf.mxu0 }
 0x583   : > { %v6322_v9 = vpop.f32.mrf.mxu0 }
 0x585   : > { %v2102_v40 = vpop.f32.mrf.mxu0 }
 0x586   : > { %v2370_v42 = vsel %vm1098_vm3, %v2102_v40, -1e+30 }
 0x587   : > { %v6333_v20 = vpop.f32.mrf.mxu0  ;;  %v2382_v15 = vsel %vm1486_vm4, %v2370_v42, -inf }
 0x588   : > { %2383 = vmax.xlane.f32.xlu0 %v2382_v15 }
 0x589   : > { %v2105_v52 = vpop.f32.mrf.mxu0 }
 0x58b   : > { %v6334_v53 = vpop.f32.mrf.mxu0 }
 0x58d   : > { %v2206_v26 = vpop.f32.mrf.mxu0 }
 0x58e   : > { %v2372_v15 = vsel %vm1098_vm3, %v2206_v26, -1e+30 }
 0x58f   : > { %v6345_v29 = vpop.f32.mrf.mxu0 }
 0x590   : > { %v2388_v29 = vsel %vm1486_vm4, %v2372_v15, -inf }
 0x591   : > { %v2209_v38 = vpop.f32.mrf.mxu0 }
 0x593   : > { %v6346_v37 = vpop.f32.mrf.mxu0 }
 0x595   : > { %v2310_v44 = vpop.f32.mrf.mxu0 }
 0x596   : > { %v8131_v38 = vsel %vm1098_vm3, %v2310_v44, -1e+30 }
 0x597   : > { %v6357_v55 = vpop.f32.mrf.mxu0 }
 0x599   : > { %v2313_v57 = vpop.f32.mrf.mxu0 }
 0x59b   : > { %v6358_v60 = vpop.f32.mrf.mxu0 }
 0x59c   : > { %v2394_v60 = vsel %vm1486_vm4, %v8131_v38, -inf }
 0x5ad   : > { %v8118_v62 = vpop.f32.mrf.mxu1 }
 0x5af   : > { %v6315_v31 = vpop.f32.mrf.mxu1 }
 0x5b1   : > { %v1949_v4 = vpop.f32.mrf.mxu1 }
 0x5b3   : > { %v6316_v0 = vpop.f32.mrf.mxu1 }
 0x5b5   : > { %v2050_v25 = vpop.f32.mrf.mxu1 }
 0x5b6   : > { %v2369_v1 = vsel %vm1098_vm3, %v2050_v25, -1e+30 }
 0x5b7   : > { %v6327_v23 = vpop.f32.mrf.mxu1  ;;  %v2379_v22 = vsel %vm1486_vm4, %v2369_v1, -inf }
 0x5b8   : > { %2380 = vmax.xlane.f32.xlu1 %v2379_v22 }
 0x5b9   : > { %v2053_v13 = vpop.f32.mrf.mxu1 }
 0x5bb   : > { %v6328_v39 = vpop.f32.mrf.mxu1 }
 0x5bd   : > { %v2154_v2 = vpop.f32.mrf.mxu1 }
 0x5be   : > { %v2371_v9 = vsel %vm1098_vm3, %v2154_v2, -1e+30 }
 0x5bf   : > { %v6339_v40 = vpop.f32.mrf.mxu1  ;;  %v2385_v20 = vsel %vm1486_vm4, %v2371_v9, -inf }
 0x5c0   : > { %2386 = vmax.xlane.f32.xlu0 %v2385_v20 }
 0x5c1   : > { %v2157_v52 = vpop.f32.mrf.mxu1 }
 0x5c3   : > { %v6340_v53 = vpop.f32.mrf.mxu1 }
 0x5c4   : > { %2389 = vmax.xlane.f32.xlu0 %v2388_v29 }
 0x5c5   : > { %v2258_v37 = vpop.f32.mrf.mxu1 }
 0x5c6   : > { %v2373_v55 = vsel %vm1098_vm3, %v2258_v37, -1e+30 }
 0x5c7   : > { %v6351_v57 = vpop.f32.mrf.mxu1  ;;  %v2391_v26 = vsel %vm1486_vm4, %v2373_v55, -inf }
 0x5c8   : > { %2395 = vmax.xlane.f32.xlu0 %v2394_v60  ;;  %2392 = vmax.xlane.f32.xlu1 %v2391_v26  ;;  %v2569_v26 = vpop.permute.xlu1 %2568 }
 0x5c9   : > { %v2261_v31 = vpop.f32.mrf.mxu1 }
 0x5cb   : > { %v6352_v4 = vpop.f32.mrf.mxu1 }
 0x5cc   : > { %v8154_v31 = vpop.permute.xlu1 %2616 }
 0x5cd   : > { %v2362_v0 = vpop.f32.mrf.mxu1 }
 0x5ce   : > { %v8144_v22 = vsel %vm1098_vm3, %v2362_v0, -1e+30 }
 0x5cf   : > { %v6363_v25 = vpop.f32.mrf.mxu1  ;;  %v2397_v13 = vsel %vm1486_vm4, %v8144_v22, -inf }
 0x5d1   : > { %v2365_v23 = vpop.f32.mrf.mxu1 }
 0x5d3   : > { %v6364_v44 = vpop.f32.mrf.mxu1 }
 0x5d9   : > { %2712 = vrot.lane.b32.xlu1 %v8011_v7, %s7385_s11 }
 0x5de   : > { %2664 = vrot.lane.b32.xlu0 %v7995_v24, %s7385_s11 }
 0x5fd   : > { %2398 = vmax.xlane.f32.xlu1 %v2397_v13 }
 0x609   : > { %v2378_v39 = vpop.xlane.xlu0 %2377 }
 0x60a   : > { %v2400_v2 = vsub.f32 %v8111_v3, %v2378_v39 }
 0x60c   : > { %v2408_v40 = vmul.f32 1.442695, %v2400_v2 }
 0x60e   : > { %6943 = vpow2.f32 %v2408_v40 }
 0x611   : > { %v2384_v20 = vpop.xlane.xlu0 %2383 }
 0x612   : > { %v2402_v52 = vsub.f32 %v2370_v42, %v2384_v20 }
 0x614   : > { %v2412_v53 = vmul.f32 1.442695, %v2402_v52 }
 0x616   : > { %6945 = vpow2.f32 %v2412_v53 }
 0x61b   : > { %v6944_v29 = vpop.eup %6943 }
 0x61c   : > { %v2424_v37 = vsel %vm1486_vm4, %v6944_v29, 0.0 }
 0x61d   : > { %2425 = vadd.xlane.f32.xlu0 %v2424_v37 }
 0x623   : > { %v8150_v57 = vpop.eup %6945 }
 0x624   : > { %v2430_v60 = vsel %vm1486_vm4, %v8150_v57, 0.0 }
 0x625   : > { %2431 = vadd.xlane.f32.xlu0 %v2430_v60 }
 0x641   : > { %v2381_v3 = vpop.xlane.xlu1 %2380 }
 0x642   : > { %v2401_v4 = vsub.f32 %v2369_v1, %v2381_v3 }
 0x644   : > { %v2410_v0 = vmul.f32 1.442695, %v2401_v4 }
 0x646   : > { %6947 = vpow2.f32 %v2410_v0 }
 0x649   : > { %v2387_v42 = vpop.xlane.xlu0 %2386 }
 0x64a   : > { %v2403_v25 = vsub.f32 %v2371_v9, %v2387_v42 }
 0x64c   : > { %v2414_v23 = vmul.f32 1.442695, %v2403_v25 }
 0x64d   : > { %v2390_v44 = vpop.xlane.xlu0 %2389 }
 0x64e   : > { %6949 = vpow2.f32 %v2414_v23  ;;  %v2404_v13 = vsub.f32 %v2372_v15, %v2390_v44 }
 0x650   : > { %v2416_v39 = vmul.f32 1.442695, %v2404_v13 }
 0x651   : > { %v2393_v15 = vpop.xlane.xlu1 %2392  ;;  %v2396_v37 = vpop.xlane.xlu0 %2395 }
 0x652   : > { %6951 = vpow2.f32 %v2416_v39  ;;  %v2405_v53 = vsub.f32 %v2373_v55, %v2393_v15  ;;  %v2406_v60 = vsub.f32 %v8131_v38, %v2396_v37  ;;  %v2574_v37 = vsel %vm1586_vm2, %v2569_v26, 0 }
 0x653   : > { %v8156_v2 = vpop.eup %6947 }
 0x654   : > { %v2427_v40 = vsel %vm1486_vm4, %v8156_v2, 0.0  ;;  %v2418_v3 = vmul.f32 1.442695, %v2405_v53  ;;  %v2420_v4 = vmul.f32 1.442695, %v2406_v60 }
 0x655   : > { %2428 = vadd.xlane.f32.xlu1 %v2427_v40  ;;  %v2665_v55 = vpop.permute.xlu0 %2664  ;;  %v8183_v44 = vpop.permute.xlu1 %2712 }
 0x656   : > { %6953 = vpow2.f32 %v2418_v3  ;;  %v2670_v26 = vsel %vm1586_vm2, %v2665_v55, 0 }
 0x657   : > { %6955 = vpow2.f32 %v2420_v4 }
 0x65b   : > { %v8160_v20 = vpop.eup %6949 }
 0x65c   : > { %v2433_v1 = vsel %vm1486_vm4, %v8160_v20, 0.0 }
 0x65d   : > { %2434 = vadd.xlane.f32.xlu1 %v2433_v1 }
 0x65f   : > { %v8164_v52 = vpop.eup %6951 }
 0x660   : > { %v2436_v9 = vsel %vm1486_vm4, %v8164_v52, 0.0 }
 0x661   : > { %2437 = vadd.xlane.f32.xlu0 %v2436_v9 }
 0x663   : > { %v8173_v0 = vpop.eup %6953 }
 0x664   : > { %v2439_v42 = vsel %vm1486_vm4, %v8173_v0, 0.0  ;;  %v8177_v25 = vpop.eup %6955 }
 0x665   : > { %v2442_v23 = vsel %vm1486_vm4, %v8177_v25, 0.0 }
 0x66e   : > { %2808 = vrot.lane.b32.xlu1 %v8033_v58, %s7385_s11 }
 0x677   : > { %2760 = vrot.lane.b32.xlu0 %v8017_v49, %s7385_s11 }
 0x686   : > { %v2399_v13 = vpop.xlane.xlu1 %2398 }
 0x687   : > { %v2407_v39 = vsub.f32 %v8144_v22, %v2399_v13 }
 0x689   : > { %v2422_v1 = vmul.f32 1.442695, %v2407_v39  ;;  %v2622_v39 = vsel %vm1586_vm2, %v8154_v31, 0  ;;  %v2718_v31 = vsel %vm1586_vm2, %v8183_v44, 0 }
 0x692   : > { %2440 = vadd.xlane.f32.xlu1 %v2439_v42 }
 0x696   : > { %2443 = vadd.xlane.f32.xlu0 %v2442_v23 }
 0x6a3   : > { %2907 = vrot.lane.b32.xlu1 %v7732_v21, %s7386_s2 }
 0x6a6   : > { %v2426_v38 = vpop.xlane.xlu0 %2425 }
 0x6a7   : > { %6957 = vrcp.f32 %v2426_v38 }
 0x6ac   : > { %2856 = vrot.lane.b32.xlu0 %v7726_v16, %s7386_s2 }
 0x6ae   : > { %v2432_v40 = vpop.xlane.xlu0 %2431 }
 0x6af   : > { %6959 = vrcp.f32 %v2432_v40 }
 0x6b0   : > { %2958 = vrot.lane.b32.xlu0 %v7739_v28, %s7386_s2  ;;  %6961 = vpow2.f32 %v2422_v1 }
 0x6b4   : > { %v6958_v9 = vpop.eup %6957  ;;  %2859 = vrot.lane.b32.xlu0 %v7908_v50, %s7386_s2 }
 0x6b5   : > { %v2456_v15 = vmul.f32 %v6958_v9, %v6944_v29 }
 0x6b7   : > { %v2464_v53 = vpack.c.bf16 %v2456_v15, %v2456_v15 }
 0x6b8   : > { %3060 = vrot.lane.b32.xlu0 %v7759_v43, %s7386_s2 }
 0x6b9   : > { %6368 = vmatmul.mubr.msk.bf16.vlgmr.msra.gmra.mxu0 %vm1486_vm4, %v2464_v53 }
 0x6ba   : > { %6378 = vmatpush3.bf16.msra.mxu0 %v2574_v37  ;;  %6379 = vmatprep.mubr.msk.bf16.mxu0 %vm7384_vm0, %v9036_v46 }
 0x6bb   : > { %6389 = vmatprep.subr.bf16.mxu0 %v9036_v46 }
 0x6bc   : > { %v6960_v22 = vpop.eup %6959  ;;  %2961 = vrot.lane.b32.xlu0 %v7917_v59, %s7386_s2 }
 0x6bd   : > { %v2458_v29 = vmul.f32 %v6960_v22, %v8150_v57  ;;  %v8208_v3 = vpop.eup %6961 }
 0x6be   : > { %v2445_v57 = vsel %vm1486_vm4, %v8208_v3, 0.0 }
 0x6bf   : > { %v2466_v60 = vpack.c.bf16 %v2458_v29, %v2458_v29 }
 0x6c0   : > { %3162 = vrot.lane.b32.xlu0 %v7783_v56, %s7386_s2 }
 0x6c1   : > { %6380 = vmatmul.mubr.msk.bf16.vlgmr.msra.gmra.mxu0 %vm1486_vm4, %v2466_v60 }
 0x6c2   : > { %6390 = vmatpush3.bf16.msra.mxu0 %v2670_v26  ;;  %6391 = vmatprep.mubr.msk.bf16.mxu0 %vm7384_vm0, %v9036_v46 }
 0x6c3   : > { %6401 = vmatprep.subr.bf16.mxu0 %v9036_v46 }
 0x6c4   : > { %3063 = vrot.lane.b32.xlu0 %v7925_v47, %s7386_s2 }
 0x6c7   : > { %2446 = vadd.xlane.f32.xlu1 %v2445_v57 }
 0x6c8   : > { %3165 = vrot.lane.b32.xlu0 %v7931_v33, %s7386_s2 }
 0x6cc   : > { %3368 = vrot.lane.b32.xlu0 %v7806_v30, %s7386_s2 }
 0x6d8   : > { %3009 = vrot.lane.b32.xlu1 %v7746_v35, %s7386_s2 }
 0x6dc   : > { %2910 = vrot.lane.b32.xlu1 %v7945_v41, %s7386_s2 }
 0x6de   : > { %v2429_v4 = vpop.xlane.xlu1 %2428 }
 0x6df   : > { %6963 = vrcp.f32 %v2429_v4 }
 0x6e0   : > { %3111 = vrot.lane.b32.xlu1 %v7766_v51, %s7386_s2 }
 0x6e4   : > { %3012 = vrot.lane.b32.xlu1 %v7953_v54, %s7386_s2 }
 0x6e6   : > { %v2435_v42 = vpop.xlane.xlu1 %2434 }
 0x6e7   : > { %6965 = vrcp.f32 %v2435_v42 }
 0x6e8   : > { %3213 = vrot.lane.b32.xlu1 %v7792_v61, %s7386_s2 }
 0x6ea   : > { %v2438_v23 = vpop.xlane.xlu0 %2437 }
 0x6eb   : > { %6967 = vrcp.f32 %v2438_v23 }
 0x6ec   : > { %v6964_v55 = vpop.eup %6963  ;;  %3114 = vrot.lane.b32.xlu1 %v7961_v17, %s7386_s2 }
 0x6ed   : > { %v2457_v38 = vmul.f32 %v6964_v55, %v8156_v2 }
 0x6ee   : > { %v2761_v53 = vpop.permute.xlu0 %2760 }
 0x6ef   : > { %v2465_v13 = vpack.c.bf16 %v2457_v38, %v2457_v38 }
 0x6f0   : > { %3216 = vrot.lane.b32.xlu1 %v7967_v63, %s7386_s2 }
 0x6f1   : > { %6374 = vmatmul.mubr.msk.bf16.vlgmr.msra.gmra.mxu1 %vm1486_vm4, %v2465_v13 }
 0x6f2   : > { %6384 = vmatpush3.bf16.msra.mxu1 %v2622_v39  ;;  %6385 = vmatprep.mubr.msk.bf16.mxu1 %vm7384_vm0, %v9036_v46 }
 0x6f3   : > { %6395 = vmatprep.subr.bf16.mxu1 %v9036_v46 }
 0x6f4   : > { %v6966_v40 = vpop.eup %6965  ;;  %3416 = vrot.lane.b32.xlu1 %v7824_v5, %s7386_s2 }
 0x6f5   : > { %v2459_v2 = vmul.f32 %v6966_v40, %v8160_v20  ;;  %v2766_v20 = vsel %vm1586_vm2, %v2761_v53, 0 }
 0x6f7   : > { %v2467_v1 = vpack.c.bf16 %v2459_v2, %v2459_v2 }
 0x6f8   : > { %v6968_v9 = vpop.eup %6967  ;;  %3464 = vrot.lane.b32.xlu1 %v7975_v32, %s7386_s2 }
 0x6f9   : > { %6386 = vmatmul.mubr.msk.bf16.vlgmr.msra.gmra.mxu1 %vm1486_vm4, %v2467_v1  ;;  %v2460_v15 = vmul.f32 %v6968_v9, %v8164_v52  ;;  %v2809_v52 = vpop.permute.xlu1 %2808 }
 0x6fa   : > { %6396 = vmatpush3.bf16.msra.mxu1 %v2718_v31  ;;  %6397 = vmatprep.mubr.msk.bf16.mxu1 %vm7384_vm0, %v9036_v46  ;;  %v2814_v55 = vsel %vm1586_vm2, %v2809_v52, 0 }
 0x6fb   : > { %v2468_v37 = vpack.c.bf16 %v2460_v15, %v2460_v15  ;;  %6407 = vmatprep.subr.bf16.mxu1 %v9036_v46 }
 0x6fc   : > { %3512 = vrot.lane.b32.xlu1 %v7981_v45, %s7386_s2 }
 0x6fd   : > { %6392 = vmatmul.mubr.msk.bf16.vlgmr.msra.gmra.mxu0 %vm1486_vm4, %v2468_v37 }
 0x6fe   : > { %6402 = vmatpush3.bf16.msra.mxu0 %v2766_v20  ;;  %6403 = vmatprep.mubr.msk.bf16.mxu0 %vm7384_vm0, %v9036_v46 }
 0x6ff   : > { %6413 = vmatprep.subr.bf16.mxu0 %v9036_v46 }
 0x71b   : > { %v2441_v44 = vpop.xlane.xlu1 %2440 }
 0x71c   : > { %6969 = vrcp.f32 %v2441_v44 }
 0x71f   : > { %v2444_v22 = vpop.xlane.xlu0 %2443  ;;  %v2908_v44 = vpop.permute.xlu1 %2907 }
 0x720   : > { %6971 = vrcp.f32 %v2444_v22 }
 0x723   : > { %v2857_v29 = vpop.permute.xlu0 %2856 }
 0x724   : > { %v2858_v38 = vrot.slane %v2857_v29, 4 }
 0x727   : > { %v2959_v60 = vpop.permute.xlu0 %2958 }
 0x728   : > { %v2960_v2 = vrot.slane %v2959_v60, 4 }
 0x729   : > { %v6970_v26 = vpop.eup %6969 }
 0x72a   : > { %v2461_v57 = vmul.f32 %v6970_v26, %v8173_v0  ;;  %v2865_v0 = vsel %vm1100_vm1, %v2858_v38, 0  ;;  %v2967_v1 = vsel %vm1100_vm1, %v2960_v2, 0 }
 0x72b   : > { %v2860_v4 = vpop.permute.xlu0 %2859 }
 0x72c   : > { %v2469_v42 = vpack.c.bf16 %v2461_v57, %v2461_v57 }
 0x72d   : > { %v6972_v23 = vpop.eup %6971 }
 0x72e   : > { %6398 = vmatmul.mubr.msk.bf16.vlgmr.msra.gmra.mxu1 %vm1486_vm4, %v2469_v42  ;;  %v2462_v13 = vmul.f32 %v6972_v23, %v8177_v25  ;;  %v2909_v42 = vrot.slane %v2908_v44, 4 }
 0x72f   : > { %6408 = vmatpush3.bf16.msra.mxu1 %v2814_v55  ;;  %6409 = vmatprep.mubr.msk.bf16.mxu1 %vm7384_vm0, %v9036_v46  ;;  %v3061_v40 = vpop.permute.xlu0 %3060 }
 0x730   : > { %v2470_v39 = vpack.c.bf16 %v2462_v13, %v2462_v13  ;;  %6419 = vmatprep.subr.bf16.mxu1 %v9036_v46  ;;  %v3062_v31 = vrot.slane %v3061_v40, 4  ;;  %v2916_v13 = vsel %vm1100_vm1, %v2909_v42, 0 }
 0x732   : > { %6404 = vmatmul.mubr.msk.bf16.vlgmr.msra.gmra.mxu0 %vm1486_vm4, %v2470_v39  ;;  %v3069_v15 = vsel %vm1100_vm1, %v3062_v31, 0 }
 0x733   : > { %6414 = vmatpush3.bf16.xpose.msra.mxu0 %v2865_v0  ;;  %6415 = vmatprep.mubr.msk.bf16.mxu0 %vm7384_vm0, %v9036_v46  ;;  %v2962_v25 = vpop.permute.xlu0 %2961 }
 0x734   : > { %6425 = vmatprep.subr.bf16.mxu0 %v9036_v46 }
 0x737   : > { %v3163_v9 = vpop.permute.xlu0 %3162 }
 0x738   : > { %v3164_v37 = vrot.slane %v3163_v9, 4 }
 0x73a   : > { %6416 = vmatmul.mubr.msk.bf16.vlgmr.msra.gmra.mxu0 %vm1100_vm1, %v2860_v4  ;;  %v3171_v52 = vsel %vm1100_vm1, %v3164_v37, 0 }
 0x73b   : > { %6426 = vmatpush3.bf16.xpose.msra.mxu0 %v2967_v1  ;;  %6427 = vmatprep.mubr.msk.bf16.mxu0 %vm7384_vm0, %v9036_v46  ;;  %v3064_v53 = vpop.permute.xlu0 %3063 }
 0x73c   : > { %6437 = vmatprep.subr.bf16.mxu0 %v9036_v46 }
 0x73f   : > { %v3166_v20 = vpop.permute.xlu0 %3165 }
 0x742   : > { %6428 = vmatmul.mubr.msk.bf16.vlgmr.msra.gmra.mxu0 %vm1100_vm1, %v2962_v25 }
 0x743   : > { %6438 = vmatpush3.bf16.xpose.msra.mxu0 %v3069_v15  ;;  %6439 = vmatprep.mubr.msk.bf16.mxu0 %vm7384_vm0, %v9036_v46  ;;  %v3369_v22 = vpop.permute.xlu0 %3368 }
 0x744   : > { %6449 = vmatprep.subr.bf16.mxu0 %v9036_v46  ;;  %v3374_v60 = vsel %vm1586_vm2, %v3369_v22, 0 }
 0x74a   : > { %6440 = vmatmul.mubr.msk.bf16.vlgmr.msra.gmra.mxu0 %vm1100_vm1, %v3064_v53 }
 0x74b   : > { %6450 = vmatpush3.bf16.xpose.msra.mxu0 %v3171_v52  ;;  %6451 = vmatprep.mubr.msk.bf16.mxu0 %vm7384_vm0, %v9036_v46 }
 0x74c   : > { %6461 = vmatprep.subr.bf16.mxu0 %v9036_v46 }
 0x750   : > { %v2447_v29 = vpop.xlane.xlu1 %2446 }
 0x751   : > { %6973 = vrcp.f32 %v2447_v29 }
 0x752   : > { %6452 = vmatmul.mubr.msk.bf16.vlgmr.msra.gmra.mxu0 %vm1100_vm1, %v3166_v20 }
 0x753   : > { %6462 = vmatpush3.bf16.msra.mxu0 %v3374_v60  ;;  %6463 = vmatprep.mubr.msk.bf16.mxu0 %vm7384_vm0, %v9036_v46 }
 0x754   : > { %6473 = vmatprep.subr.bf16.mxu0 %v9036_v46  ;;  %v3010_v26 = vpop.permute.xlu1 %3009 }
 0x755   : > { %v3011_v39 = vrot.slane %v3010_v26, 4 }
 0x757   : > { %v3018_v0 = vsel %vm1100_vm1, %v3011_v39, 0 }
 0x758   : > { %v2911_v57 = vpop.permute.xlu1 %2910 }
 0x75c   : > { %v3112_v38 = vpop.permute.xlu1 %3111 }
 0x75d   : > { %v3113_v2 = vrot.slane %v3112_v38, 4 }
 0x75e   : > { %v6974_v4 = vpop.eup %6973 }
 0x75f   : > { %v2463_v23 = vmul.f32 %v6974_v4, %v8208_v3  ;;  %v3120_v25 = vsel %vm1100_vm1, %v3113_v2, 0 }
 0x760   : > { %v3013_v40 = vpop.permute.xlu1 %3012 }
 0x761   : > { %v2471_v55 = vpack.c.bf16 %v2463_v23, %v2463_v23 }
 0x763   : > { %6410 = vmatmul.mubr.msk.bf16.vlgmr.msra.gmra.mxu1 %vm1486_vm4, %v2471_v55 }
 0x764   : > { %6420 = vmatpush3.bf16.xpose.msra.mxu1 %v2916_v13  ;;  %6421 = vmatprep.mubr.msk.bf16.mxu1 %vm7384_vm0, %v9036_v46  ;;  %v3214_v3 = vpop.permute.xlu1 %3213 }
 0x765   : > { %6431 = vmatprep.subr.bf16.mxu1 %v9036_v46  ;;  %v3215_v9 = vrot.slane %v3214_v3, 4 }
 0x767   : > { %v3222_v53 = vsel %vm1100_vm1, %v3215_v9, 0 }
 0x768   : > { %v3115_v1 = vpop.permute.xlu1 %3114 }
 0x76b   : > { %6422 = vmatmul.mubr.msk.bf16.vlgmr.msra.gmra.mxu1 %vm1100_vm1, %v2911_v57 }
 0x76c   : > { %6432 = vmatpush3.bf16.xpose.msra.mxu1 %v3018_v0  ;;  %6433 = vmatprep.mubr.msk.bf16.mxu1 %vm7384_vm0, %v9036_v46  ;;  %v3217_v15 = vpop.permute.xlu1 %3216 }
 0x76d   : > { %6443 = vmatprep.subr.bf16.mxu1 %v9036_v46 }
 0x770   : > { %v3417_v44 = vpop.permute.xlu1 %3416 }
 0x771   : > { %v3422_v29 = vsel %vm1586_vm2, %v3417_v44, 0 }
 0x773   : > { %6434 = vmatmul.mubr.msk.bf16.vlgmr.msra.gmra.mxu1 %vm1100_vm1, %v3013_v40 }
 0x774   : > { %6444 = vmatpush3.bf16.xpose.msra.mxu1 %v3120_v25  ;;  %6445 = vmatprep.mubr.msk.bf16.mxu1 %vm7384_vm0, %v9036_v46  ;;  %v3465_v6 = vpop.permute.xlu1 %3464 }
 0x775   : > { %6455 = vmatprep.subr.bf16.mxu1 %v9036_v46 }
 0x779   : > { %v8307_v31 = vpop.f32.mrf.mxu0 }
 0x77b   : > { %v6369_v37 = vpop.f32.mrf.mxu0  ;;  %6446 = vmatmul.mubr.msk.bf16.vlgmr.msra.gmra.mxu1 %vm1100_vm1, %v3115_v1 }
 0x77c   : > { %6456 = vmatpush3.bf16.xpose.msra.mxu1 %v3222_v53  ;;  %6457 = vmatprep.mubr.msk.bf16.mxu1 %vm7384_vm0, %v9036_v46 }
 0x77d   : > { %v2517_v20 = vpop.f32.mrf.mxu0  ;;  %6467 = vmatprep.subr.bf16.mxu1 %v9036_v46 }
 0x77f   : > { %v6370_v52 = vpop.f32.mrf.mxu0 }
 0x781   : > { %v8314_v22 = vpop.f32.mrf.mxu0 }
 0x783   : > { %v6381_v60 = vpop.f32.mrf.mxu0  ;;  %6458 = vmatmul.mubr.msk.bf16.vlgmr.msra.gmra.mxu1 %vm1100_vm1, %v3217_v15 }
 0x784   : > { %6468 = vmatpush3.bf16.msra.mxu1 %v3422_v29  ;;  %6469 = vmatprep.mubr.msk.bf16.mxu1 %vm7384_vm0, %v9036_v46 }
 0x785   : > { %v2613_v26 = vpop.f32.mrf.mxu0  ;;  %6479 = vmatprep.subr.bf16.mxu1 %v9036_v46 }
 0x787   : > { %v6382_v57 = vpop.f32.mrf.mxu0 }
 0x7b1   : > { %v8321_v4 = vpop.f32.mrf.mxu1 }
 0x7b3   : > { %v6375_v23 = vpop.f32.mrf.mxu1 }
 0x7b5   : > { %v2565_v55 = vpop.f32.mrf.mxu1 }
 0x7b7   : > { %v6376_v38 = vpop.f32.mrf.mxu1 }
 0x7b9   : > { %v8325_v13 = vpop.f32.mrf.mxu1 }
 0x7bb   : > { %v6387_v40 = vpop.f32.mrf.mxu1 }
 0x7bd   : > { %v2661_v0 = vpop.f32.mrf.mxu1  ;;  %v8329_v3 = vpop.f32.mrf.mxu0 }
 0x7bf   : > { %v6388_v2 = vpop.f32.mrf.mxu1  ;;  %v6393_v25 = vpop.f32.mrf.mxu0 }
 0x7c1   : > { %v2709_v1 = vpop.f32.mrf.mxu0 }
 0x7c3   : > { %v6394_v9 = vpop.f32.mrf.mxu0 }
 0x7ee   : > { %v8331_v15 = vpop.f32.mrf.mxu1 }
 0x7f0   : > { %v6399_v37 = vpop.f32.mrf.mxu1 }
 0x7f2   : > { %v2757_v20 = vpop.f32.mrf.mxu1  ;;  %v8335_v52 = vpop.f32.mrf.mxu0 }
 0x7f4   : > { %v6400_v44 = vpop.f32.mrf.mxu1  ;;  %v6405_v29 = vpop.f32.mrf.mxu0 }
 0x7f6   : > { %v2805_v60 = vpop.f32.mrf.mxu0 }
 0x7f8   : > { %v6406_v26 = vpop.f32.mrf.mxu0 }
 0x7fa   : > { %v2901_v57 = vpop.f32.mrf.mxu0 }
 0x7fb   : > { %v8339_v23 = vsel %vm1098_vm3, %v2901_v57, -1e+30 }
 0x7fc   : > { %v6417_v55 = vpop.f32.mrf.mxu0  ;;  %v3272_v38 = vsel %vm1486_vm4, %v8339_v23, -inf }
 0x7fd   : > { %3273 = vmax.xlane.f32.xlu0 %v3272_v38 }
 0x7fe   : > { %v2904_v40 = vpop.f32.mrf.mxu0 }
 0x800   : > { %v6418_v0 = vpop.f32.mrf.mxu0 }
 0x802   : > { %v3003_v2 = vpop.f32.mrf.mxu0 }
 0x803   : > { %v3266_v25 = vsel %vm1098_vm3, %v3003_v2, -1e+30 }
 0x804   : > { %v6429_v1 = vpop.f32.mrf.mxu0  ;;  %v3278_v9 = vsel %vm1486_vm4, %v3266_v25, -inf }
 0x805   : > { %3279 = vmax.xlane.f32.xlu0 %v3278_v9 }
 0x806   : > { %v3006_v37 = vpop.f32.mrf.mxu0 }
 0x808   : > { %v6430_v20 = vpop.f32.mrf.mxu0 }
 0x80a   : > { %v3105_v44 = vpop.f32.mrf.mxu0 }
 0x80c   : > { %v6441_v29 = vpop.f32.mrf.mxu0 }
 0x80e   : > { %v3108_v60 = vpop.f32.mrf.mxu0 }
 0x810   : > { %v6442_v26 = vpop.f32.mrf.mxu0 }
 0x812   : > { %v3207_v57 = vpop.f32.mrf.mxu0 }
 0x814   : > { %v6453_v55 = vpop.f32.mrf.mxu0 }
 0x816   : > { %v3210_v48 = vpop.f32.mrf.mxu0 }
 0x818   : > { %v6454_v38 = vpop.f32.mrf.mxu0 }
 0x823   : > { %v8346_v40 = vpop.f32.mrf.mxu1 }
 0x825   : > { %v6411_v2 = vpop.f32.mrf.mxu1 }
 0x827   : > { %v2853_v1 = vpop.f32.mrf.mxu1 }
 0x829   : > { %v6412_v36 = vpop.f32.mrf.mxu1 }
 0x82a   : > { %v3268_v36 = vsel %vm1098_vm3, %v3105_v44, -1e+30 }
 0x82b   : > { %v2952_v53 = vpop.f32.mrf.mxu1 }
 0x82c   : > { %v3265_v9 = vsel %vm1098_vm3, %v2952_v53, -1e+30  ;;  %v3284_v53 = vsel %vm1486_vm4, %v3268_v36, -inf }
 0x82d   : > { %v6423_v37 = vpop.f32.mrf.mxu1  ;;  %v3275_v20 = vsel %vm1486_vm4, %v3265_v9, -inf }
 0x82e   : > { %3276 = vmax.xlane.f32.xlu1 %v3275_v20  ;;  %v8361_v37 = vsel %vm1098_vm3, %v3207_v57, -1e+30 }
 0x82f   : > { %v2955_v29 = vpop.f32.mrf.mxu1  ;;  %v3290_v44 = vsel %vm1486_vm4, %v8361_v37, -inf }
 0x831   : > { %v6424_v60 = vpop.f32.mrf.mxu1 }
 0x833   : > { %v3054_v48 = vpop.f32.mrf.mxu1 }
 0x834   : > { %v3267_v26 = vsel %vm1098_vm3, %v3054_v48, -1e+30 }
 0x835   : > { %v6435_v55 = vpop.f32.mrf.mxu1  ;;  %v3281_v38 = vsel %vm1486_vm4, %v3267_v26, -inf }
 0x836   : > { %3282 = vmax.xlane.f32.xlu0 %v3281_v38 }
 0x837   : > { %v3057_v2 = vpop.f32.mrf.mxu1 }
 0x839   : > { %v6436_v1 = vpop.f32.mrf.mxu1 }
 0x83a   : > { %3285 = vmax.xlane.f32.xlu0 %v3284_v53 }
 0x83b   : > { %v3156_v20 = vpop.f32.mrf.mxu1 }
 0x83c   : > { %v3269_v29 = vsel %vm1098_vm3, %v3156_v20, -1e+30 }
 0x83d   : > { %v3287_v60 = vsel %vm1486_vm4, %v3269_v29, -inf  ;;  %v6447_v48 = vpop.f32.mrf.mxu1 }
 0x83e   : > { %3291 = vmax.xlane.f32.xlu0 %v3290_v44  ;;  %3288 = vmax.xlane.f32.xlu1 %v3287_v60 }
 0x83f   : > { %v3159_v55 = vpop.f32.mrf.mxu1 }
 0x841   : > { %v6448_v38 = vpop.f32.mrf.mxu1 }
 0x843   : > { %v3258_v2 = vpop.f32.mrf.mxu1 }
 0x844   : > { %v8374_v53 = vsel %vm1098_vm3, %v3258_v2, -1e+30 }
 0x845   : > { %v6459_v1 = vpop.f32.mrf.mxu1  ;;  %v3293_v20 = vsel %vm1486_vm4, %v8374_v53, -inf }
 0x847   : > { %v3261_v0 = vpop.f32.mrf.mxu1 }
 0x849   : > { %v6460_v57 = vpop.f32.mrf.mxu1 }
 0x84f   : > { %3608 = vrot.lane.b32.xlu1 %v8011_v7, %s7386_s2 }
 0x854   : > { %3560 = vrot.lane.b32.xlu0 %v7995_v24, %s7386_s2 }
 0x873   : > { %3294 = vmax.xlane.f32.xlu1 %v3293_v20 }
 0x886   : > { %v3274_v60 = vpop.xlane.xlu0 %3273 }
 0x887   : > { %v3296_v48 = vsub.f32 %v8339_v23, %v3274_v60  ;;  %v8387_v23 = vpop.permute.xlu1 %3512 }
 0x889   : > { %v3304_v44 = vmul.f32 1.442695, %v3296_v48 }
 0x88b   : > { %6975 = vpow2.f32 %v3304_v44 }
 0x88e   : > { %v3280_v0 = vpop.xlane.xlu0 %3279 }
 0x88f   : > { %v3298_v55 = vsub.f32 %v3266_v25, %v3280_v0 }
 0x891   : > { %v3308_v38 = vmul.f32 1.442695, %v3298_v55 }
 0x893   : > { %6977 = vpow2.f32 %v3308_v38 }
 0x898   : > { %v8379_v1 = vpop.eup %6975 }
 0x899   : > { %v3320_v57 = vsel %vm1486_vm4, %v8379_v1, 0.0 }
 0x89a   : > { %3321 = vadd.xlane.f32.xlu0 %v3320_v57 }
 0x8a0   : > { %v8383_v2 = vpop.eup %6977 }
 0x8a1   : > { %v3326_v20 = vsel %vm1486_vm4, %v8383_v2, 0.0 }
 0x8a2   : > { %3327 = vadd.xlane.f32.xlu0 %v3326_v20 }
 0x8b7   : > { %v3277_v60 = vpop.xlane.xlu1 %3276 }
 0x8b8   : > { %v3297_v48 = vsub.f32 %v3265_v9, %v3277_v60 }
 0x8ba   : > { %v3306_v25 = vmul.f32 1.442695, %v3297_v48 }
 0x8bc   : > { %6979 = vpow2.f32 %v3306_v25 }
 0x8bf   : > { %v3283_v44 = vpop.xlane.xlu0 %3282 }
 0x8c0   : > { %v3299_v0 = vsub.f32 %v3267_v26, %v3283_v44 }
 0x8c2   : > { %v3310_v55 = vmul.f32 1.442695, %v3299_v0 }
 0x8c3   : > { %v3286_v38 = vpop.xlane.xlu0 %3285 }
 0x8c4   : > { %6981 = vpow2.f32 %v3310_v55  ;;  %v3300_v39 = vsub.f32 %v3268_v36, %v3286_v38 }
 0x8c6   : > { %v3312_v57 = vmul.f32 1.442695, %v3300_v39 }
 0x8c7   : > { %v3289_v39 = vpop.xlane.xlu1 %3288  ;;  %v3292_v48 = vpop.xlane.xlu0 %3291 }
 0x8c8   : > { %6983 = vpow2.f32 %v3312_v57  ;;  %v3301_v36 = vsub.f32 %v3269_v29, %v3289_v39  ;;  %v3302_v25 = vsub.f32 %v8361_v37, %v3292_v48 }
 0x8c9   : > { %v8389_v42 = vpop.eup %6979 }
 0x8ca   : > { %v3323_v20 = vsel %vm1486_vm4, %v8389_v42, 0.0  ;;  %v3314_v44 = vmul.f32 1.442695, %v3301_v36  ;;  %v3316_v0 = vmul.f32 1.442695, %v3302_v25  ;;  %v3470_v25 = vsel %vm1586_vm2, %v3465_v6, 0 }
 0x8cb   : > { %3324 = vadd.xlane.f32.xlu1 %v3323_v20  ;;  %v3609_v37 = vpop.permute.xlu1 %3608  ;;  %v3561_v29 = vpop.permute.xlu0 %3560 }
 0x8cc   : > { %6985 = vpow2.f32 %v3314_v44 }
 0x8cd   : > { %6987 = vpow2.f32 %v3316_v0  ;;  %v3614_v0 = vsel %vm1586_vm2, %v3609_v37, 0 }
 0x8d1   : > { %v8393_v46 = vpop.eup %6981 }
 0x8d2   : > { %v3329_v9 = vsel %vm1486_vm4, %v8393_v46, 0.0 }
 0x8d3   : > { %3330 = vadd.xlane.f32.xlu1 %v3329_v9 }
 0x8d5   : > { %v8397_v60 = vpop.eup %6983 }
 0x8d6   : > { %v3332_v26 = vsel %vm1486_vm4, %v8397_v60, 0.0 }
 0x8d7   : > { %3333 = vadd.xlane.f32.xlu0 %v3332_v26 }
 0x8d9   : > { %v8406_v55 = vpop.eup %6985 }
 0x8da   : > { %v3335_v38 = vsel %vm1486_vm4, %v8406_v55, 0.0  ;;  %v8410_v57 = vpop.eup %6987 }
 0x8db   : > { %v3338_v20 = vsel %vm1486_vm4, %v8410_v57, 0.0 }
 0x8e4   : > { %3704 = vrot.lane.b32.xlu1 %v8033_v58, %s7386_s2 }
 0x8ed   : > { %3656 = vrot.lane.b32.xlu0 %v8017_v49, %s7386_s2 }
 0x8fc   : > { %v3295_v9 = vpop.xlane.xlu1 %3294 }
 0x8fd   : > { %v3303_v26 = vsub.f32 %v8374_v53, %v3295_v9 }
 0x8ff   : > { %v3318_v36 = vmul.f32 1.442695, %v3303_v26 }
 0x908   : > { %3336 = vadd.xlane.f32.xlu1 %v3335_v38 }
 0x90c   : > { %3339 = vadd.xlane.f32.xlu0 %v3338_v20 }
 0x919   : > { %3803 = vrot.lane.b32.xlu1 %v7732_v21, %s7387_s18 }
 0x922   : > { %3752 = vrot.lane.b32.xlu0 %v7726_v16, %s7387_s18 }
 0x923   : > { %v3322_v39 = vpop.xlane.xlu0 %3321 }
 0x924   : > { %6989 = vrcp.f32 %v3322_v39 }
 0x925   : > { %6991 = vpow2.f32 %v3318_v36 }
 0x926   : > { %3854 = vrot.lane.b32.xlu0 %v7739_v28, %s7387_s18  ;;  %v9060_v28 = vmov 0.0  }
 0x92a   : > { %3755 = vrot.lane.b32.xlu0 %v7908_v50, %s7387_s18 }
 0x92b   : > { %v3328_v48 = vpop.xlane.xlu0 %3327 }
 0x92c   : > { %6993 = vrcp.f32 %v3328_v48 }
 0x92e   : > { %3956 = vrot.lane.b32.xlu0 %v7759_v43, %s7387_s18 }
 0x931   : > { %v6990_v21 = vpop.eup %6989 }
 0x932   : > { %3857 = vrot.lane.b32.xlu0 %v7917_v59, %s7387_s18  ;;  %v3352_v16 = vmul.f32 %v6990_v21, %v8379_v1  ;;  %v8434_v50 = vpop.eup %6991  ;;  %v3566_v1 = vsel %vm1586_vm2, %v3561_v29, 0 }
 0x933   : > { %v3341_v6 = vsel %vm1486_vm4, %v8434_v50, 0.0 }
 0x934   : > { %v3360_v53 = vpack.c.bf16 %v3352_v16, %v3352_v16 }
 0x936   : > { %4058 = vrot.lane.b32.xlu0 %v7783_v56, %s7387_s18  ;;  %6464 = vmatmul.mubr.msk.bf16.vlgmr.msra.gmra.mxu0 %vm1486_vm4, %v3360_v53 }
 0x937   : > { %6474 = vmatpush3.bf16.msra.mxu0 %v3470_v25  ;;  %6475 = vmatprep.mubr.msk.bf16.mxu0 %vm7384_vm0, %v9060_v28 }
 0x938   : > { %6485 = vmatprep.subr.bf16.mxu0 %v9060_v28 }
 0x939   : > { %v6994_v43 = vpop.eup %6993 }
 0x93a   : > { %3959 = vrot.lane.b32.xlu0 %v7925_v47, %s7387_s18  ;;  %v3354_v59 = vmul.f32 %v6994_v43, %v8383_v2 }
 0x93c   : > { %v3362_v56 = vpack.c.bf16 %v3354_v59, %v3354_v59 }
 0x93d   : > { %3342 = vadd.xlane.f32.xlu1 %v3341_v6 }
 0x93e   : > { %4061 = vrot.lane.b32.xlu0 %v7931_v33, %s7387_s18  ;;  %6476 = vmatmul.mubr.msk.bf16.vlgmr.msra.gmra.mxu0 %vm1486_vm4, %v3362_v56 }
 0x93f   : > { %6486 = vmatpush3.bf16.msra.mxu0 %v3566_v1  ;;  %6487 = vmatprep.mubr.msk.bf16.mxu0 %vm7384_vm0, %v9060_v28 }
 0x940   : > { %6497 = vmatprep.subr.bf16.mxu0 %v9060_v28 }
 0x94e   : > { %3905 = vrot.lane.b32.xlu1 %v7746_v35, %s7387_s18 }
 0x952   : > { %3806 = vrot.lane.b32.xlu1 %v7945_v41, %s7387_s18 }
 0x954   : > { %v3325_v47 = vpop.xlane.xlu1 %3324 }
 0x955   : > { %6995 = vrcp.f32 %v3325_v47 }
 0x956   : > { %4007 = vrot.lane.b32.xlu1 %v7766_v51, %s7387_s18  ;;  %v3518_v51 = vsel %vm1586_vm2, %v8387_v23, 0 }
 0x95a   : > { %3908 = vrot.lane.b32.xlu1 %v7953_v54, %s7387_s18 }
 0x95c   : > { %v3331_v33 = vpop.xlane.xlu1 %3330 }
 0x95d   : > { %6997 = vrcp.f32 %v3331_v33 }
 0x95e   : > { %4109 = vrot.lane.b32.xlu1 %v7792_v61, %s7387_s18 }
 0x960   : > { %v3334_v2 = vpop.xlane.xlu0 %3333 }
 0x961   : > { %6999 = vrcp.f32 %v3334_v2 }
 0x962   : > { %v6996_v44 = vpop.eup %6995  ;;  %4010 = vrot.lane.b32.xlu1 %v7961_v17, %s7387_s18 }
 0x963   : > { %v3353_v35 = vmul.f32 %v6996_v44, %v8389_v42 }
 0x964   : > { %v3657_v23 = vpop.permute.xlu0 %3656 }
 0x965   : > { %v3361_v41 = vpack.c.bf16 %v3353_v35, %v3353_v35  ;;  %v3662_v20 = vsel %vm1586_vm2, %v3657_v23, 0 }
 0x966   : > { %4112 = vrot.lane.b32.xlu1 %v7967_v63, %s7387_s18 }
 0x967   : > { %6470 = vmatmul.mubr.msk.bf16.vlgmr.msra.gmra.mxu1 %vm1486_vm4, %v3361_v41 }
 0x968   : > { %6480 = vmatpush3.bf16.msra.mxu1 %v3518_v51  ;;  %6481 = vmatprep.mubr.msk.bf16.mxu1 %vm7384_vm0, %v9060_v28 }
 0x969   : > { %6491 = vmatprep.subr.bf16.mxu1 %v9060_v28 }
 0x96a   : > { %v6998_v61 = vpop.eup %6997 }
 0x96b   : > { %v3355_v54 = vmul.f32 %v6998_v61, %v8393_v46  ;;  %v3705_v46 = vpop.permute.xlu1 %3704 }
 0x96c   : > { %v3710_v21 = vsel %vm1586_vm2, %v3705_v46, 0 }
 0x96d   : > { %v3363_v17 = vpack.c.bf16 %v3355_v54, %v3355_v54 }
 0x96e   : > { %v7000_v42 = vpop.eup %6999 }
 0x96f   : > { %6482 = vmatmul.mubr.msk.bf16.vlgmr.msra.gmra.mxu1 %vm1486_vm4, %v3363_v17  ;;  %v3356_v63 = vmul.f32 %v7000_v42, %v8397_v60 }
 0x970   : > { %6492 = vmatpush3.bf16.msra.mxu1 %v3614_v0  ;;  %6493 = vmatprep.mubr.msk.bf16.mxu1 %vm7384_vm0, %v9060_v28 }
 0x971   : > { %v3364_v38 = vpack.c.bf16 %v3356_v63, %v3356_v63  ;;  %6503 = vmatprep.subr.bf16.mxu1 %v9060_v28 }
 0x973   : > { %6488 = vmatmul.mubr.msk.bf16.vlgmr.msra.gmra.mxu0 %vm1486_vm4, %v3364_v38 }
 0x974   : > { %6498 = vmatpush3.bf16.msra.mxu0 %v3662_v20  ;;  %6499 = vmatprep.mubr.msk.bf16.mxu0 %vm7384_vm0, %v9060_v28 }
 0x975   : > { %6509 = vmatprep.subr.bf16.mxu0 %v9060_v28 }
 0x991   : > { %v3337_v60 = vpop.xlane.xlu1 %3336 }
 0x992   : > { %7001 = vrcp.f32 %v3337_v60 }
 0x995   : > { %v3340_v37 = vpop.xlane.xlu0 %3339  ;;  %v3804_v41 = vpop.permute.xlu1 %3803 }
 0x996   : > { %7003 = vrcp.f32 %v3340_v37  ;;  %v3805_v42 = vrot.slane %v3804_v41, 4 }
 0x998   : > { %v3812_v38 = vsel %vm1100_vm1, %v3805_v42, 0 }
 0x999   : > { %v3753_v29 = vpop.permute.xlu0 %3752 }
 0x99a   : > { %v3754_v16 = vrot.slane %v3753_v29, 4 }
 0x99d   : > { %v3855_v39 = vpop.permute.xlu0 %3854 }
 0x99e   : > { %v3856_v59 = vrot.slane %v3855_v39, 4 }
 0x99f   : > { %v7002_v9 = vpop.eup %7001 }
 0x9a0   : > { %v3357_v26 = vmul.f32 %v7002_v9, %v8406_v55  ;;  %v3761_v55 = vsel %vm1100_vm1, %v3754_v16, 0  ;;  %v3863_v6 = vsel %vm1100_vm1, %v3856_v59, 0 }
 0x9a1   : > { %v3756_v43 = vpop.permute.xlu0 %3755 }
 0x9a2   : > { %v3365_v36 = vpack.c.bf16 %v3357_v26, %v3357_v26 }
 0x9a3   : > { %v7004_v48 = vpop.eup %7003 }
 0x9a4   : > { %6494 = vmatmul.mubr.msk.bf16.vlgmr.msra.gmra.mxu1 %vm1486_vm4, %v3365_v36  ;;  %v3358_v53 = vmul.f32 %v7004_v48, %v8410_v57 }
 0x9a5   : > { %6504 = vmatpush3.bf16.msra.mxu1 %v3710_v21  ;;  %6505 = vmatprep.mubr.msk.bf16.mxu1 %vm7384_vm0, %v9060_v28  ;;  %v3957_v57 = vpop.permute.xlu0 %3956 }
 0x9a6   : > { %v3366_v25 = vpack.c.bf16 %v3358_v53, %v3358_v53  ;;  %6515 = vmatprep.subr.bf16.mxu1 %v9060_v28  ;;  %v3958_v1 = vrot.slane %v3957_v57, 4 }
 0x9a8   : > { %6500 = vmatmul.mubr.msk.bf16.vlgmr.msra.gmra.mxu0 %vm1486_vm4, %v3366_v25  ;;  %v3965_v47 = vsel %vm1100_vm1, %v3958_v1, 0 }
 0x9a9   : > { %6510 = vmatpush3.bf16.xpose.msra.mxu0 %v3761_v55  ;;  %6511 = vmatprep.mubr.msk.bf16.mxu0 %vm7384_vm0, %v9060_v28  ;;  %v3858_v56 = vpop.permute.xlu0 %3857 }
 0x9aa   : > { %6521 = vmatprep.subr.bf16.mxu0 %v9060_v28 }
 0x9ad   : > { %v4059_v33 = vpop.permute.xlu0 %4058 }
 0x9ae   : > { %v4060_v2 = vrot.slane %v4059_v33, 4 }
 0x9b0   : > { %6512 = vmatmul.mubr.msk.bf16.vlgmr.msra.gmra.mxu0 %vm1100_vm1, %v3756_v43  ;;  %v4067_v35 = vsel %vm1100_vm1, %v4060_v2, 0 }
 0x9b1   : > { %6522 = vmatpush3.bf16.xpose.msra.mxu0 %v3863_v6  ;;  %6523 = vmatprep.mubr.msk.bf16.mxu0 %vm7384_vm0, %v9060_v28  ;;  %v3960_v44 = vpop.permute.xlu0 %3959 }
 0x9b2   : > { %6533 = vmatprep.subr.bf16.mxu0 %v9060_v28 }
 0x9b5   : > { %v4062_v61 = vpop.permute.xlu0 %4061 }
 0x9b8   : > { %6524 = vmatmul.mubr.msk.bf16.vlgmr.msra.gmra.mxu0 %vm1100_vm1, %v3858_v56 }
 0x9b9   : > { %6534 = vmatpush3.bf16.xpose.msra.mxu0 %v3965_v47  ;;  %6535 = vmatprep.mubr.msk.bf16.mxu0 %vm7384_vm0, %v9060_v28 }
 0x9ba   : > { %6545 = vmatprep.subr.bf16.mxu0 %v9060_v28 }
 0x9c0   : > { %6536 = vmatmul.mubr.msk.bf16.vlgmr.msra.gmra.mxu0 %vm1100_vm1, %v3960_v44 }
 0x9c1   : > { %6546 = vmatpush3.bf16.xpose.msra.mxu0 %v4067_v35  ;;  %6547 = vmatprep.mubr.msk.bf16.mxu0 %vm7384_vm0, %v9060_v28 }
 0x9c2   : > { %6557 = vmatprep.subr.bf16.mxu0 %v9060_v28 }
 0x9c6   : > { %v3343_v51 = vpop.xlane.xlu1 %3342 }
 0x9c7   : > { %7005 = vrcp.f32 %v3343_v51 }
 0x9c8   : > { %6548 = vmatmul.mubr.msk.bf16.vlgmr.msra.gmra.mxu0 %vm1100_vm1, %v4062_v61 }
 0x9c9   : > { %6559 = vmatprep.mubr.msk.bf16.mxu0 %vm7384_vm0, %v9060_v28 }
 0x9ca   : > { %v3906_v54 = vpop.permute.xlu1 %3905 }
 0x9cb   : > { %v3907_v20 = vrot.slane %v3906_v54, 4 }
 0x9cd   : > { %v3914_v60 = vsel %vm1100_vm1, %v3907_v20, 0 }
 0x9ce   : > { %v3807_v23 = vpop.permute.xlu1 %3806 }
 0x9d2   : > { %v4008_v46 = vpop.permute.xlu1 %4007 }
 0x9d3   : > { %v4009_v37 = vrot.slane %v4008_v46, 4 }
 0x9d4   : > { %v7006_v17 = vpop.eup %7005 }
 0x9d5   : > { %v3359_v0 = vmul.f32 %v7006_v17, %v8434_v50  ;;  %v4016_v29 = vsel %vm1100_vm1, %v4009_v37, 0 }
 0x9d6   : > { %v3909_v50 = vpop.permute.xlu1 %3908 }
 0x9d7   : > { %v3367_v63 = vpack.c.bf16 %v3359_v0, %v3359_v0 }
 0x9d9   : > { %6506 = vmatmul.mubr.msk.bf16.vlgmr.msra.gmra.mxu1 %vm1486_vm4, %v3367_v63 }
 0x9da   : > { %6516 = vmatpush3.bf16.xpose.msra.mxu1 %v3812_v38  ;;  %6517 = vmatprep.mubr.msk.bf16.mxu1 %vm7384_vm0, %v9060_v28  ;;  %v4110_v9 = vpop.permute.xlu1 %4109 }
 0x9db   : > { %6527 = vmatprep.subr.bf16.mxu1 %v9060_v28  ;;  %v4111_v26 = vrot.slane %v4110_v9, 4 }
 0x9dd   : > { %v4118_v36 = vsel %vm1100_vm1, %v4111_v26, 0 }
 0x9de   : > { %v4011_v39 = vpop.permute.xlu1 %4010 }
 0x9e1   : > { %6518 = vmatmul.mubr.msk.bf16.vlgmr.msra.gmra.mxu1 %vm1100_vm1, %v3807_v23 }
 0x9e2   : > { %6528 = vmatpush3.bf16.xpose.msra.mxu1 %v3914_v60  ;;  %6529 = vmatprep.mubr.msk.bf16.mxu1 %vm7384_vm0, %v9060_v28  ;;  %v4113_v21 = vpop.permute.xlu1 %4112 }
 0x9e3   : > { %6539 = vmatprep.subr.bf16.mxu1 %v9060_v28 }
 0x9e9   : > { %6530 = vmatmul.mubr.msk.bf16.vlgmr.msra.gmra.mxu1 %vm1100_vm1, %v3909_v50 }
 0x9ea   : > { %6540 = vmatpush3.bf16.xpose.msra.mxu1 %v4016_v29  ;;  %6541 = vmatprep.mubr.msk.bf16.mxu1 %vm7384_vm0, %v9060_v28 }
 0x9eb   : > { %6551 = vmatprep.subr.bf16.mxu1 %v9060_v28 }
 0x9f1   : > { %6542 = vmatmul.mubr.msk.bf16.vlgmr.msra.gmra.mxu1 %vm1100_vm1, %v4011_v39 }
 0x9f2   : > { %6552 = vmatpush3.bf16.xpose.msra.mxu1 %v4118_v36  ;;  %6553 = vmatprep.mubr.msk.bf16.mxu1 %vm7384_vm0, %v9060_v28 }
 0x9f3   : > { %6563 = vmatprep.subr.bf16.mxu1 %v9060_v28 }
 0x9f6   : > { %v8533_v48 = vpop.f32.mrf.mxu0 }
 0x9f8   : > { %v6465_v16 = vpop.f32.mrf.mxu0 }
 0x9f9   : > { %6554 = vmatmul.mubr.msk.bf16.vlgmr.msra.gmra.mxu1 %vm1100_vm1, %v4113_v21 }
 0x9fa   : > { %v3413_v53 = vpop.f32.mrf.mxu0  ;;  %6565 = vmatprep.mubr.msk.bf16.mxu1 %vm7384_vm0, %v9060_v28 }
 0x9fc   : > { %v6466_v25 = vpop.f32.mrf.mxu0 }
 0x9fe   : > { %v8538_v43 = vpop.f32.mrf.mxu0 }
 0xa00   : > { %v6477_v55 = vpop.f32.mrf.mxu0 }
 0xa02   : > { %v3509_v59 = vpop.f32.mrf.mxu0 }
 0xa04   : > { %v6478_v57 = vpop.f32.mrf.mxu0 }
 0xa27   : > { %v8540_v6 = vpop.f32.mrf.mxu1 }
 0xa28   : > { %v6765_v56 = vpack.i.bf16 %v8540_v6, %v8533_v48 }
 0xa29   : > { %v6471_v1 = vpop.f32.mrf.mxu1 }
 0xa2b   : > { %v3461_v47 = vpop.f32.mrf.mxu1 }
 0xa2d   : > { %v6472_v33 = vpop.f32.mrf.mxu1 }
 0xa2f   : > { %v8544_v2 = vpop.f32.mrf.mxu1 }
 0xa30   : > { %v6770_v44 = vpack.i.bf16 %v8544_v2, %v8538_v43 }
 0xa31   : > { %v6483_v35 = vpop.f32.mrf.mxu1 }
 0xa33   : > { %v3557_v41 = vpop.f32.mrf.mxu1  ;;  %v8548_v51 = vpop.f32.mrf.mxu0 }
 0xa35   : > { %v6484_v61 = vpop.f32.mrf.mxu1  ;;  %v6489_v54 = vpop.f32.mrf.mxu0 }
 0xa37   : > { %v3605_v17 = vpop.f32.mrf.mxu0 }
 0xa39   : > { %v6490_v42 = vpop.f32.mrf.mxu0 }
 0xa64   : > { %v8550_v0 = vpop.f32.mrf.mxu1 }
 0xa65   : > { %v6795_v63 = vpack.i.bf16 %v8550_v0, %v8548_v51  ;;  %v6854_v0 = vld [vmem:[%s7617_s12] sm:$0xff]  }
 0xa66   : > { %v6495_v23 = vpop.f32.mrf.mxu1 }
 0xa68   : > { %v3653_v38 = vpop.f32.mrf.mxu1  ;;  %v8554_v20 = vpop.f32.mrf.mxu0 }
 0xa6a   : > { %v6496_v46 = vpop.f32.mrf.mxu1  ;;  %v6501_v60 = vpop.f32.mrf.mxu0 }
 0xa6c   : > { %v3701_v50 = vpop.f32.mrf.mxu0 }
 0xa6e   : > { %v6502_v37 = vpop.f32.mrf.mxu0 }
 0xa70   : > { %v3797_v29 = vpop.f32.mrf.mxu0 }
 0xa71   : > { %v8558_v9 = vsel %vm1098_vm3, %v3797_v29, -1e+30 }
 0xa72   : > { %v4168_v26 = vsel %vm1486_vm4, %v8558_v9, -inf  ;;  %v6513_v39 = vpop.f32.mrf.mxu0 }
 0xa73   : > { %4169 = vmax.xlane.f32.xlu0 %v4168_v26 }
 0xa74   : > { %v3800_v36 = vpop.f32.mrf.mxu0 }
 0xa76   : > { %v6514_v21 = vpop.f32.mrf.mxu0 }
 0xa78   : > { %v3899_v16 = vpop.f32.mrf.mxu0 }
 0xa79   : > { %v8564_v53 = vsel %vm1098_vm3, %v3899_v16, -1e+30 }
 0xa7a   : > { %v4174_v25 = vsel %vm1486_vm4, %v8564_v53, -inf  ;;  %v6525_v55 = vpop.f32.mrf.mxu0 }
 0xa7b   : > { %4175 = vmax.xlane.f32.xlu0 %v4174_v25 }
 0xa7c   : > { %v3902_v59 = vpop.f32.mrf.mxu0 }
 0xa7e   : > { %v6526_v57 = vpop.f32.mrf.mxu0 }
 0xa80   : > { %v4001_v1 = vpop.f32.mrf.mxu0 }
 0xa81   : > { %v4164_v59 = vsel %vm1098_vm3, %v4001_v1, -1e+30 }
 0xa82   : > { %v6537_v47 = vpop.f32.mrf.mxu0 }
 0xa83   : > { %v4180_v47 = vsel %vm1486_vm4, %v4164_v59, -inf }
 0xa84   : > { %v4004_v33 = vpop.f32.mrf.mxu0 }
 0xa86   : > { %v6538_v35 = vpop.f32.mrf.mxu0 }
 0xa88   : > { %v4103_v41 = vpop.f32.mrf.mxu0 }
 0xa89   : > { %v4166_v35 = vsel %vm1098_vm3, %v4103_v41, -1e+30 }
 0xa8a   : > { %v6549_v61 = vpop.f32.mrf.mxu0 }
 0xa8c   : > { %v4106_v54 = vpop.f32.mrf.mxu0 }
 0xa8e   : > { %v6550_v17 = vpop.f32.mrf.mxu0 }
 0xa8f   : > { %v4186_v17 = vsel %vm1486_vm4, %v4166_v35, -inf }
 0xa99   : > { %v8568_v42 = vpop.f32.mrf.mxu1 }
 0xa9a   : > { %v6800_v23 = vpack.i.bf16 %v8568_v42, %v8554_v20 }
 0xa9b   : > { %v6507_v38 = vpop.f32.mrf.mxu1 }
 0xa9d   : > { %v3749_v46 = vpop.f32.mrf.mxu1 }
 0xa9f   : > { %v6508_v60 = vpop.f32.mrf.mxu1 }
 0xaa1   : > { %v3848_v50 = vpop.f32.mrf.mxu1 }
 0xaa2   : > { %v4161_v37 = vsel %vm1098_vm3, %v3848_v50, -1e+30 }
 0xaa3   : > { %v4171_v29 = vsel %vm1486_vm4, %v4161_v37, -inf  ;;  %v6519_v26 = vpop.f32.mrf.mxu1 }
 0xaa4   : > { %4172 = vmax.xlane.f32.xlu1 %v4171_v29 }
 0xaa5   : > { %v3851_v39 = vpop.f32.mrf.mxu1 }
 0xaa7   : > { %v6520_v36 = vpop.f32.mrf.mxu1 }
 0xaa9   : > { %v3950_v21 = vpop.f32.mrf.mxu1 }
 0xaaa   : > { %v8577_v16 = vsel %vm1098_vm3, %v3950_v21, -1e+30 }
 0xaab   : > { %v4177_v25 = vsel %vm1486_vm4, %v8577_v16, -inf  ;;  %v6531_v55 = vpop.f32.mrf.mxu1 }
 0xaac   : > { %4178 = vmax.xlane.f32.xlu0 %v4177_v25 }
 0xaad   : > { %v3953_v57 = vpop.f32.mrf.mxu1 }
 0xaaf   : > { %v6532_v33 = vpop.f32.mrf.mxu1 }
 0xab0   : > { %4181 = vmax.xlane.f32.xlu0 %v4180_v47 }
 0xab1   : > { %v4052_v61 = vpop.f32.mrf.mxu1 }
 0xab2   : > { %v8588_v54 = vsel %vm1098_vm3, %v4052_v61, -1e+30 }
 0xab3   : > { %v4183_v38 = vsel %vm1486_vm4, %v8588_v54, -inf  ;;  %v6543_v1 = vpop.f32.mrf.mxu1 }
 0xab4   : > { %4187 = vmax.xlane.f32.xlu0 %v4186_v17  ;;  %4184 = vmax.xlane.f32.xlu1 %v4183_v38 }
 0xab5   : > { %v4055_v46 = vpop.f32.mrf.mxu1 }
 0xab7   : > { %v6544_v60 = vpop.f32.mrf.mxu1 }
 0xab9   : > { %v4154_v50 = vpop.f32.mrf.mxu1 }
 0xaba   : > { %v8601_v39 = vsel %vm1098_vm3, %v4154_v50, -1e+30 }
 0xabb   : > { %v6555_v29 = vpop.f32.mrf.mxu1  ;;  %v4189_v36 = vsel %vm1486_vm4, %v8601_v39, -inf }
 0xabd   : > { %v4157_v26 = vpop.f32.mrf.mxu1 }
 0xabf   : > { %v6556_v41 = vpop.f32.mrf.mxu1 }
 0xac5   : > { %4312 = vrot.lane.b32.xlu1 %v7824_v5, %s7387_s18 }
 0xac9   : > { %4360 = vrot.lane.b32.xlu1 %v7975_v32, %s7387_s18 }
 0xaca   : > { %4264 = vrot.lane.b32.xlu0 %v7806_v30, %s7387_s18 }
 0xaed   : > { %4190 = vmax.xlane.f32.xlu1 %v4189_v36 }
 0xafc   : > { %v4170_v21 = vpop.xlane.xlu0 %4169 }
 0xafd   : > { %v4192_v25 = vsub.f32 %v8558_v9, %v4170_v21 }
 0xafe   : > { %4408 = vrot.lane.b32.xlu1 %v7981_v45, %s7387_s18 }
 0xaff   : > { %v4200_v5 = vmul.f32 1.442695, %v4192_v25 }
 0xb01   : > { %7007 = vpow2.f32 %v4200_v5 }
 0xb04   : > { %v4176_v32 = vpop.xlane.xlu0 %4175 }
 0xb05   : > { %v4194_v55 = vsub.f32 %v8564_v53, %v4176_v32 }
 0xb07   : > { %v4204_v30 = vmul.f32 1.442695, %v4194_v55 }
 0xb09   : > { %7009 = vpow2.f32 %v4204_v30 }
 0xb0e   : > { %v8609_v8 = vpop.eup %7007 }
 0xb0f   : > { %v4216_v57 = vsel %vm1486_vm4, %v8609_v8, 0.0 }
 0xb10   : > { %4217 = vadd.xlane.f32.xlu0 %v4216_v57 }
 0xb16   : > { %v8613_v47 = vpop.eup %7009 }
 0xb17   : > { %v4222_v9 = vsel %vm1486_vm4, %v8613_v47, 0.0 }
 0xb18   : > { %4223 = vadd.xlane.f32.xlu0 %v4222_v9  ;;  %v9061_v9 = vpack.i.bf16 %v8321_v4, %v8307_v31 }
 0xb2d   : > { %v4173_v45 = vpop.xlane.xlu1 %4172 }
 0xb2e   : > { %v4193_v33 = vsub.f32 %v4161_v37, %v4173_v45  ;;  %4456 = vrot.lane.b32.xlu0 %v7995_v24, %s7387_s18 }
 0xb30   : > { %v4202_v53 = vmul.f32 1.442695, %v4193_v33 }
 0xb32   : > { %7011 = vpow2.f32 %v4202_v53 }
 0xb35   : > { %v4179_v61 = vpop.xlane.xlu0 %4178 }
 0xb36   : > { %v4195_v32 = vsub.f32 %v8577_v16, %v4179_v61 }
 0xb38   : > { %v4206_v55 = vmul.f32 1.442695, %v4195_v32 }
 0xb39   : > { %v4182_v17 = vpop.xlane.xlu0 %4181 }
 0xb3a   : > { %v4196_v38 = vsub.f32 %v4164_v59, %v4182_v17 }
 0xb3c   : > { %v4208_v1 = vmul.f32 1.442695, %v4196_v38 }
 0xb3d   : > { %v4188_v46 = vpop.xlane.xlu0 %4187  ;;  %v4185_v60 = vpop.xlane.xlu1 %4184 }
 0xb3e   : > { %7013 = vpow2.f32 %v4208_v1  ;;  %v4198_v50 = vsub.f32 %v4166_v35, %v4188_v46  ;;  %v4197_v30 = vsub.f32 %v8588_v54, %v4185_v60 }
 0xb3f   : > { %v8619_v29 = vpop.eup %7011 }
 0xb40   : > { %v4212_v26 = vmul.f32 1.442695, %v4198_v50  ;;  %v4219_v41 = vsel %vm1486_vm4, %v8619_v29, 0.0  ;;  %v4210_v57 = vmul.f32 1.442695, %v4197_v30 }
 0xb41   : > { %v4265_v37 = vpop.permute.xlu0 %4264  ;;  %v4313_v36 = vpop.permute.xlu1 %4312  ;;  %4220 = vadd.xlane.f32.xlu1 %v4219_v41 }
 0xb42   : > { %7015 = vpow2.f32 %v4212_v26  ;;  %v4270_v24 = vsel %vm1586_vm2, %v4265_v37, 0  ;;  %v4318_v21 = vsel %vm1586_vm2, %v4313_v36, 0 }
 0xb43   : > { %6558 = vmatpush3.bf16.msra.mxu0 %v4270_v24  ;;  %6564 = vmatpush3.bf16.msra.mxu1 %v4318_v21  ;;  %7017 = vpow2.f32 %v4206_v55 }
 0xb44   : > { %6569 = vmatprep.subr.bf16.mxu0 %v9060_v28  ;;  %6575 = vmatprep.subr.bf16.mxu1 %v9060_v28  ;;  %7019 = vpow2.f32 %v4210_v57 }
 0xb45   : > { %v4361_v16 = vpop.permute.xlu1 %4360 }
 0xb46   : > { %v4366_v1 = vsel %vm1586_vm2, %v4361_v16, 0 }
 0xb4b   : > { %v8627_v59 = vpop.eup %7013 }
 0xb4c   : > { %v4228_v35 = vsel %vm1486_vm4, %v8627_v59, 0.0 }
 0xb4d   : > { %4229 = vadd.xlane.f32.xlu0 %v4228_v35 }
 0xb4f   : > { %v8631_v25 = vpop.eup %7015 }
 0xb50   : > { %v4234_v5 = vsel %vm1486_vm4, %v8631_v25, 0.0 }
 0xb51   : > { %4235 = vadd.xlane.f32.xlu0 %v4234_v5 }
 0xb52   : > { %4504 = vrot.lane.b32.xlu1 %v8011_v7, %s7387_s18  ;;  %v8649_v7 = vpop.eup %7017 }
 0xb53   : > { %v4225_v54 = vsel %vm1486_vm4, %v8649_v7, 0.0  ;;  %v8653_v45 = vpop.eup %7019 }
 0xb54   : > { %v4231_v31 = vsel %vm1486_vm4, %v8653_v45, 0.0 }
 0xb67   : > { %4552 = vrot.lane.b32.xlu0 %v8017_v49, %s7387_s18 }
 0xb6b   : > { %6756 = vrot.lane.b32.xlu0 %v9061_v9, %s7387_s18 }
 0xb6f   : > { %6766 = vrot.lane.b32.xlu0 %v6765_v56, %s7386_s2  ;;  %v9062_v56 = vpack.i.bf16 %v8325_v13, %v8314_v22 }
 0xb76   : > { %4226 = vadd.xlane.f32.xlu1 %v4225_v54  ;;  %v4191_v49 = vpop.xlane.xlu1 %4190 }
 0xb77   : > { %v4199_v33 = vsub.f32 %v8601_v39, %v4191_v49 }
 0xb79   : > { %v4214_v53 = vmul.f32 1.442695, %v4199_v33 }
 0xb7a   : > { %4232 = vadd.xlane.f32.xlu1 %v4231_v31 }
 0xb7b   : > { %7021 = vpow2.f32 %v4214_v53 }
 0xb88   : > { %v8658_v4 = vpop.eup %7021 }
 0xb89   : > { %v4237_v48 = vsel %vm1486_vm4, %v8658_v4, 0.0 }
 0xb8a   : > { %4238 = vadd.xlane.f32.xlu1 %v4237_v48 }
 0xb99   : > { %v4218_v6 = vpop.xlane.xlu0 %4217 }
 0xb9a   : > { %7023 = vrcp.f32 %v4218_v6 }
 0xb9b   : > { %4600 = vrot.lane.b32.xlu1 %v8033_v58, %s7387_s18 }
 0xb9f   : > { %6761 = vrot.lane.b32.xlu1 %v9062_v56, %s7387_s18 }
 0xba1   : > { %v4224_v39 = vpop.xlane.xlu0 %4223 }
 0xba2   : > { %7025 = vrcp.f32 %v4224_v39 }
 0xba3   : > { %6771 = vrot.lane.b32.xlu1 %v6770_v44, %s7386_s2  ;;  %v4409_v44 = vpop.permute.xlu1 %4408 }
 0xba4   : > { %v4414_v41 = vsel %vm1586_vm2, %v4409_v44, 0 }
 0xba5   : > { %v4457_v13 = vpop.permute.xlu0 %4456 }
 0xba6   : > { %v4462_v2 = vsel %vm1586_vm2, %v4457_v13, 0 }
 0xba7   : > { %v7024_v61 = vpop.eup %7023 }
 0xba8   : > { %v4248_v17 = vmul.f32 %v7024_v61, %v8609_v8 }
 0xbaa   : > { %v4256_v38 = vpack.c.bf16 %v4248_v17, %v4248_v17 }
 0xbac   : > { %6560 = vmatmul.mubr.msk.bf16.vlgmr.msra.gmra.mxu0 %vm1486_vm4, %v4256_v38 }
 0xbad   : > { %6570 = vmatpush3.bf16.msra.mxu0 %v4366_v1  ;;  %6571 = vmatprep.mubr.msk.bf16.mxu0 %vm7384_vm0, %v9060_v28 }
 0xbae   : > { %6581 = vmatprep.subr.bf16.mxu0 %v9060_v28 }
 0xbaf   : > { %v7026_v58 = vpop.eup %7025 }
 0xbb0   : > { %v4250_v22 = vmul.f32 %v7026_v58, %v8613_v47 }
 0xbb2   : > { %v4258_v43 = vpack.c.bf16 %v4250_v22, %v4250_v22 }
 0xbb4   : > { %6572 = vmatmul.mubr.msk.bf16.vlgmr.msra.gmra.mxu0 %vm1486_vm4, %v4258_v43  ;;  %v6847_v43 = vld [vmem:[%s7617_s12 + $0x38] sm:$0xff]  }
 0xbb5   : > { %6582 = vmatpush3.bf16.msra.mxu0 %v4462_v2  ;;  %6583 = vmatprep.mubr.msk.bf16.mxu0 %vm7384_vm0, %v9060_v28  ;;  %v6848_v2 = vld [vmem:[%s7617_s12 + $0x30] sm:$0xff]  }
 0xbb6   : > { %6593 = vmatprep.subr.bf16.mxu0 %v9060_v28 }
 0xbca   : > { %v4221_v8 = vpop.xlane.xlu1 %4220 }
 0xbcb   : > { %7027 = vrcp.f32 %v4221_v8 }
 0xbce   : > { %v4505_v55 = vpop.permute.xlu1 %4504 }
 0xbcf   : > { %v4510_v49 = vsel %vm1586_vm2, %v4505_v55, 0 }
 0xbd6   : > { %v4230_v46 = vpop.xlane.xlu0 %4229 }
 0xbd7   : > { %7029 = vrcp.f32 %v4230_v46  ;;  %v6849_v46 = vld [vmem:[%s7617_s12 + $0x28] sm:$0xff]  }
 0xbd8   : > { %v7028_v60 = vpop.eup %7027 }
 0xbd9   : > { %v4249_v47 = vmul.f32 %v7028_v60, %v8619_v29 }
 0xbda   : > { %v4236_v50 = vpop.xlane.xlu0 %4235 }
 0xbdb   : > { %v4257_v26 = vpack.c.bf16 %v4249_v47, %v4249_v47  ;;  %7031 = vrcp.f32 %v4236_v50  ;;  %v9064_v47 = vpack.i.bf16 %v8331_v15, %v8329_v3  ;;  %v6850_v50 = vld [vmem:[%s7617_s12 + $0x20] sm:$0xff]   ;;  %v6852_v3 = vld [vmem:[%s7617_s12 + $0x10] sm:$0xff]  }
 0xbdd   : > { %6566 = vmatmul.mubr.msk.bf16.vlgmr.msra.gmra.mxu1 %vm1486_vm4, %v4257_v26 }
 0xbde   : > { %6576 = vmatpush3.bf16.msra.mxu1 %v4414_v41  ;;  %6577 = vmatprep.mubr.msk.bf16.mxu1 %vm7384_vm0, %v9060_v28  ;;  %v4553_v24 = vpop.permute.xlu0 %4552  ;;  %v6851_v41 = vld [vmem:[%s7617_s12 + $0x18] sm:$0xff]  }
 0xbdf   : > { %6587 = vmatprep.subr.bf16.mxu1 %v9060_v28  ;;  %v4558_v29 = vsel %vm1586_vm2, %v4553_v24, 0 }
 0xbe4   : > { %v7030_v37 = vpop.eup %7029 }
 0xbe5   : > { %v4252_v36 = vmul.f32 %v7030_v37, %v8627_v59 }
 0xbe7   : > { %v4260_v21 = vpack.c.bf16 %v4252_v36, %v4252_v36 }
 0xbe8   : > { %v7032_v35 = vpop.eup %7031 }
 0xbe9   : > { %6584 = vmatmul.mubr.msk.bf16.vlgmr.msra.gmra.mxu0 %vm1486_vm4, %v4260_v21  ;;  %v4254_v5 = vmul.f32 %v7032_v35, %v8631_v25  ;;  %v6853_v21 = vld [vmem:[%s7617_s12 + $0x8] sm:$0xff]  }
 0xbea   : > { %6594 = vmatpush3.bf16.msra.mxu0 %v4558_v29  ;;  %6595 = vmatprep.mubr.msk.bf16.mxu0 %vm7384_vm0, %v9060_v28 }
 0xbeb   : > { %v4262_v32 = vpack.c.bf16 %v4254_v5, %v4254_v5  ;;  %6605 = vmatprep.subr.bf16.mxu0 %v6847_v43 }
 0xbf1   : > { %6596 = vmatmul.mubr.msk.bf16.vlgmr.msra.gmra.mxu0 %vm1486_vm4, %v4262_v32 }
 0xbf2   : > { %6606 = vmatpush3.bf16.msra.mxu0 %v6847_v43 }
 0xbf3   : > { %6607 = vmatprep.subr.bf16.mxu0 %v6848_v2 }
 0xbf6   : > { %6608 = vmatpush3.bf16.msra.mxu0 %v6848_v2 }
 0xbf7   : > { %6609 = vmatprep.subr.bf16.mxu0 %v6849_v46 }
 0xbfa   : > { %6610 = vmatpush3.bf16.msra.mxu0 %v6849_v46 }
 0xbfb   : > { %6611 = vmatprep.subr.bf16.mxu0 %v6850_v50 }
 0xbfe   : > { %6612 = vmatpush3.bf16.msra.mxu0 %v6850_v50 }
 0xbff   : > { %v4227_v30 = vpop.xlane.xlu1 %4226  ;;  %6613 = vmatprep.subr.bf16.mxu0 %v6851_v41 }
 0xc00   : > { %7033 = vrcp.f32 %v4227_v30 }
 0xc02   : > { %6614 = vmatpush3.bf16.msra.mxu0 %v6851_v41 }
 0xc03   : > { %v4233_v59 = vpop.xlane.xlu1 %4232  ;;  %6615 = vmatprep.subr.bf16.mxu0 %v6852_v3 }
 0xc04   : > { %7035 = vrcp.f32 %v4233_v59  ;;  %v9065_v59 = vpack.i.bf16 %v8346_v40, %v8335_v52  ;;  %v6757_v40 = vpop.permute.xlu0 %6756 }
 0xc06   : > { %6616 = vmatpush3.bf16.msra.mxu0 %v6852_v3 }
 0xc07   : > { %6617 = vmatprep.subr.bf16.mxu0 %v6853_v21 }
 0xc0a   : > { %6618 = vmatpush3.bf16.msra.mxu0 %v6853_v21 }
 0xc0b   : > { %6619 = vmatprep.subr.bf16.mxu0 %v6854_v0 }
 0xc0d   : > { %v7034_v57 = vpop.eup %7033 }
 0xc0e   : > { %v4251_v9 = vmul.f32 %v7034_v57, %v8649_v7  ;;  %6620 = vmatpush3.bf16.msra.mxu0 %v6854_v0 }
 0xc10   : > { %v4259_v16 = vpack.c.bf16 %v4251_v9, %v4251_v9 }
 0xc11   : > { %v7036_v54 = vpop.eup %7035 }
 0xc12   : > { %6578 = vmatmul.mubr.msk.bf16.vlgmr.msra.gmra.mxu1 %vm1486_vm4, %v4259_v16  ;;  %v4253_v25 = vmul.f32 %v7036_v54, %v8653_v45  ;;  %v9063_v45 = vmov 0  }
 0xc13   : > { %6588 = vmatpush3.bf16.msra.mxu1 %v4510_v49  ;;  %v4239_v33 = vpop.xlane.xlu1 %4238  ;;  %6589 = vmatprep.mubr.msk.bf16.mxu1 %vm7384_vm0, %v9060_v28 }
 0xc14   : > { %7037 = vrcp.f32 %v4239_v33  ;;  %6599 = vmatprep.subr.bf16.mxu1 %v9060_v28  ;;  %v4261_v31 = vpack.c.bf16 %v4253_v25, %v4253_v25 }
 0xc17   : > { %v4601_v53 = vpop.permute.xlu1 %4600 }
 0xc18   : > { %v4606_v7 = vsel %vm1586_vm2, %v4601_v53, 0 }
 0xc1a   : > { %6590 = vmatmul.mubr.msk.bf16.vlgmr.msra.gmra.mxu1 %vm1486_vm4, %v4261_v31 }
 0xc1b   : > { %6600 = vmatpush3.bf16.msra.mxu1 %v4606_v7  ;;  %6601 = vmatprep.mubr.msk.bf16.mxu1 %vm7384_vm0, %v9060_v28  ;;  %v6767_v7 = vpop.permute.xlu0 %6766 }
 0xc21   : > { %v7038_v48 = vpop.eup %7037 }
 0xc22   : > { %v4255_v6 = vmul.f32 %v7038_v48, %v8658_v4  ;;  %v6759_v48 = vunpack.i.h.bf16 %v6757_v40 }
 0xc24   : > { %v4263_v56 = vpack.c.bf16 %v4255_v6, %v4255_v6  ;;  %v6758_v6 = vunpack.i.l.bf16 %v6757_v40  ;;  %v4745_v42 = vsel %vm1100_vm1, %v8097_v11, %v6759_v48 }
 0xc26   : > { %6602 = vmatmul.mubr.msk.bf16.vlgmr.msra.gmra.mxu1 %vm1486_vm4, %v4263_v56  ;;  %v6769_v56 = vunpack.i.h.bf16 %v6767_v7 }
 0xc27   : > { %5166 = vmatprep.mubr.bf16.mxu1 %v9063_v45 }
 0xc6c   : > { %v4306_v39 = vpop.f32.mrf.mxu0 }
 0xc6e   : > { %v6561_v61 = vpop.f32.mrf.mxu0 }
 0xc70   : > { %v4309_v17 = vpop.f32.mrf.mxu0 }
 0xc72   : > { %v6562_v38 = vpop.f32.mrf.mxu0 }
 0xc74   : > { %v4402_v1 = vpop.f32.mrf.mxu0 }
 0xc76   : > { %v6573_v58 = vpop.f32.mrf.mxu0 }
 0xc78   : > { %v4405_v22 = vpop.f32.mrf.mxu0 }
 0xc7a   : > { %v6574_v13 = vpop.f32.mrf.mxu0 }
 0xc9d   : > { %v4354_v28 = vpop.f32.mrf.mxu1 }
 0xc9e   : > { %v6775_v44 = vpack.i.bf16 %v4354_v28, %v4306_v39  ;;  %v6768_v39 = vunpack.i.l.bf16 %v6767_v7  ;;  %v6762_v28 = vpop.permute.xlu1 %6761 }
 0xc9f   : > { %v6567_v4 = vpop.f32.mrf.mxu1  ;;  %v6764_v2 = vunpack.i.h.bf16 %v6762_v28 }
 0xca0   : > { %6776 = vrot.lane.b32.xlu0 %v6775_v44, %s7385_s11  ;;  %v6763_v44 = vunpack.i.l.bf16 %v6762_v28 }
 0xca1   : > { %v4357_v8 = vpop.f32.mrf.mxu1  ;;  %v4747_v46 = vsel %vm1100_vm1, %v8101_v19, %v6764_v2 }
 0xca2   : > { %v6772_v43 = vpop.permute.xlu1 %6771 }
 0xca3   : > { %v6568_v60 = vpop.f32.mrf.mxu1  ;;  %v6774_v4 = vunpack.i.h.bf16 %v6772_v43  ;;  %v6773_v8 = vunpack.i.l.bf16 %v6772_v43  ;;  %v7090_v43 = vld [vmem:[#allocation2] sm:$0xff] }
 0xca4   : > { %6786 = vrot.lane.b32.xlu0 %v9064_v47, %s7387_s18  ;;  %v4746_v60 = vsel %vm1100_vm1, %v8099_v14, %v6763_v44  ;;  %v7091_v44 = vld [vmem:[#allocation2 + $0x10] sm:$0xff] }
 0xca5   : > { %v4756_v41 = vsel %vm4752_vm5, %v4747_v46, %v6774_v4 }
 0xca8   : > { %6796 = vrot.lane.b32.xlu0 %v6795_v63, %s7386_s2 }
 0xca9   : > { %v4498_v26 = vpop.f32.mrf.mxu0 }
 0xcab   : > { %v6585_v37 = vpop.f32.mrf.mxu0 }
 0xcad   : > { %v4501_v36 = vpop.f32.mrf.mxu0 }
 0xcaf   : > { %v6586_v15 = vpop.f32.mrf.mxu0 }
 0xcb1   : > { %v4594_v24 = vpop.f32.mrf.mxu0 }
 0xcb3   : > { %v6597_v35 = vpop.f32.mrf.mxu0 }
 0xcb5   : > { %v4597_v29 = vpop.f32.mrf.mxu0 }
 0xcb7   : > { %v6598_v51 = vpop.f32.mrf.mxu0 }
 0xcd2   : > { %v4450_v63 = vpop.f32.mrf.mxu1 }
 0xcd3   : > { %v6780_v5 = vpack.i.bf16 %v4450_v63, %v4402_v1  ;;  %v4754_v1 = vsel %vm4752_vm5, %v4745_v42, %v6769_v56  ;;  %v4780_v56 = vsub.s32 2, %v7697_v27 }
 0xcd4   : > { %v6579_v32 = vpop.f32.mrf.mxu1 }
 0xcd5   : > { %6781 = vrot.lane.b32.xlu1 %v6780_v5, %s7385_s11 }
 0xcd6   : > { %v4453_v55 = vpop.f32.mrf.mxu1 }
 0xcd8   : > { %v6580_v30 = vpop.f32.mrf.mxu1 }
 0xcd9   : > { %6791 = vrot.lane.b32.xlu1 %v9065_v59, %s7387_s18 }
 0xcda   : > { %v4546_v57 = vpop.f32.mrf.mxu1 }
 0xcdb   : > { %v6805_v9 = vpack.i.bf16 %v4546_v57, %v4498_v26  ;;  %v4755_v26 = vsel %vm4752_vm5, %v4746_v60, %v6773_v8 }
 0xcdc   : > { %v6591_v16 = vpop.f32.mrf.mxu1 }
 0xcdd   : > { %6801 = vrot.lane.b32.xlu1 %v6800_v23, %s7386_s2  ;;  %6806 = vrot.lane.b32.xlu0 %v6805_v9, %s7385_s11  ;;  %v4744_v23 = vsel %vm1100_vm1, %v8095_v12, %v6758_v6 }
 0xcde   : > { %v4549_v54 = vpop.f32.mrf.mxu1  ;;  %v4753_v38 = vsel %vm4752_vm5, %v4744_v23, %v6768_v39 }
 0xce0   : > { %v6592_v49 = vpop.f32.mrf.mxu1 }
 0xce6   : > { %v4642_v33 = vpop.f32.mrf.mxu1 }
 0xce7   : > { %v6810_v25 = vpack.i.bf16 %v4642_v33, %v4594_v24 }
 0xce8   : > { %v6603_v53 = vpop.f32.mrf.mxu1 }
 0xce9   : > { %6811 = vrot.lane.b32.xlu1 %v6810_v25, %s7385_s11 }
 0xcea   : > { %v4645_v31 = vpop.f32.mrf.mxu1 }
 0xcec   : > { %v6604_v52 = vpop.f32.mrf.mxu1 }
 0xd12   : > { %v6777_v20 = vpop.permute.xlu0 %6776 }
 0xd13   : > { %v6779_v61 = vunpack.i.h.bf16 %v6777_v20  ;;  %v6778_v17 = vunpack.i.l.bf16 %v6777_v20  ;;  %v8773_v20 = vld [vmem:[%s7609_s13] sm:$0xff] }
 0xd15   : > { %v4762_v58 = vsel %vm4761_vm6, %v4753_v38, %v6778_v17  ;;  %v4763_v22 = vsel %vm4761_vm6, %v4754_v1, %v6779_v61  ;;  %v7088_v17 = vld [vmem:[#allocation2 + $0x30] sm:$0xff] }
 0xd16   : > { %v6001_v13 = vpack.c.bf16 %v4763_v22, %v4762_v58  ;;  %v6787_v11 = vpop.permute.xlu0 %6786  ;;  %v7089_v22 = vld [vmem:[#allocation2 + $0x18] sm:$0xff] }
 0xd17   : > { %v6789_v24 = vunpack.i.h.bf16 %v6787_v11  ;;  %v6788_v21 = vunpack.i.l.bf16 %v6787_v11 }
 0xd18   : > { %6621 = vmatprep.mubr.bf16.mxu0 %v6001_v13 }
 0xd19   : > { %v4749_v14 = vsel %vm1100_vm1, %v8105_v10, %v6789_v24  ;;  %v4748_v51 = vsel %vm1100_vm1, %v8103_v18, %v6788_v21  ;;  %v7095_v21 = vld [vmem:[#allocation2 + $0x38] sm:$0xff] }
 0xd1a   : > { %v6797_v37 = vpop.permute.xlu0 %6796 }
 0xd1b   : > { %v6799_v35 = vunpack.i.h.bf16 %v6797_v37  ;;  %v6798_v29 = vunpack.i.l.bf16 %v6797_v37  ;;  %v7093_v37 = vld [vmem:[#allocation2 + $0x28] sm:$0xff] }
 0xd1d   : > { %v4757_v32 = vsel %vm4752_vm5, %v4748_v51, %v6798_v29  ;;  %v4758_v55 = vsel %vm4752_vm5, %v4749_v14, %v6799_v35  ;;  %v6855_v29 = vld [vmem:[%s7623_s24 + $0x70] ss:$8 sps:$4 sm:$0xff]  }
 0xd47   : > { %v6782_v12 = vpop.permute.xlu1 %6781 }
 0xd48   : > { %v6784_v47 = vunpack.i.h.bf16 %v6782_v12  ;;  %v6783_v50 = vunpack.i.l.bf16 %v6782_v12 }
 0xd4a   : > { %v4765_v36 = vsel %vm4761_vm6, %v4756_v41, %v6784_v47  ;;  %v4764_v3 = vsel %vm4761_vm6, %v4755_v26, %v6783_v50  ;;  %v7092_v47 = vld [vmem:[#allocation2 + $0x8] sm:$0xff] }
 0xd4b   : > { %v6002_v15 = vpack.c.bf16 %v4765_v36, %v4764_v3  ;;  %v6792_v0 = vpop.permute.xlu1 %6791 }
 0xd4c   : > { %v6794_v16 = vunpack.i.h.bf16 %v6792_v0  ;;  %v6793_v54 = vunpack.i.l.bf16 %v6792_v0 }
 0xd4d   : > { %6622 = vmatmul.mubr.bf16.vlgmr.msra.gmra.mxu0 %v6002_v15  ;;  %v7094_v15 = vld [vmem:[#allocation2 + $0x20] sm:$0xff] }
 0xd4e   : > { %v4751_v33 = vsel %vm1100_vm1, %v8118_v62, %v6794_v16  ;;  %v4750_v25 = vsel %vm1100_vm1, %v8107_v34, %v6793_v54  ;;  %v4781_v62 = vrot.slane %v8773_v20, %v4780_v56 }
 0xd4f   : > { %v6807_v19 = vpop.permute.xlu0 %6806  ;;  %v6802_v9 = vpop.permute.xlu1 %6801 }
 0xd50   : > { %v6809_v63 = vunpack.i.h.bf16 %v6807_v19  ;;  %v6808_v5 = vunpack.i.l.bf16 %v6807_v19  ;;  %v6804_v10 = vunpack.i.h.bf16 %v6802_v9  ;;  %v6803_v49 = vunpack.i.l.bf16 %v6802_v9  ;;  %v6857_v19 = vld [vmem:[%s7623_s24 + $0x74] ss:$8 sps:$4 sm:$0xff]  }
 0xd51   : > { %5134 = vmatprep.subr.bf16.mxu1 %v6857_v19 }
 0xd52   : > { %v4766_v30 = vsel %vm4761_vm6, %v4757_v32, %v6808_v5  ;;  %v4767_v59 = vsel %vm4761_vm6, %v4758_v55, %v6809_v63  ;;  %v4759_v52 = vsel %vm4752_vm5, %v4750_v25, %v6803_v49  ;;  %v4760_v40 = vsel %vm4752_vm5, %v4751_v33, %v6804_v10  ;;  %5135 = vmatpush1.bf16.msra.mxu1 %v6855_v29  ;;  %v6860_v33 = vld [vmem:[%s7623_s24 + $0x64] ss:$8 sps:$4 sm:$0xff]  }
 0xd53   : > { %v6003_v57 = vpack.c.bf16 %v4767_v59, %v4766_v30  ;;  %5136 = vmatprep.subr.bf16.mxu1 %v6860_v33 }
 0xd55   : > { %6625 = vmatprep.mubr.bf16.mxu0 %v6003_v57 }
 0xd5b   : > { %v6812_v18 = vpop.permute.xlu1 %6811 }
 0xd5c   : > { %v6814_v53 = vunpack.i.h.bf16 %v6812_v18  ;;  %v6813_v31 = vunpack.i.l.bf16 %v6812_v18 }
 0xd5e   : > { %v4769_v7 = vsel %vm4761_vm6, %v4760_v40, %v6814_v53  ;;  %v4768_v48 = vsel %vm4761_vm6, %v4759_v52, %v6813_v31  ;;  %v6858_v53 = vld [vmem:[%s7623_s24 + $0x60] ss:$8 sps:$4 sm:$0xff]   ;;  %v6863_v40 = vld [vmem:[%s7623_s24 + $0x54] ss:$8 sps:$4 sm:$0xff]  }
 0xd5f   : > { %v6004_v6 = vpack.c.bf16 %v4769_v7, %v4768_v48  ;;  %5137 = vmatpush1.bf16.msra.mxu1 %v6858_v53 }
 0xd60   : > { %5138 = vmatprep.subr.bf16.mxu1 %v6863_v40 }
 0xd61   : > { %6626 = vmatmul.mubr.bf16.gmra.mxu0 %v6004_v6  ;;  %v6861_v6 = vld [vmem:[%s7623_s24 + $0x50] ss:$8 sps:$4 sm:$0xff]  }
 0xd63   : > { %5139 = vmatpush1.bf16.msra.mxu1 %v6861_v6 }
 0xe0d   : > { %v6623_v39 = vpop.f32.mrf.mxu0 }
 0xe0e   : > { %v4897_v61 = vadd.f32 %v6623_v39, %v4781_v62 }
 0xe0f   : > { %v4888_v34 = vpop.f32.mrf.mxu0 }
 0xe10   : > { %v4889_v42 = vadd.f32 %v4888_v34, %v4781_v62  ;;  %v8779_v13 = vadd.f32 %v7089_v22, %v4897_v61 }
 0xe11   : > { %v6624_v23 = vpop.f32.mrf.mxu0 }
 0xe12   : > { %v8776_v38 = vadd.f32 %v7088_v17, %v4889_v42  ;;  %v4900_v28 = vadd.f32 %v6624_v23, %v4781_v62  ;;  %v6866_v23 = vld [vmem:[%s7623_s24 + $0x44] ss:$8 sps:$4 sm:$0xff]   ;;  %v6864_v17 = vld [vmem:[%s7623_s24 + $0x40] ss:$8 sps:$4 sm:$0xff]  }
 0xe13   : > { %v4891_v1 = vpop.f32.mrf.mxu0  ;;  %5140 = vmatprep.subr.bf16.mxu1 %v6866_v23 }
 0xe14   : > { %v4892_v58 = vadd.f32 %v4891_v1, %v4781_v62  ;;  %4927 = vadd.xlane.f32.xlu0 %v8776_v38  ;;  %v8785_v11 = vadd.f32 %v7091_v44, %v4900_v28  ;;  %5141 = vmatpush1.bf16.msra.mxu1 %v6864_v17  ;;  %v6867_v44 = vld [vmem:[%s7623_s24 + $0x30] ss:$8 sps:$4 sm:$0xff]  }
 0xe16   : > { %v8781_v2 = vadd.f32 %v7090_v43, %v4892_v58  ;;  %v6869_v43 = vld [vmem:[%s7623_s24 + $0x34] ss:$8 sps:$4 sm:$0xff]  }
 0xe17   : > { %5142 = vmatprep.subr.bf16.mxu1 %v6869_v43 }
 0xe18   : > { %4931 = vadd.xlane.f32.xlu0 %v8779_v13  ;;  %4929 = vadd.xlane.f32.xlu1 %v8781_v2 }
 0xe19   : > { %5143 = vmatpush1.bf16.msra.mxu1 %v6867_v44 }
 0xe1c   : > { %4933 = vadd.xlane.f32.xlu0 %v8785_v11 }
 0xe21   : > { %v6627_v4 = vpop.f32.mrf.mxu0 }
 0xe22   : > { %v4913_v60 = vadd.f32 %v6627_v4, %v4781_v62 }
 0xe23   : > { %v4904_v8 = vpop.f32.mrf.mxu0 }
 0xe24   : > { %v4905_v12 = vadd.f32 %v4904_v8, %v4781_v62  ;;  %v8791_v36 = vadd.f32 %v7093_v37, %v4913_v60  ;;  %v6872_v8 = vld [vmem:[%s7623_s24 + $0x24] ss:$8 sps:$4 sm:$0xff]   ;;  %v6873_v60 = vld [vmem:[%s7623_s24 + $0x10] ss:$8 sps:$4 sm:$0xff]  }
 0xe25   : > { %v6628_v46 = vpop.f32.mrf.mxu0  ;;  %5144 = vmatprep.subr.bf16.mxu1 %v6872_v8 }
 0xe26   : > { %v8788_v50 = vadd.f32 %v7092_v47, %v4905_v12  ;;  %v4916_v3 = vadd.f32 %v6628_v46, %v4781_v62  ;;  %v6870_v12 = vld [vmem:[%s7623_s24 + $0x20] ss:$8 sps:$4 sm:$0xff]   ;;  %v6875_v46 = vld [vmem:[%s7623_s24 + $0x14] ss:$8 sps:$4 sm:$0xff]   ;;  %v6878_v47 = vld [vmem:[%s7623_s24 + $0x4] ss:$8 sps:$4 sm:$0xff]  }
 0xe27   : > { %v4907_v26 = vpop.f32.mrf.mxu0  ;;  %5145 = vmatpush1.bf16.msra.mxu1 %v6870_v12 }
 0xe28   : > { %v4908_v41 = vadd.f32 %v4907_v26, %v4781_v62  ;;  %4935 = vadd.xlane.f32.xlu0 %v8788_v50  ;;  %v8797_v35 = vadd.f32 %v7095_v21, %v4916_v3  ;;  %5146 = vmatprep.subr.bf16.mxu1 %v6875_v46  ;;  %v6876_v26 = vld [vmem:[%s7623_s24] ss:$8 sps:$4 sm:$0xff]  }
 0xe2a   : > { %v8793_v24 = vadd.f32 %v7094_v15, %v4908_v41 }
 0xe2b   : > { %5147 = vmatpush1.bf16.msra.mxu1 %v6873_v60 }
 0xe2c   : > { %4937 = vadd.xlane.f32.xlu1 %v8793_v24  ;;  %4939 = vadd.xlane.f32.xlu0 %v8791_v36 }
 0xe2d   : > { %5148 = vmatprep.subr.bf16.mxu1 %v6878_v47 }
 0xe2f   : > { %5149 = vmatpush1.bf16.msra.mxu1 %v6876_v26 }
 0xe30   : > { %4941 = vadd.xlane.f32.xlu1 %v8797_v35 }
 0xe9d   : > { %v4928_v14 = vpop.xlane.xlu0 %4927 }
 0xe9e   : > { %v4943_v51 = vmul.f32 0.0078125, %v4928_v14 }
 0xea0   : > { %v8803_v0 = vsub.f32 %v8776_v38, %v4943_v51 }
 0xea1   : > { %v4932_v63 = vpop.xlane.xlu0 %4931  ;;  %v4930_v5 = vpop.xlane.xlu1 %4929 }
 0xea2   : > { %v4945_v32 = vmul.f32 0.0078125, %v4932_v63  ;;  %v4944_v55 = vmul.f32 0.0078125, %v4930_v5  ;;  %v4959_v30 = vmul.f32 %v8803_v0, %v8803_v0 }
 0xea4   : > { %v8808_v59 = vsub.f32 %v8779_v13, %v4945_v32  ;;  %v8811_v57 = vsub.f32 %v8781_v2, %v4944_v55  ;;  %4967 = vadd.xlane.f32.xlu0 %v4959_v30  ;;  %v5017_v55 = vsub.s32 3, %v7697_v27 }
 0xea5   : > { %v4934_v9 = vpop.xlane.xlu0 %4933 }
 0xea6   : > { %v4946_v16 = vmul.f32 0.0078125, %v4934_v9  ;;  %v4960_v54 = vmul.f32 %v8811_v57, %v8811_v57  ;;  %v4961_v10 = vmul.f32 %v8808_v59, %v8808_v59  ;;  %v5018_v9 = vrot.slane %v8773_v20, %v5017_v55 }
 0xea8   : > { %v8818_v49 = vsub.f32 %v8785_v11, %v4946_v16  ;;  %4969 = vadd.xlane.f32.xlu1 %v4960_v54  ;;  %4971 = vadd.xlane.f32.xlu0 %v4961_v10  ;;  %v5029_v16 = vsub.s32 4, %v7697_v27 }
 0xeaa   : > { %v4962_v18 = vmul.f32 %v8818_v49, %v8818_v49  ;;  %v5030_v53 = vrot.slane %v8773_v20, %v5029_v16  ;;  %v6880_v16 = vld [vmem:[%s7625_s0 + $0x38] sm:$0xff]  }
 0xeac   : > { %4973 = vadd.xlane.f32.xlu1 %v4962_v18 }
 0xeb1   : > { %v4936_v25 = vpop.xlane.xlu0 %4935 }
 0xeb2   : > { %v4947_v31 = vmul.f32 0.0078125, %v4936_v25 }
 0xeb4   : > { %v8825_v52 = vsub.f32 %v8788_v50, %v4947_v31 }
 0xeb5   : > { %v4938_v7 = vpop.xlane.xlu1 %4937  ;;  %v4940_v48 = vpop.xlane.xlu0 %4939 }
 0xeb6   : > { %v4948_v56 = vmul.f32 0.0078125, %v4938_v7  ;;  %v4949_v39 = vmul.f32 0.0078125, %v4940_v48  ;;  %v4963_v62 = vmul.f32 %v8825_v52, %v8825_v52 }
 0xeb8   : > { %v8832_v34 = vsub.f32 %v8793_v24, %v4948_v56  ;;  %v8835_v42 = vsub.f32 %v8791_v36, %v4949_v39  ;;  %4975 = vadd.xlane.f32.xlu0 %v4963_v62 }
 0xeb9   : > { %v4942_v61 = vpop.xlane.xlu1 %4941 }
 0xeba   : > { %v4950_v1 = vmul.f32 0.0078125, %v4942_v61  ;;  %v4964_v58 = vmul.f32 %v8832_v34, %v8832_v34  ;;  %v4965_v22 = vmul.f32 %v8835_v42, %v8835_v42 }
 0xebc   : > { %v8844_v28 = vsub.f32 %v8797_v35, %v4950_v1  ;;  %4977 = vadd.xlane.f32.xlu1 %v4964_v58  ;;  %4979 = vadd.xlane.f32.xlu0 %v4965_v22 }
 0xebe   : > { %v4966_v4 = vmul.f32 %v8844_v28, %v8844_v28 }
 0xec0   : > { %4981 = vadd.xlane.f32.xlu1 %v4966_v4 }
 0xf2d   : > { %v4968_v41 = vpop.xlane.xlu0 %4967 }
 0xf2e   : > { %v4983_v37 = vmul.f32 0.0078125, %v4968_v41 }
 0xf30   : > { %v4991_v3 = vadd.f32 1e-05, %v4983_v37 }
 0xf31   : > { %v4970_v15 = vpop.xlane.xlu1 %4969  ;;  %v4972_v21 = vpop.xlane.xlu0 %4971 }
 0xf32   : > { %7039 = vrsqrt.f32 %v4991_v3  ;;  %v4984_v29 = vmul.f32 0.0078125, %v4970_v15  ;;  %v4985_v19 = vmul.f32 0.0078125, %v4972_v21 }
 0xf34   : > { %v4992_v14 = vadd.f32 1e-05, %v4984_v29  ;;  %v4993_v51 = vadd.f32 1e-05, %v4985_v19 }
 0xf35   : > { %v4974_v63 = vpop.xlane.xlu1 %4973 }
 0xf36   : > { %7041 = vrsqrt.f32 %v4992_v14  ;;  %v4986_v5 = vmul.f32 0.0078125, %v4974_v63 }
 0xf37   : > { %7043 = vrsqrt.f32 %v4993_v51 }
 0xf38   : > { %v4994_v32 = vadd.f32 1e-05, %v4986_v5 }
 0xf3a   : > { %7045 = vrsqrt.f32 %v4994_v32 }
 0xf3f   : > { %v7040_v30 = vpop.eup %7039 }
 0xf40   : > { %v5007_v54 = vmul.f32 %v7040_v30, %v8803_v0  ;;  %v6879_v30 = vld [vmem:[%s7625_s0 + $0x78] sm:$0xff]  }
 0xf41   : > { %v4976_v10 = vpop.xlane.xlu0 %4975  ;;  %6157 = vmatprep.subr.bf16.mxu0 %v6879_v30  ;;  %6629 = vmatprep.subr.bf16.mxu1 %v6879_v30 }
 0xf42   : > { %v4987_v18 = vmul.f32 0.0078125, %v4976_v10  ;;  %v5019_v25 = vmul.f32 %v5018_v9, %v5007_v54  ;;  %6158 = vmatpush3.bf16.msra.mxu0 %v6880_v16  ;;  %v6885_v54 = vld [vmem:[%s7625_s0 + $0x60] sm:$0xff]  }
 0xf43   : > { %v7042_v33 = vpop.eup %7041  ;;  %v6886_v10 = vld [vmem:[%s7625_s0 + $0x20] sm:$0xff]  }
 0xf44   : > { %v7044_v31 = vpop.eup %7043  ;;  %v5008_v40 = vmul.f32 %v7042_v33, %v8811_v57  ;;  %v4995_v7 = vadd.f32 1e-05, %v4987_v18  ;;  %v5031_v61 = vadd.f32 %v5030_v53, %v5019_v25  ;;  %v6887_v18 = vld [vmem:[%s7625_s0 + $0x58] sm:$0xff]   ;;  %v6889_v25 = vld [vmem:[%s7625_s0 + $0x50] sm:$0xff]  }
 0xf45   : > { %v4978_v48 = vpop.xlane.xlu1 %4977  ;;  %v4980_v6 = vpop.xlane.xlu0 %4979  ;;  %v5009_v0 = vmul.f32 %v7044_v31, %v8808_v59  ;;  %v6888_v33 = vld [vmem:[%s7625_s0 + $0x18] sm:$0xff]   ;;  %v6891_v31 = vld [vmem:[%s7625_s0 + $0x48] sm:$0xff]  }
 0xf46   : > { %7047 = vrsqrt.f32 %v4995_v7  ;;  %v4988_v56 = vmul.f32 0.0078125, %v4978_v48  ;;  %v4989_v39 = vmul.f32 0.0078125, %v4980_v6  ;;  %v5020_v62 = vmul.f32 %v5018_v9, %v5008_v40  ;;  %v6892_v40 = vld [vmem:[%s7625_s0 + $0x8] sm:$0xff]   ;;  %v6893_v7 = vld [vmem:[%s7625_s0 + $0x40] sm:$0xff]   ;;  %v616_v6 = vld [vmem:[%s7636_s27] sm:$0x3] }
 0xf47   : > { %v7046_v23 = vpop.eup %7045  ;;  %v5021_v12 = vmul.f32 %v5018_v9, %v5009_v0  ;;  %v6894_v48 = vld [vmem:[%s7625_s0] sm:$0xff]  }
 0xf48   : > { %v4996_v17 = vadd.f32 1e-05, %v4988_v56  ;;  %v4997_v1 = vadd.f32 1e-05, %v4989_v39  ;;  %v5032_v58 = vadd.f32 %v5030_v53, %v5020_v62  ;;  %v5010_v22 = vmul.f32 %v7046_v23, %v8818_v49 }
 0xf49   : > { %v4982_v43 = vpop.xlane.xlu1 %4981  ;;  %v5033_v60 = vadd.f32 %v5030_v53, %v5021_v12  ;;  %v9066_v56 = vsub.s32 0, %v7697_v27  ;;  %v9067_v62 = vsub.s32 1, %v7697_v27 }
 0xf4a   : > { %7049 = vrsqrt.f32 %v4996_v17  ;;  %v4990_v44 = vmul.f32 0.0078125, %v4982_v43  ;;  %v5039_v57 = vpack.c.bf16 %v5032_v58, %v5031_v61  ;;  %v5022_v4 = vmul.f32 %v5018_v9, %v5010_v22 }
 0xf4b   : > { %7051 = vrsqrt.f32 %v4997_v1  ;;  %v8890_v39 = vrot.slane %v616_v6, %v9066_v56  ;;  %v8894_v23 = vrot.slane %v616_v6, %v9067_v62 }
 0xf4c   : > { %v4998_v8 = vadd.f32 1e-05, %v4990_v44  ;;  %5167 = vmatmul.mubr.bf16.vlgmr.msra.gmra.mxu1 %v5039_v57  ;;  %v5034_v46 = vadd.f32 %v5030_v53, %v5022_v4 }
 0xf4d   : > { %5176 = vmatprep.mubr.bf16.mxu1 %v9063_v45  ;;  %6637 = vmatpush3.bf16.msra.mxu1 %v6880_v16 }
 0xf4e   : > { %7053 = vrsqrt.f32 %v4998_v8  ;;  %v5040_v59 = vpack.c.bf16 %v5034_v46, %v5033_v60 }
 0xf53   : > { %v7048_v47 = vpop.eup %7047 }
 0xf54   : > { %5177 = vmatmul.mubr.bf16.gmra.mxu1 %v5040_v59  ;;  %v5011_v26 = vmul.f32 %v7048_v47, %v8825_v52 }
 0xf55   : > { %5186 = vmatprep.mubr.bf16.mxu1 %v9063_v45 }
 0xf56   : > { %v5023_v37 = vmul.f32 %v5018_v9, %v5011_v26 }
 0xf57   : > { %v7050_v49 = vpop.eup %7049 }
 0xf58   : > { %v5012_v41 = vmul.f32 %v7050_v49, %v8832_v34  ;;  %v7052_v3 = vpop.eup %7051  ;;  %v5035_v29 = vadd.f32 %v5030_v53, %v5023_v37 }
 0xf59   : > { %v5013_v14 = vmul.f32 %v7052_v3, %v8835_v42  ;;  %v6881_v42 = vld [vmem:[%s7625_s0 + $0x70] sm:$0xff]  }
 0xf5a   : > { %v5024_v15 = vmul.f32 %v5018_v9, %v5012_v41  ;;  %6159 = vmatprep.subr.bf16.mxu0 %v6881_v42  ;;  %6630 = vmatprep.subr.bf16.mxu1 %v6881_v42 }
 0xf5b   : > { %v7054_v21 = vpop.eup %7053  ;;  %v5025_v5 = vmul.f32 %v5018_v9, %v5013_v14 }
 0xf5c   : > { %v5036_v19 = vadd.f32 %v5030_v53, %v5024_v15  ;;  %v5014_v51 = vmul.f32 %v7054_v21, %v8844_v28  ;;  %v6882_v28 = vld [vmem:[%s7625_s0 + $0x30] sm:$0xff]  }
 0xf5d   : > { %v5037_v32 = vadd.f32 %v5030_v53, %v5025_v5  ;;  %6160 = vmatpush3.bf16.msra.mxu0 %v6882_v28  ;;  %6638 = vmatpush3.bf16.msra.mxu1 %v6882_v28 }
 0xf5e   : > { %v5041_v63 = vpack.c.bf16 %v5036_v19, %v5035_v29  ;;  %v5026_v52 = vmul.f32 %v5018_v9, %v5014_v51  ;;  %v6884_v9 = vld [vmem:[%s7625_s0 + $0x28] sm:$0xff]  }
 0xf60   : > { %5187 = vmatmul.mubr.bf16.gmra.mxu1 %v5041_v63  ;;  %v5038_v34 = vadd.f32 %v5030_v53, %v5026_v52  ;;  %v6890_v53 = vld [vmem:[%s7625_s0 + $0x10] sm:$0xff]  }
 0xf61   : > { %5196 = vmatprep.mubr.bf16.mxu1 %v9063_v45  ;;  %v6883_v45 = vld [vmem:[%s7625_s0 + $0x68] sm:$0xff]  }
 0xf62   : > { %v5042_v55 = vpack.c.bf16 %v5038_v34, %v5037_v32  ;;  %6161 = vmatprep.subr.bf16.mxu0 %v6883_v45  ;;  %6631 = vmatprep.subr.bf16.mxu1 %v6883_v45 }
 0xf63   : > { %6162 = vmatpush3.bf16.msra.mxu0 %v6884_v9  ;;  %6639 = vmatpush3.bf16.msra.mxu1 %v6884_v9 }
 0xf64   : > { %6163 = vmatprep.subr.bf16.mxu0 %v6885_v54  ;;  %6632 = vmatprep.subr.bf16.mxu1 %v6885_v54 }
 0xf67   : > { %6164 = vmatpush3.bf16.msra.mxu0 %v6886_v10  ;;  %6640 = vmatpush3.bf16.msra.mxu1 %v6886_v10 }
 0xf68   : > { %5197 = vmatmul.mubr.bf16.gmra.mxu1 %v5042_v55  ;;  %6165 = vmatprep.subr.bf16.mxu0 %v6887_v18 }
 0xf69   : > { %6633 = vmatprep.subr.bf16.mxu1 %v6887_v18 }
 0xf6b   : > { %6166 = vmatpush3.bf16.msra.mxu0 %v6888_v33  ;;  %6641 = vmatpush3.bf16.msra.mxu1 %v6888_v33 }
 0xf6c   : > { %6167 = vmatprep.subr.bf16.mxu0 %v6889_v25  ;;  %6634 = vmatprep.subr.bf16.mxu1 %v6889_v25 }
 0xf6f   : > { %6168 = vmatpush3.bf16.msra.mxu0 %v6890_v53  ;;  %6642 = vmatpush3.bf16.msra.mxu1 %v6890_v53 }
 0xf70   : > { %6169 = vmatprep.subr.bf16.mxu0 %v6891_v31  ;;  %6635 = vmatprep.subr.bf16.mxu1 %v6891_v31 }
 0xf73   : > { %6170 = vmatpush3.bf16.msra.mxu0 %v6892_v40  ;;  %6643 = vmatpush3.bf16.msra.mxu1 %v6892_v40 }
 0xf74   : > { %6171 = vmatprep.subr.bf16.mxu0 %v6893_v7  ;;  %6636 = vmatprep.subr.bf16.mxu1 %v6893_v7 }
 0xf77   : > { %6172 = vmatpush3.bf16.msra.mxu0 %v6894_v48  ;;  %6644 = vmatpush3.bf16.msra.mxu1 %v6894_v48 }
0x100c   : > { %v5168_v61 = vpop.f32.mrf.mxu1 }
0x100d   : > { %v5169_v0 = vadd.f32 %v5168_v61, %v8890_v39 }
0x100e   : > { %v5170_v17 = vpop.f32.mrf.mxu1 }
0x100f   : > { %v5171_v1 = vadd.f32 %v5170_v17, %v8894_v23  ;;  %v5223_v58 = vmul.f32 0.70710677, %v5169_v0  ;;  %v5207_v33 = vmul.f32 0.5, %v5169_v0 }
0x1010   : > { %v5172_v22 = vpop.f32.mrf.mxu1 }
0x1011   : > { %v5224_v43 = vmul.f32 0.70710677, %v5171_v1  ;;  %v5173_v44 = vadd.f32 %v5172_v22, %v8890_v39  ;;  %v5208_v16 = vmul.f32 0.5, %v5171_v1 }
0x1012   : > { %v5174_v57 = vpop.f32.mrf.mxu1 }
0x1013   : > { %7055 = verf.f32 %v5224_v43  ;;  %v5225_v4 = vmul.f32 0.70710677, %v5173_v44  ;;  %v5175_v8 = vadd.f32 %v5174_v57, %v8894_v23  ;;  %v5209_v42 = vmul.f32 0.5, %v5173_v44 }
0x1014   : > { %7057 = verf.f32 %v5223_v58  ;;  %v5178_v12 = vpop.f32.mrf.mxu1 }
0x1015   : > { %7059 = verf.f32 %v5225_v4  ;;  %v5226_v46 = vmul.f32 0.70710677, %v5175_v8  ;;  %v8901_v60 = vadd.f32 %v5178_v12, %v8890_v39  ;;  %v5210_v9 = vmul.f32 0.5, %v5175_v8 }
0x1016   : > { %v5180_v59 = vpop.f32.mrf.mxu1 }
0x1017   : > { %7061 = verf.f32 %v5226_v46  ;;  %v5181_v47 = vadd.f32 %v5180_v59, %v8894_v23  ;;  %v5227_v26 = vmul.f32 0.70710677, %v8901_v60 }
0x1018   : > { %v5182_v49 = vpop.f32.mrf.mxu1 }
0x1019   : > { %v5228_v41 = vmul.f32 0.70710677, %v5181_v47  ;;  %v5183_v37 = vadd.f32 %v5182_v49, %v8890_v39 }
0x101a   : > { %v5184_v3 = vpop.f32.mrf.mxu1 }
0x101b   : > { %7063 = verf.f32 %v5228_v41  ;;  %v5229_v15 = vmul.f32 0.70710677, %v5183_v37  ;;  %v5185_v21 = vadd.f32 %v5184_v3, %v8894_v23  ;;  %v5213_v59 = vmul.f32 0.5, %v5183_v37 }
0x101c   : > { %7065 = verf.f32 %v5227_v26  ;;  %v5212_v41 = vmul.f32 0.5, %v5181_v47 }
0x101d   : > { %7067 = verf.f32 %v5229_v15  ;;  %v5230_v29 = vmul.f32 0.70710677, %v5185_v21  ;;  %v5214_v3 = vmul.f32 0.5, %v5185_v21 }
0x101f   : > { %7069 = verf.f32 %v5230_v29 }
0x1020   : > { %v7056_v19 = vpop.eup %7055  ;;  %v5188_v14 = vpop.f32.mrf.mxu1 }
0x1021   : > { %v7058_v51 = vpop.eup %7057  ;;  %v8908_v63 = vadd.f32 %v5188_v14, %v8890_v39  ;;  %v5256_v34 = vadd.f32 1.0, %v7056_v19  ;;  %v5211_v19 = vmul.f32 0.5, %v8901_v60 }
0x1022   : > { %v7060_v52 = vpop.eup %7059  ;;  %v5190_v5 = vpop.f32.mrf.mxu1  ;;  %v5255_v30 = vadd.f32 1.0, %v7058_v51 }
0x1023   : > { %v5257_v32 = vadd.f32 1.0, %v7060_v52  ;;  %v8911_v28 = vadd.f32 %v5190_v5, %v8894_v23  ;;  %v5231_v10 = vmul.f32 0.70710677, %v8908_v63  ;;  %v5272_v40 = vmul.f32 %v5256_v34, %v5208_v16 }
0x1024   : > { %v7062_v55 = vpop.eup %7061  ;;  %v5192_v45 = vpop.f32.mrf.mxu1  ;;  %v5271_v6 = vmul.f32 %v5255_v30, %v5207_v33 }
0x1025   : > { %v5258_v54 = vadd.f32 1.0, %v7062_v55  ;;  %v5193_v18 = vadd.f32 %v5192_v45, %v8890_v39  ;;  %v5273_v25 = vmul.f32 %v5257_v32, %v5209_v42  ;;  %v5232_v53 = vmul.f32 0.70710677, %v8911_v28 }
0x1026   : > { %v5194_v31 = vpop.f32.mrf.mxu1  ;;  %v5216_v33 = vmul.f32 0.5, %v8911_v28 }
0x1027   : > { %v5274_v7 = vmul.f32 %v5258_v54, %v5210_v9  ;;  %7071 = verf.f32 %v5232_v53  ;;  %v5233_v56 = vmul.f32 0.70710677, %v5193_v18  ;;  %v5195_v62 = vadd.f32 %v5194_v31, %v8894_v23 }
0x1028   : > { %v7064_v48 = vpop.eup %7063  ;;  %v5198_v61 = vpop.f32.mrf.mxu1  ;;  %7073 = verf.f32 %v5231_v10  ;;  %v5287_v22 = vpack.c.bf16 %v5273_v25, %v5271_v6  ;;  %v5217_v10 = vmul.f32 0.5, %v5193_v18 }
0x1029   : > { %v7066_v17 = vpop.eup %7065  ;;  %v8918_v1 = vadd.f32 %v5198_v61, %v8890_v39  ;;  %v5288_v58 = vpack.c.bf16 %v5274_v7, %v5272_v40  ;;  %7075 = verf.f32 %v5233_v56  ;;  %v5234_v43 = vmul.f32 0.70710677, %v5195_v62 }
0x102a   : > { %v7068_v0 = vpop.eup %7067  ;;  %v5200_v44 = vpop.f32.mrf.mxu1  ;;  %v5260_v57 = vadd.f32 1.0, %v7064_v48  ;;  %v5259_v46 = vadd.f32 1.0, %v7066_v17  ;;  %v5218_v25 = vmul.f32 0.5, %v5195_v62 }
0x102b   : > { %v5261_v4 = vadd.f32 1.0, %v7068_v0  ;;  %v5235_v8 = vmul.f32 0.70710677, %v8918_v1  ;;  %5427 = vmatprep.mubr.bf16.mxu0 %v5288_v58  ;;  %7077 = verf.f32 %v5234_v43  ;;  %v5201_v26 = vadd.f32 %v5200_v44, %v8894_v23 }
0x102c   : > { %v7070_v12 = vpop.eup %7069  ;;  %v5202_v49 = vpop.f32.mrf.mxu1  ;;  %5428 = vmatmul.mubr.bf16.vlgmr.msra.gmra.mxu0 %v5287_v22  ;;  %v5276_v5 = vmul.f32 %v5260_v57, %v5212_v41  ;;  %v5275_v37 = vmul.f32 %v5259_v46, %v5211_v19  ;;  %v5297_v41 = vsub.s32 5, %v7697_v27 }
0x102d   : > { %v5262_v15 = vadd.f32 1.0, %v7070_v12  ;;  %v5203_v29 = vadd.f32 %v5202_v49, %v8890_v39  ;;  %v5277_v14 = vmul.f32 %v5261_v4, %v5213_v59  ;;  %v5236_v51 = vmul.f32 0.70710677, %v5201_v26 }
0x102e   : > { %v5204_v52 = vpop.f32.mrf.mxu1  ;;  %7079 = verf.f32 %v5235_v8  ;;  %v5220_v28 = vmul.f32 0.5, %v5201_v26 }
0x102f   : > { %v5278_v34 = vmul.f32 %v5262_v15, %v5214_v3  ;;  %v5237_v32 = vmul.f32 0.70710677, %v5203_v29  ;;  %7081 = verf.f32 %v5236_v51  ;;  %v5205_v55 = vadd.f32 %v5204_v52, %v8894_v23 }
0x1030   : > { %v5289_v47 = vpack.c.bf16 %v5277_v14, %v5275_v37  ;;  %v5215_v23 = vmul.f32 0.5, %v8908_v63  ;;  %v5221_v44 = vmul.f32 0.5, %v5203_v29  ;;  %v5219_v63 = vmul.f32 0.5, %v8918_v1 }
0x1031   : > { %7083 = verf.f32 %v5237_v32  ;;  %v5290_v30 = vpack.c.bf16 %v5278_v34, %v5276_v5  ;;  %v5238_v21 = vmul.f32 0.70710677, %v5205_v55  ;;  %v5222_v62 = vmul.f32 0.5, %v5205_v55 }
0x1032   : > { %v5298_v15 = vrot.slane %v8773_v20, %v5297_v41 }
0x1033   : > { %5435 = vmatprep.mubr.bf16.mxu0 %v5290_v30  ;;  %7085 = verf.f32 %v5238_v21 }
0x1034   : > { %5436 = vmatmul.mubr.bf16.gmra.mxu0 %v5289_v47  ;;  %v7072_v39 = vpop.eup %7071 }
0x1035   : > { %v7074_v60 = vpop.eup %7073  ;;  %v5264_v42 = vadd.f32 1.0, %v7072_v39 }
0x1036   : > { %v7076_v16 = vpop.eup %7075  ;;  %v5263_v54 = vadd.f32 1.0, %v7074_v60 }
0x1037   : > { %v5265_v45 = vadd.f32 1.0, %v7076_v16  ;;  %v5280_v7 = vmul.f32 %v5264_v42, %v5216_v33 }
0x1038   : > { %v7078_v9 = vpop.eup %7077  ;;  %v5279_v56 = vmul.f32 %v5263_v54, %v5215_v23 }
0x1039   : > { %v5266_v53 = vadd.f32 1.0, %v7078_v9  ;;  %v5281_v31 = vmul.f32 %v5265_v45, %v5217_v10 }
0x103b   : > { %v7080_v40 = vpop.eup %7079  ;;  %v5282_v48 = vmul.f32 %v5266_v53, %v5218_v25  ;;  %v5291_v58 = vpack.c.bf16 %v5281_v31, %v5279_v56 }
0x103c   : > { %v7082_v6 = vpop.eup %7081  ;;  %v5267_v18 = vadd.f32 1.0, %v7080_v40 }
0x103d   : > { %v5292_v17 = vpack.c.bf16 %v5282_v48, %v5280_v7  ;;  %v5268_v22 = vadd.f32 1.0, %v7082_v6 }
0x103e   : > { %v7084_v61 = vpop.eup %7083  ;;  %v5283_v46 = vmul.f32 %v5267_v18, %v5219_v63 }
0x103f   : > { %v5269_v0 = vadd.f32 1.0, %v7084_v61  ;;  %5443 = vmatprep.mubr.bf16.mxu1 %v5292_v17  ;;  %v5284_v8 = vmul.f32 %v5268_v22, %v5220_v28 }
0x1040   : > { %v7086_v43 = vpop.eup %7085  ;;  %5444 = vmatmul.mubr.bf16.vlgmr.msra.gmra.mxu1 %v5291_v58 }
0x1041   : > { %v5270_v57 = vadd.f32 1.0, %v7086_v43  ;;  %v5285_v4 = vmul.f32 %v5269_v0, %v5221_v44 }
0x1043   : > { %v5286_v12 = vmul.f32 %v5270_v57, %v5222_v62  ;;  %v5293_v49 = vpack.c.bf16 %v5285_v4, %v5283_v46 }
0x1045   : > { %v5294_v59 = vpack.c.bf16 %v5286_v12, %v5284_v8 }
0x1047   : > { %5451 = vmatprep.mubr.bf16.mxu1 %v5294_v59 }
0x1048   : > { %5452 = vmatmul.mubr.bf16.gmra.mxu1 %v5293_v49 }
0x10ec   : > { %v6173_v3 = vpop.f32.mrf.mxu0 }
0x10ee   : > { %v6174_v29 = vpop.f32.mrf.mxu0 }
0x10ef   : > { %v6175_v19 = vadd.f32 %v6174_v29, %v6173_v3 }
0x10f0   : > { %v6176_v26 = vpop.f32.mrf.mxu0 }
0x10f1   : > { %v5430_v14 = vadd.f32 %v6175_v19, %v5298_v15 }
0x10f2   : > { %v6177_v51 = vpop.f32.mrf.mxu0 }
0x10f3   : > { %v5460_v1 = vadd.f32 %v5430_v14, %v8776_v38  ;;  %v6178_v52 = vadd.f32 %v6177_v51, %v6176_v26 }
0x10f4   : > { %v6179_v5 = vpop.f32.mrf.mxu0 }
0x10f5   : > { %5468 = vst [vmem:[#allocation2 + $0x30] sm:$0xff] %v5460_v1  ;;  %v5433_v34 = vadd.f32 %v6178_v52, %v5298_v15 }
0x10f6   : > { %v6180_v32 = vpop.f32.mrf.mxu0 }
0x10f7   : > { %v5461_v37 = vadd.f32 %v5433_v34, %v8781_v2  ;;  %v6181_v55 = vadd.f32 %v6180_v32, %v6179_v5 }
0x10f8   : > { %v6182_v30 = vpop.f32.mrf.mxu0 }
0x10f9   : > { %5469 = vst [vmem:[#allocation2] sm:$0xff] %v5461_v37  ;;  %v5438_v27 = vadd.f32 %v6181_v55, %v5298_v15 }
0x10fa   : > { %v6183_v47 = vpop.f32.mrf.mxu0 }
0x10fb   : > { %v5462_v20 = vadd.f32 %v5438_v27, %v8779_v13  ;;  %v6184_v21 = vadd.f32 %v6183_v47, %v6182_v30 }
0x10fd   : > { %5470 = vst [vmem:[#allocation2 + $0x18] sm:$0xff] %v5462_v20  ;;  %v5441_v39 = vadd.f32 %v6184_v21, %v5298_v15 }
0x10ff   : > { %v5463_v60 = vadd.f32 %v5441_v39, %v8785_v11 }
0x1100   : > { %v6185_v38 = vpop.f32.mrf.mxu1 }
0x1101   : > { %5471 = vst [vmem:[#allocation2 + $0x10] sm:$0xff] %v5463_v60 }
0x1102   : > { %v6186_v16 = vpop.f32.mrf.mxu1 }
0x1103   : > { %v6187_v42 = vadd.f32 %v6186_v16, %v6185_v38 }
0x1104   : > { %v6188_v45 = vpop.f32.mrf.mxu1 }
0x1105   : > { %v5446_v9 = vadd.f32 %v6187_v42, %v5298_v15 }
0x1106   : > { %v6189_v54 = vpop.f32.mrf.mxu1 }
0x1107   : > { %v5464_v2 = vadd.f32 %v5446_v9, %v8788_v50  ;;  %v6190_v10 = vadd.f32 %v6189_v54, %v6188_v45 }
0x1108   : > { %v6191_v33 = vpop.f32.mrf.mxu1 }
0x1109   : > { %5472 = vst [vmem:[#allocation2 + $0x8] sm:$0xff] %v5464_v2  ;;  %v5449_v25 = vadd.f32 %v6190_v10, %v5298_v15 }
0x110a   : > { %v6192_v53 = vpop.f32.mrf.mxu1 }
0x110b   : > { %v5465_v13 = vadd.f32 %v5449_v25, %v8793_v24  ;;  %v6193_v23 = vadd.f32 %v6192_v53, %v6191_v33 }
0x110c   : > { %v6194_v31 = vpop.f32.mrf.mxu1 }
0x110d   : > { %5473 = vst [vmem:[#allocation2 + $0x20] sm:$0xff] %v5465_v13  ;;  %v5454_v11 = vadd.f32 %v6193_v23, %v5298_v15 }
0x110e   : > { %v6195_v40 = vpop.f32.mrf.mxu1 }
0x110f   : > { %v5466_v7 = vadd.f32 %v5454_v11, %v8791_v36  ;;  %v6196_v48 = vadd.f32 %v6195_v40, %v6194_v31 }
0x1111   : > { %5474 = vst [vmem:[#allocation2 + $0x28] sm:$0xff] %v5466_v7  ;;  %v5457_v6 = vadd.f32 %v6196_v48, %v5298_v15  ;;  %5479 = sbr.rel (%p5967_p11) target bundleno = 4697 (0x1259), region = 84 }
0x1113   : > { %v5467_v56 = vadd.f32 %v5457_v6, %v8797_v35 }
0x1115   : > { %5475 = vst [vmem:[#allocation2 + $0x38] sm:$0xff] %v5467_v56 }
0x1116   : > { %5482 = vadd.xlane.f32.xlu0 %v5460_v1  ;;  %5486 = vadd.xlane.f32.xlu1 %v5462_v20  ;;  %v5968_v23 = vld [vmem:[%s9022_s7] ss:$0 sm:$0xff]  ;;  %v5969_v40 = vld [vmem:[%s9022_s7 + $0x1] ss:$0 sm:$0xff] }
0x111a   : > { %5484 = vadd.xlane.f32.xlu0 %v5461_v37  ;;  %5488 = vadd.xlane.f32.xlu1 %v5463_v60 }
0x111e   : > { %5490 = vadd.xlane.f32.xlu0 %v5464_v2  ;;  %5492 = vadd.xlane.f32.xlu1 %v5465_v13 }
0x1122   : > { %5494 = vadd.xlane.f32.xlu0 %v5466_v7  ;;  %5496 = vadd.xlane.f32.xlu1 %v5467_v56 }
0x119f   : > { %v5483_v50 = vpop.xlane.xlu0 %5482  ;;  %v5487_v24 = vpop.xlane.xlu1 %5486 }
0x11a0   : > { %v5498_v36 = vmul.f32 0.0078125, %v5483_v50  ;;  %v5500_v61 = vmul.f32 0.0078125, %v5487_v24 }
0x11a2   : > { %v8939_v17 = vsub.f32 %v5460_v1, %v5498_v36  ;;  %v8941_v58 = vsub.f32 %v5462_v20, %v5500_v61 }
0x11a3   : > { %v5485_v35 = vpop.xlane.xlu0 %5484  ;;  %v5489_v0 = vpop.xlane.xlu1 %5488 }
0x11a4   : > { %v5499_v22 = vmul.f32 0.0078125, %v5485_v35  ;;  %v5514_v43 = vmul.f32 %v8939_v17, %v8939_v17  ;;  %v5501_v18 = vmul.f32 0.0078125, %v5489_v0  ;;  %v5516_v62 = vmul.f32 %v8941_v58, %v8941_v58 }
0x11a6   : > { %v8945_v44 = vsub.f32 %v5461_v37, %v5499_v22  ;;  %5522 = vadd.xlane.f32.xlu0 %v5514_v43  ;;  %v8947_v28 = vsub.f32 %v5463_v60, %v5501_v18 }
0x11a7   : > { %v5491_v57 = vpop.xlane.xlu0 %5490  ;;  %v5493_v63 = vpop.xlane.xlu1 %5492 }
0x11a8   : > { %v5502_v4 = vmul.f32 0.0078125, %v5491_v57  ;;  %v5515_v8 = vmul.f32 %v8945_v44, %v8945_v44  ;;  %v5503_v12 = vmul.f32 0.0078125, %v5493_v63  ;;  %v5517_v49 = vmul.f32 %v8947_v28, %v8947_v28 }
0x11aa   : > { %v8953_v46 = vsub.f32 %v5464_v2, %v5502_v4  ;;  %5526 = vadd.xlane.f32.xlu0 %v5516_v62  ;;  %5524 = vadd.xlane.f32.xlu1 %v5515_v8  ;;  %v8955_v59 = vsub.f32 %v5465_v13, %v5503_v12 }
0x11ab   : > { %v5495_v41 = vpop.xlane.xlu0 %5494  ;;  %v5497_v3 = vpop.xlane.xlu1 %5496 }
0x11ac   : > { %v5504_v15 = vmul.f32 0.0078125, %v5495_v41  ;;  %v5518_v29 = vmul.f32 %v8953_v46, %v8953_v46  ;;  %v5505_v19 = vmul.f32 0.0078125, %v5497_v3  ;;  %v5519_v51 = vmul.f32 %v8955_v59, %v8955_v59 }
0x11ae   : > { %v8961_v26 = vsub.f32 %v5466_v7, %v5504_v15  ;;  %5528 = vadd.xlane.f32.xlu1 %v5517_v49  ;;  %5530 = vadd.xlane.f32.xlu0 %v5518_v29  ;;  %v8963_v14 = vsub.f32 %v5467_v56, %v5505_v19 }
0x11b0   : > { %v5520_v1 = vmul.f32 %v8961_v26, %v8961_v26  ;;  %v5521_v52 = vmul.f32 %v8963_v14, %v8963_v14 }
0x11b2   : > { %5532 = vadd.xlane.f32.xlu1 %v5519_v51  ;;  %5534 = vadd.xlane.f32.xlu0 %v5520_v1 }
0x11b6   : > { %5536 = vadd.xlane.f32.xlu1 %v5521_v52 }
0x122f   : > { %v5523_v5 = vpop.xlane.xlu0 %5522 }
0x1230   : > { %v5538_v34 = vmul.f32 0.0078125, %v5523_v5 }
0x1232   : > { %v5546_v32 = vadd.f32 1e-05, %v5538_v34 }
0x1233   : > { %v5525_v37 = vpop.xlane.xlu1 %5524  ;;  %v5527_v55 = vpop.xlane.xlu0 %5526 }
0x1234   : > { %7096 = vrsqrt.f32 %v5546_v32  ;;  %v5539_v30 = vmul.f32 0.0078125, %v5525_v37  ;;  %v5540_v27 = vmul.f32 0.0078125, %v5527_v55 }
0x1236   : > { %v5547_v47 = vadd.f32 1e-05, %v5539_v30  ;;  %v5548_v20 = vadd.f32 1e-05, %v5540_v27 }
0x1237   : > { %v5529_v21 = vpop.xlane.xlu1 %5528  ;;  %v5531_v39 = vpop.xlane.xlu0 %5530 }
0x1238   : > { %7098 = vrsqrt.f32 %v5547_v47  ;;  %v5541_v60 = vmul.f32 0.0078125, %v5529_v21  ;;  %v5542_v38 = vmul.f32 0.0078125, %v5531_v39 }
0x1239   : > { %7100 = vrsqrt.f32 %v5548_v20 }
0x123a   : > { %v5549_v16 = vadd.f32 1e-05, %v5541_v60  ;;  %v5550_v42 = vadd.f32 1e-05, %v5542_v38 }
0x123b   : > { %v5533_v45 = vpop.xlane.xlu1 %5532  ;;  %v5535_v9 = vpop.xlane.xlu0 %5534 }
0x123c   : > { %7102 = vrsqrt.f32 %v5549_v16  ;;  %v5543_v54 = vmul.f32 0.0078125, %v5533_v45  ;;  %v5544_v2 = vmul.f32 0.0078125, %v5535_v9 }
0x123d   : > { %7104 = vrsqrt.f32 %v5550_v42 }
0x123e   : > { %v5551_v10 = vadd.f32 1e-05, %v5543_v54  ;;  %v5552_v33 = vadd.f32 1e-05, %v5544_v2 }
0x123f   : > { %v5537_v25 = vpop.xlane.xlu1 %5536 }
0x1240   : > { %7106 = vrsqrt.f32 %v5551_v10  ;;  %v5545_v53 = vmul.f32 0.0078125, %v5537_v25 }
0x1241   : > { %v7097_v13 = vpop.eup %7096  ;;  %7108 = vrsqrt.f32 %v5552_v33 }
0x1242   : > { %v5562_v31 = vmul.f32 %v7097_v13, %v8939_v17  ;;  %v5553_v11 = vadd.f32 1e-05, %v5545_v53 }
0x1244   : > { %v5574_v7 = vmul.f32 %v5968_v23, %v5562_v31  ;;  %7110 = vrsqrt.f32 %v5553_v11 }
0x1245   : > { %v7099_v48 = vpop.eup %7098 }
0x1246   : > { %v7101_v6 = vpop.eup %7100  ;;  %v5586_v56 = vadd.f32 %v5969_v40, %v5574_v7  ;;  %v5563_v50 = vmul.f32 %v7099_v48, %v8945_v44 }
0x1247   : > { %v5564_v24 = vmul.f32 %v7101_v6, %v8941_v58 }
0x1248   : > { %5594 = vst [vmem:[#allocation14] sm:$0xff] %v5586_v56  ;;  %v5575_v36 = vmul.f32 %v5968_v23, %v5563_v50 }
0x1249   : > { %v7103_v61 = vpop.eup %7102  ;;  %v5576_v35 = vmul.f32 %v5968_v23, %v5564_v24 }
0x124a   : > { %v7105_v0 = vpop.eup %7104  ;;  %v5587_v17 = vadd.f32 %v5969_v40, %v5575_v36  ;;  %v5565_v22 = vmul.f32 %v7103_v61, %v8947_v28 }
0x124b   : > { %v5588_v43 = vadd.f32 %v5969_v40, %v5576_v35  ;;  %v5566_v18 = vmul.f32 %v7105_v0, %v8953_v46 }
0x124c   : > { %5595 = vst [vmem:[#allocation14 + $0x8] sm:$0xff] %v5587_v17  ;;  %v5577_v62 = vmul.f32 %v5968_v23, %v5565_v22 }
0x124d   : > { %v7107_v57 = vpop.eup %7106  ;;  %5596 = vst [vmem:[#allocation14 + $0x10] sm:$0xff] %v5588_v43  ;;  %v5578_v63 = vmul.f32 %v5968_v23, %v5566_v18 }
0x124e   : > { %v7109_v4 = vpop.eup %7108  ;;  %v5589_v44 = vadd.f32 %v5969_v40, %v5577_v62  ;;  %v5567_v58 = vmul.f32 %v7107_v57, %v8955_v59 }
0x124f   : > { %v5590_v8 = vadd.f32 %v5969_v40, %v5578_v63  ;;  %v5568_v12 = vmul.f32 %v7109_v4, %v8961_v26 }
0x1250   : > { %5597 = vst [vmem:[#allocation14 + $0x18] sm:$0xff] %v5589_v44  ;;  %v5579_v49 = vmul.f32 %v5968_v23, %v5567_v58 }
0x1251   : > { %v7111_v41 = vpop.eup %7110  ;;  %5598 = vst [vmem:[#allocation14 + $0x20] sm:$0xff] %v5590_v8  ;;  %v5580_v28 = vmul.f32 %v5968_v23, %v5568_v12 }
0x1252   : > { %v5591_v3 = vadd.f32 %v5969_v40, %v5579_v49  ;;  %v5569_v46 = vmul.f32 %v7111_v41, %v8963_v14 }
0x1253   : > { %v5592_v15 = vadd.f32 %v5969_v40, %v5580_v28 }
0x1254   : > { %5599 = vst [vmem:[#allocation14 + $0x28] sm:$0xff] %v5591_v3  ;;  %v5581_v29 = vmul.f32 %v5968_v23, %v5569_v46 }
0x1255   : > { %5600 = vst [vmem:[#allocation14 + $0x30] sm:$0xff] %v5592_v15 }
0x1256   : > { %v5593_v19 = vadd.f32 %v5969_v40, %v5581_v29 }
0x1258   : > { %5601 = vst [vmem:[#allocation14 + $0x38] sm:$0xff] %v5593_v19 }
0x1259 PF: > { %p6689_p0 = scmp.eq.s32.totalorder %s7525_s29, 1  ;;  %s7388_s22 = smov [#allocation14]  }
0x125a   : > { %s5611_s13 = sshll.u32 %s7388_s22, 4  ;;  %s5612_s13 = int_to_ptr.vmem [resolvable:$true] %s5611_s13 }
0x125b   : > { %s7278_s17 = scalar_lea.vmem %s5612_s13, 1024  ;;  %p7285_p12 = scmp.lt.s32.totalorder %s5612_s13, %s5612_s13 }
0x125c   : > { %p7279_p1 = scmp.ne.s32.totalorder %s5612_s13, %s7278_s17  ;;  %p7286_p13 = scmp.lt.s32.totalorder %s7278_s17, %s7278_s17 }
0x125e   : > { %p7280_p9 = pnand %p7279_p1, %p6689_p0  ;;  %p7287_p3 = por %p7286_p13, %p7285_p12 }
0x1260   : > { %p7281_p10 = pneg %p7280_p9 }
0x1262   : > { %p7288_p2 = pnand %p7287_p3, %p7281_p10 }
0x1264   : > { %7291 = shalt.err (!%p7288_p2)
}
0x1265   : > { %s7389_s21 = smov 128   ;;  %s7390_s25 = smov 8  }
0x1266   : > { %6663 = dma.vmem_to_hbm [thread:$0]  (%p6689_p0), %s5612_s13, 1024, %s9023_s8, [#allocation5], %s7389_s21, %s7389_s21, %s7390_s25  }
0x1267   : > { %7343 = dma.done.wait (%p6689_p0), [#allocation5], 1024  }
0x1268   : > { %7345 = vsyncadd (%p6689_p0), [#allocation5], 4294966272 }
0x1269 PF: > { %s9068_s23 = sld [smem:[#allocation21_spill]]  ;;  %s9072_s27 = smov %s7352_s28 }
0x126a   : > { %s9069_s24 = sld [smem:[#allocation20_spill]]  ;;  %s9074_s30 = smov %s7364_s9 }
0x126b   : > { %s9070_s29 = sld [smem:[#allocation23_spill]] }
0x126c   : > { %s9071_s14 = sld [smem:[#allocation22_spill]] }
0x126f   : > { %s29_s10 = sadd.s32 1, %s9068_s23  }
0x1270   : > { %p26_p4 = scmp.ge.s32.totalorder %s29_s10, 4   ;;  %s9073_s28 = smov %s9069_s24 }
0x1272   : > { %s9075_s9 = smov %s9071_s14  ;;  %28 = sbr.rel (!%p26_p4) target bundleno = 15 (0xf), region = 155 }
0x1277   :  { %5627 = vsyncpa [#allocation4], 1 }
0x1278   :  { %5629 = vsyncpa [#allocation4 + $0x1], 1 }
0x1279   :  { %5630 = vsyncpa [#allocation7], 1 }
0x127a   :  { %5632 = vsyncpa [#allocation7 + $0x1], 1 }
0x127b   :  { %5633 = vsyncpa [#allocation10], 1 }
0x127c   :  { %5635 = vsyncpa [#allocation10 + $0x1], 1 }
0x127d   :  { %5636 = vsyncpa [#allocation13], 1 }
0x127e   :  { %5638 = vsyncpa [#allocation13 + $0x1], 1 }
0x127f   :  { %5639 = vsyncpa [#allocation5], 1 }
0x1280   :  { %5641 = vsyncpa [#allocation5 + $0x1], 1 }

</bundles_post_ra>
